<compile_context>
chip_gen: v5e
topology: v5e:2x2
jax: 0.10.0
libtpu: 0.0.40
codegen_flags: <defaults>
</compile_context>

<pallas_src>
import functools

import jax
import jax.numpy as jnp
from jax.experimental import pallas as pl
from jax.experimental.pallas import tpu as pltpu


# TODO(synk): attn_mask is None for the VisionTransformer; an additive (L, L)
# mask could be supported by passing one extra input added to the scores.
def _block_kernel(x_ref, ln1w_ref, ln1b_ref, wqkv_ref, bqkv_ref, wo_ref, bo_ref,
                  ln2w_ref, ln2b_ref, w1_ref, b1_ref, w2_ref, b2_ref,
                  o_ref, attn_sc, *, n_head, eps=1e-5):
    B, L, E = x_ref.shape                 # (B_TILE, L, E) block
    D = E // n_head
    M = B * L
    scale = 1.0 / float(D) ** 0.5
    bf16 = jnp.bfloat16

    # Leading-dim merge only (lane dim untouched) -> one tall slab for projections.
    x = x_ref[...].astype(jnp.float32).reshape(M, E)

    def layer_norm(v, w_ref, b_ref):      # fp32 statistics (LayerNorm subclass)
        mu = jnp.mean(v, axis=-1, keepdims=True)
        var = jnp.mean(jnp.square(v - mu), axis=-1, keepdims=True)
        return (v - mu) * jax.lax.rsqrt(var + eps) * w_ref[...] + b_ref[...]

    # ---------------- attention branch ----------------
    h = layer_norm(x, ln1w_ref, ln1b_ref)
    qkv = jnp.dot(h.astype(bf16), wqkv_ref[...],
                  preferred_element_type=jnp.float32) + bqkv_ref[...]
    q = qkv[:, :E]
    k = qkv[:, E:2 * E]
    v = qkv[:, 2 * E:]

    # Per-head lane slices, each head batched over the B_TILE sequences.
    for hh in range(n_head):
        lo, hi = hh * D, (hh + 1) * D
        qh = (q[:, lo:hi] * scale).reshape(B, L, D).astype(bf16)
        kh = k[:, lo:hi].reshape(B, L, D).astype(bf16)
        vh = v[:, lo:hi].reshape(B, L, D).astype(bf16)
        s = jnp.einsum("bld,bmd->blm", qh, kh,
                       preferred_element_type=jnp.float32)          # (B, L, L)
        s = s - jnp.max(s, axis=-1, keepdims=True)
        p = jnp.exp(s)
        p = p * pl.reciprocal(jnp.sum(p, axis=-1, keepdims=True), approx=True)
        oh = jnp.einsum("blm,bmd->bld", p.astype(bf16), vh,
                        preferred_element_type=jnp.float32)          # (B, L, D)
        # Lane-dense write into the (M, E) scratch -> no concatenate.
        attn_sc[:, lo:hi] = oh.reshape(M, D)

    attn = jnp.dot(attn_sc[...].astype(bf16), wo_ref[...],
                   preferred_element_type=jnp.float32)
    x = x + attn + bo_ref[...]

    # ---------------- MLP branch ----------------
    h2 = layer_norm(x, ln2w_ref, ln2b_ref)
    m = jnp.dot(h2.astype(bf16), w1_ref[...],
                preferred_element_type=jnp.float32) + b1_ref[...]
    m = m * jax.nn.sigmoid(1.702 * m)                 # QuickGELU (fp32)
    m = jnp.dot(m.astype(bf16), w2_ref[...],
                preferred_element_type=jnp.float32) + b2_ref[...]
    x = x + m

    o_ref[...] = x.reshape(B, L, E).astype(o_ref.dtype)


def _pick_b_tile(n, max_tile=8):
    """Largest divisor of n not exceeding max_tile (sequences per grid step)."""
    for t in range(min(n, max_tile), 0, -1):
        if n % t == 0:
            return t
    return 1


def residual_attention_block(x_nle, p, n_head, *, b_tile=None):
    """One CLIP ResidualAttentionBlock on a batch-major (N, L, E) slab.

    PyTorch runs the block on (L, N, E); the permutes before/after the
    transformer cancel, so batch-major is mathematically identical and we skip
    both HBM transposes.
    """
    N, L, E = x_nle.shape
    if b_tile is None:
        b_tile = _pick_b_tile(N)
    assert N % b_tile == 0

    to_bf16 = lambda a: a.astype(jnp.bfloat16)
    weights = (
        p["ln1_w"], p["ln1_b"],
        to_bf16(p["wqkv"]), p["bqkv"],
        to_bf16(p["wo"]), p["bo"],
        p["ln2_w"], p["ln2_b"],
        to_bf16(p["w1"]), p["b1"],
        to_bf16(p["w2"]), p["b2"],
    )

    def full(a):                           # whole-array (constant-index) spec
        return pl.BlockSpec(a.shape, lambda i, _nd=a.ndim: (0,) * _nd)

    kernel = functools.partial(_block_kernel, n_head=n_head)
    return pl.pallas_call(
        kernel,
        out_shape=jax.ShapeDtypeStruct((N, L, E), x_nle.dtype),
        grid_spec=pltpu.PrefetchScalarGridSpec(
            num_scalar_prefetch=0,
            grid=(N // b_tile,),
            in_specs=[pl.BlockSpec((b_tile, L, E), lambda i: (i, 0, 0))]
                     + [full(w) for w in weights],
            out_specs=pl.BlockSpec((b_tile, L, E), lambda i: (i, 0, 0)),
            scratch_shapes=[pltpu.VMEM((b_tile * L, E), jnp.float32)],
        ),
        compiler_params=pltpu.CompilerParams(
            dimension_semantics=("parallel",),
            vmem_limit_bytes=48 * 1024 * 1024,   # headroom below v7x's 64 MiB
        ),
    )(x_nle, *weights)


# ---------------------------------------------------------------------------
# Full VisionTransformer forward (pre/post work in plain JAX, blocks in Pallas)
# ---------------------------------------------------------------------------
def _layer_norm(x, w, b, eps=1e-5):
    x32 = x.astype(jnp.float32)
    mu = x32.mean(-1, keepdims=True)
    var = ((x32 - mu) ** 2).mean(-1, keepdims=True)
    return ((x32 - mu) * jax.lax.rsqrt(var + eps) * w + b).astype(x.dtype)


def _patch_embed(x_img, params):
    """Conv2d(3, width, k=P, s=P, bias=False) + class token + pos emb + ln_pre."""
    N, C, R, _ = x_img.shape
    width, _, P, _ = params["conv_w"].shape
    Hp = R // P
    xp = x_img.reshape(N, C, Hp, P, Hp, P).transpose(0, 2, 4, 1, 3, 5)
    xp = xp.reshape(N, Hp * Hp, C * P * P)
    x = xp @ params["conv_w"].reshape(width, C * P * P).T        # (N, patches, width)
    cls = jnp.broadcast_to(params["class_emb"], (N, 1, width)).astype(x.dtype)
    x = jnp.concatenate([cls, x], axis=1) + params["pos_emb"]
    return _layer_norm(x, params["ln_pre_w"], params["ln_pre_b"])


def vision_transformer_forward(x_img, params, *, n_head, block_fn=None):
    # TODO(synk): patch-embedding conv, token/positional embedding, ln_pre/ln_post
    # and the final projection are tiny per-token ops left to XLA; all the FLOPs
    # (the transformer blocks) run in the Pallas kernel.
    if block_fn is None:
        block_fn = residual_attention_block
    x = _patch_embed(x_img, params)                   # (N, L, width), batch-major
    for blk in params["blocks"]:
        x = block_fn(x, blk, n_head)
    x = _layer_norm(x[:, 0, :], params["ln_post_w"], params["ln_post_b"])
    return x @ params["proj"]


# ---------------------------------------------------------------------------
# Pure-JAX fp32 reference of one block (for validation)
# ---------------------------------------------------------------------------
def _reference_block(x, p, n_head, eps=1e-5):
    N, L, E = x.shape
    D = E // n_head
    h = _layer_norm(x, p["ln1_w"][0], p["ln1_b"][0], eps)
    qkv = h @ p["wqkv"] + p["bqkv"][0]
    q, k, v = jnp.split(qkv, 3, axis=-1)

    def heads(t):  # (N, L, E) -> (N, H, L, D)
        return t.reshape(N, L, n_head, D).transpose(0, 2, 1, 3)

    qh, kh, vh = heads(q), heads(k), heads(v)
    s = jnp.einsum("nhld,nhmd->nhlm", qh, kh) * (1.0 / float(D) ** 0.5)
    a = jax.nn.softmax(s, axis=-1)
    o = jnp.einsum("nhlm,nhmd->nhld", a, vh).transpose(0, 2, 1, 3).reshape(N, L, E)
    x = x + o @ p["wo"] + p["bo"][0]
    h2 = _layer_norm(x, p["ln2_w"][0], p["ln2_b"][0], eps)
    m = h2 @ p["w1"] + p["b1"][0]
    m = m * jax.nn.sigmoid(1.702 * m)
    return x + m @ p["w2"] + p["b2"][0]


# ---------------------------------------------------------------------------
# Deterministic synthetic parameters (weights already transposed for x @ W)
# ---------------------------------------------------------------------------
def init_vit_params(key, *, width, layers, heads, patch_size, input_resolution,
                    output_dim):
    del heads  # head count does not change parameter shapes
    num_patches = (input_resolution // patch_size) ** 2
    L = num_patches + 1
    scale = width ** -0.5
    keys = iter(jax.random.split(key, 4 + 8 * layers))
    nrm = lambda shape, s=0.02: s * jax.random.normal(next(keys), shape, jnp.float32)

    blocks = []
    for _ in range(layers):
        blocks.append({
            "ln1_w": jnp.ones((1, width), jnp.float32),
            "ln1_b": jnp.zeros((1, width), jnp.float32),
            "wqkv": nrm((width, 3 * width)),    # in_proj_weight.T
            "bqkv": nrm((1, 3 * width)),        # in_proj_bias
            "wo": nrm((width, width)),          # out_proj.weight.T
            "bo": nrm((1, width)),
            "ln2_w": jnp.ones((1, width), jnp.float32),
            "ln2_b": jnp.zeros((1, width), jnp.float32),
            "w1": nrm((width, 4 * width)),      # c_fc.weight.T
            "b1": nrm((1, 4 * width)),
            "w2": nrm((4 * width, width)),      # c_proj.weight.T
            "b2": nrm((1, width)),
        })

    return {
        "conv_w": nrm((width, 3, patch_size, patch_size), 0.05),
        "class_emb": nrm((width,), scale),
        "pos_emb": nrm((L, width), scale),
        "ln_pre_w": jnp.ones((width,), jnp.float32),
        "ln_pre_b": jnp.zeros((width,), jnp.float32),
        "ln_post_w": jnp.ones((width,), jnp.float32),
        "ln_post_b": jnp.zeros((width,), jnp.float32),
        "proj": nrm((width, output_dim), scale),
        "blocks": blocks,
    }


if __name__ == "__main__":
    input_resolution, patch_size = 16, 4       # -> 16 patches + 1 class = 17 tokens
    width, layers, heads, output_dim = 32, 2, 4, 16
    batch = 2

    key = jax.random.PRNGKey(0)
    k_x, k_p = jax.random.split(key)
    x_img = jax.random.normal(k_x, (batch, 3, input_resolution, input_resolution),
                              jnp.float32)
    params = init_vit_params(k_p, width=width, layers=layers, heads=heads,
                             patch_size=patch_size,
                             input_resolution=input_resolution,
                             output_dim=output_dim)

    fwd = jax.jit(functools.partial(vision_transformer_forward, n_head=heads))
    out = jax.block_until_ready(fwd(x_img, params))

    ref = vision_transformer_forward(x_img, params, n_head=heads,
                                     block_fn=_reference_block)
    assert out.shape == (batch, output_dim)
    assert jnp.allclose(out, ref, atol=1e-2, rtol=1e-2), "mismatch vs JAX reference"

    print("KERNEL_OK")
</pallas_src>

<mosaic_0001>
module attributes {stable_mosaic.version = 11 : i64} {
  func.func @_block_kernel(%arg0: i32, %arg1: memref<2x17x32xf32, #tpu.memory_space<vmem>>, %arg2: memref<1x32xf32, #tpu.memory_space<vmem>>, %arg3: memref<1x32xf32, #tpu.memory_space<vmem>>, %arg4: memref<32x96xbf16, #tpu.memory_space<vmem>>, %arg5: memref<1x96xf32, #tpu.memory_space<vmem>>, %arg6: memref<32x32xbf16, #tpu.memory_space<vmem>>, %arg7: memref<1x32xf32, #tpu.memory_space<vmem>>, %arg8: memref<1x32xf32, #tpu.memory_space<vmem>>, %arg9: memref<1x32xf32, #tpu.memory_space<vmem>>, %arg10: memref<32x128xbf16, #tpu.memory_space<vmem>>, %arg11: memref<1x128xf32, #tpu.memory_space<vmem>>, %arg12: memref<128x32xbf16, #tpu.memory_space<vmem>>, %arg13: memref<1x32xf32, #tpu.memory_space<vmem>>, %arg14: memref<2x17x32xf32, #tpu.memory_space<vmem>>, %arg15: memref<34x32xf32, #tpu.memory_space<vmem>>) attributes {dimension_semantics = [#tpu.dimension_semantics<parallel>], iteration_bounds = array<i64: 1>, scalar_prefetch = 0 : i64, scratch_operands = 1 : i64, tpu.core_type = #tpu.core_type<tc>, window_params = [{transform_indices = @transform_0, window_bounds = array<i64: 2, 17, 32>}, {pipeline_mode = #tpu.pipeline_mode<synchronous>, transform_indices = @transform_1, window_bounds = array<i64: 1, 32>}, {pipeline_mode = #tpu.pipeline_mode<synchronous>, transform_indices = @transform_2, window_bounds = array<i64: 1, 32>}, {pipeline_mode = #tpu.pipeline_mode<synchronous>, transform_indices = @transform_3, window_bounds = array<i64: 32, 96>}, {pipeline_mode = #tpu.pipeline_mode<synchronous>, transform_indices = @transform_4, window_bounds = array<i64: 1, 96>}, {pipeline_mode = #tpu.pipeline_mode<synchronous>, transform_indices = @transform_5, window_bounds = array<i64: 32, 32>}, {pipeline_mode = #tpu.pipeline_mode<synchronous>, transform_indices = @transform_6, window_bounds = array<i64: 1, 32>}, {pipeline_mode = #tpu.pipeline_mode<synchronous>, transform_indices = @transform_7, window_bounds = array<i64: 1, 32>}, {pipeline_mode = #tpu.pipeline_mode<synchronous>, transform_indices = @transform_8, window_bounds = array<i64: 1, 32>}, {pipeline_mode = #tpu.pipeline_mode<synchronous>, transform_indices = @transform_9, window_bounds = array<i64: 32, 128>}, {pipeline_mode = #tpu.pipeline_mode<synchronous>, transform_indices = @transform_10, window_bounds = array<i64: 1, 128>}, {pipeline_mode = #tpu.pipeline_mode<synchronous>, transform_indices = @transform_11, window_bounds = array<i64: 128, 32>}, {pipeline_mode = #tpu.pipeline_mode<synchronous>, transform_indices = @transform_12, window_bounds = array<i64: 1, 32>}, {transform_indices = @transform_13, window_bounds = array<i64: 2, 17, 32>}]} {
    %c0 = arith.constant 0 : index
    %c0_0 = arith.constant 0 : index
    %c0_1 = arith.constant 0 : index
    %0 = vector.load %arg1[%c0, %c0_0, %c0_1] : memref<2x17x32xf32, #tpu.memory_space<vmem>>, vector<2x17x32xf32>
    %1 = vector.shape_cast %0 : vector<2x17x32xf32> to vector<34x32xf32>
    %cst = arith.constant dense<0.000000e+00> : vector<34xf32>
    %2 = vector.multi_reduction <add>, %1, %cst [1] : vector<34x32xf32> to vector<34xf32>
    %3 = vector.shape_cast %2 : vector<34xf32> to vector<34x1xf32>
    %cst_2 = arith.constant 3.200000e+01 : f32
    %4 = vector.broadcast %cst_2 : f32 to vector<34x1xf32>
    %5 = arith.divf %3, %4 : vector<34x1xf32>
    %6 = vector.broadcast %5 : vector<34x1xf32> to vector<34x32xf32>
    %7 = arith.subf %1, %6 : vector<34x32xf32>
    %8 = arith.mulf %7, %7 : vector<34x32xf32>
    %cst_3 = arith.constant dense<0.000000e+00> : vector<34xf32>
    %9 = vector.multi_reduction <add>, %8, %cst_3 [1] : vector<34x32xf32> to vector<34xf32>
    %10 = vector.shape_cast %9 : vector<34xf32> to vector<34x1xf32>
    %cst_4 = arith.constant 3.200000e+01 : f32
    %11 = vector.broadcast %cst_4 : f32 to vector<34x1xf32>
    %12 = arith.divf %10, %11 : vector<34x1xf32>
    %13 = vector.broadcast %5 : vector<34x1xf32> to vector<34x32xf32>
    %14 = arith.subf %1, %13 : vector<34x32xf32>
    %cst_5 = arith.constant 9.99999974E-6 : f32
    %15 = vector.broadcast %cst_5 : f32 to vector<34x1xf32>
    %16 = arith.addf %12, %15 : vector<34x1xf32>
    %17 = math.rsqrt %16 : vector<34x1xf32>
    %18 = vector.broadcast %17 : vector<34x1xf32> to vector<34x32xf32>
    %19 = arith.mulf %14, %18 : vector<34x32xf32>
    %c0_6 = arith.constant 0 : index
    %c0_7 = arith.constant 0 : index
    %20 = vector.load %arg2[%c0_6, %c0_7] : memref<1x32xf32, #tpu.memory_space<vmem>>, vector<1x32xf32>
    %21 = vector.broadcast %20 : vector<1x32xf32> to vector<34x32xf32>
    %22 = arith.mulf %19, %21 : vector<34x32xf32>
    %c0_8 = arith.constant 0 : index
    %c0_9 = arith.constant 0 : index
    %23 = vector.load %arg3[%c0_8, %c0_9] : memref<1x32xf32, #tpu.memory_space<vmem>>, vector<1x32xf32>
    %24 = vector.broadcast %23 : vector<1x32xf32> to vector<34x32xf32>
    %25 = arith.addf %22, %24 : vector<34x32xf32>
    %26 = arith.truncf %25 : vector<34x32xf32> to vector<34x32xbf16>
    %c0_10 = arith.constant 0 : index
    %c0_11 = arith.constant 0 : index
    %27 = vector.load %arg4[%c0_10, %c0_11] : memref<32x96xbf16, #tpu.memory_space<vmem>>, vector<32x96xbf16>
    %cst_12 = arith.constant dense<0.000000e+00> : vector<34x96xf32>
    %28 = tpu.matmul %26, %27, %cst_12 {dimension_numbers = #tpu.dot_dimension_numbers<[1], [0], [0], [1], [0, 0, 1, 1], [], []>} : vector<34x32xbf16>, vector<32x96xbf16>, vector<34x96xf32> -> vector<34x96xf32>
    %c0_13 = arith.constant 0 : index
    %c0_14 = arith.constant 0 : index
    %29 = vector.load %arg5[%c0_13, %c0_14] : memref<1x96xf32, #tpu.memory_space<vmem>>, vector<1x96xf32>
    %30 = vector.broadcast %29 : vector<1x96xf32> to vector<34x96xf32>
    %31 = arith.addf %28, %30 : vector<34x96xf32>
    %32 = vector.extract_strided_slice %31 {offsets = [0, 0], sizes = [34, 32], strides = [1, 1]} : vector<34x96xf32> to vector<34x32xf32>
    %33 = vector.extract_strided_slice %31 {offsets = [0, 32], sizes = [34, 32], strides = [1, 1]} : vector<34x96xf32> to vector<34x32xf32>
    %34 = vector.extract_strided_slice %31 {offsets = [0, 64], sizes = [34, 32], strides = [1, 1]} : vector<34x96xf32> to vector<34x32xf32>
    %35 = vector.extract_strided_slice %32 {offsets = [0, 0], sizes = [34, 8], strides = [1, 1]} : vector<34x32xf32> to vector<34x8xf32>
    %cst_15 = arith.constant 0.353553385 : f32
    %36 = vector.broadcast %cst_15 : f32 to vector<34x8xf32>
    %37 = arith.mulf %35, %36 : vector<34x8xf32>
    %38 = vector.shape_cast %37 : vector<34x8xf32> to vector<2x17x8xf32>
    %39 = arith.truncf %38 : vector<2x17x8xf32> to vector<2x17x8xbf16>
    %40 = vector.extract_strided_slice %33 {offsets = [0, 0], sizes = [34, 8], strides = [1, 1]} : vector<34x32xf32> to vector<34x8xf32>
    %41 = vector.shape_cast %40 : vector<34x8xf32> to vector<2x17x8xf32>
    %42 = arith.truncf %41 : vector<2x17x8xf32> to vector<2x17x8xbf16>
    %43 = vector.extract_strided_slice %34 {offsets = [0, 0], sizes = [34, 8], strides = [1, 1]} : vector<34x32xf32> to vector<34x8xf32>
    %44 = vector.shape_cast %43 : vector<34x8xf32> to vector<2x17x8xf32>
    %45 = arith.truncf %44 : vector<2x17x8xf32> to vector<2x17x8xbf16>
    "tpu.trace_start"() <{level = 10 : i32, message = "bld,bmd->blm"}> : () -> ()
    %cst_16 = arith.constant dense<0.000000e+00> : vector<2x17x17xf32>
    %46 = tpu.matmul %39, %42, %cst_16 {dimension_numbers = #tpu.dot_dimension_numbers<[2], [2], [1], [1], [0, 0, 0, 1, 1, 1], [0], [0]>} : vector<2x17x8xbf16>, vector<2x17x8xbf16>, vector<2x17x17xf32> -> vector<2x17x17xf32>
    "tpu.trace_stop"() : () -> ()
    %cst_17 = arith.constant dense<0xFF800000> : vector<2x17xf32>
    %47 = vector.multi_reduction <maximumf>, %46, %cst_17 [2] : vector<2x17x17xf32> to vector<2x17xf32>
    %48 = vector.shape_cast %47 : vector<2x17xf32> to vector<2x17x1xf32>
    %49 = vector.broadcast %48 : vector<2x17x1xf32> to vector<2x17x17xf32>
    %50 = arith.subf %46, %49 : vector<2x17x17xf32>
    %51 = math.exp %50 : vector<2x17x17xf32>
    %cst_18 = arith.constant dense<0.000000e+00> : vector<2x17xf32>
    %52 = vector.multi_reduction <add>, %51, %cst_18 [2] : vector<2x17x17xf32> to vector<2x17xf32>
    %53 = vector.shape_cast %52 : vector<2x17xf32> to vector<2x17x1xf32>
    %54 = tpu.reciprocal %53 {approx = true} : vector<2x17x1xf32> -> vector<2x17x1xf32>
    %55 = vector.broadcast %54 : vector<2x17x1xf32> to vector<2x17x17xf32>
    %56 = arith.mulf %51, %55 : vector<2x17x17xf32>
    %57 = arith.truncf %56 : vector<2x17x17xf32> to vector<2x17x17xbf16>
    "tpu.trace_start"() <{level = 10 : i32, message = "blm,bmd->bld"}> : () -> ()
    %cst_19 = arith.constant dense<0.000000e+00> : vector<2x17x8xf32>
    %58 = tpu.matmul %57, %45, %cst_19 {dimension_numbers = #tpu.dot_dimension_numbers<[2], [1], [1], [2], [0, 0, 0, 1, 1, 2], [0], [0]>} : vector<2x17x17xbf16>, vector<2x17x8xbf16>, vector<2x17x8xf32> -> vector<2x17x8xf32>
    "tpu.trace_stop"() : () -> ()
    %59 = vector.shape_cast %58 : vector<2x17x8xf32> to vector<34x8xf32>
    %c0_20 = arith.constant 0 : index
    %c0_21 = arith.constant 0 : index
    %60 = vector.load %arg15[%c0_20, %c0_21] : memref<34x32xf32, #tpu.memory_space<vmem>>, vector<34x8xf32>
    tpu.vector_store %arg15[%c0_20, %c0_21], %59 {strides = array<i32>} : memref<34x32xf32, #tpu.memory_space<vmem>>, vector<34x8xf32>,
    %61 = vector.extract_strided_slice %32 {offsets = [0, 8], sizes = [34, 8], strides = [1, 1]} : vector<34x32xf32> to vector<34x8xf32>
    %cst_22 = arith.constant 0.353553385 : f32
    %62 = vector.broadcast %cst_22 : f32 to vector<34x8xf32>
    %63 = arith.mulf %61, %62 : vector<34x8xf32>
    %64 = vector.shape_cast %63 : vector<34x8xf32> to vector<2x17x8xf32>
    %65 = arith.truncf %64 : vector<2x17x8xf32> to vector<2x17x8xbf16>
    %66 = vector.extract_strided_slice %33 {offsets = [0, 8], sizes = [34, 8], strides = [1, 1]} : vector<34x32xf32> to vector<34x8xf32>
    %67 = vector.shape_cast %66 : vector<34x8xf32> to vector<2x17x8xf32>
    %68 = arith.truncf %67 : vector<2x17x8xf32> to vector<2x17x8xbf16>
    %69 = vector.extract_strided_slice %34 {offsets = [0, 8], sizes = [34, 8], strides = [1, 1]} : vector<34x32xf32> to vector<34x8xf32>
    %70 = vector.shape_cast %69 : vector<34x8xf32> to vector<2x17x8xf32>
    %71 = arith.truncf %70 : vector<2x17x8xf32> to vector<2x17x8xbf16>
    "tpu.trace_start"() <{level = 10 : i32, message = "bld,bmd->blm"}> : () -> ()
    %cst_23 = arith.constant dense<0.000000e+00> : vector<2x17x17xf32>
    %72 = tpu.matmul %65, %68, %cst_23 {dimension_numbers = #tpu.dot_dimension_numbers<[2], [2], [1], [1], [0, 0, 0, 1, 1, 1], [0], [0]>} : vector<2x17x8xbf16>, vector<2x17x8xbf16>, vector<2x17x17xf32> -> vector<2x17x17xf32>
    "tpu.trace_stop"() : () -> ()
    %cst_24 = arith.constant dense<0xFF800000> : vector<2x17xf32>
    %73 = vector.multi_reduction <maximumf>, %72, %cst_24 [2] : vector<2x17x17xf32> to vector<2x17xf32>
    %74 = vector.shape_cast %73 : vector<2x17xf32> to vector<2x17x1xf32>
    %75 = vector.broadcast %74 : vector<2x17x1xf32> to vector<2x17x17xf32>
    %76 = arith.subf %72, %75 : vector<2x17x17xf32>
    %77 = math.exp %76 : vector<2x17x17xf32>
    %cst_25 = arith.constant dense<0.000000e+00> : vector<2x17xf32>
    %78 = vector.multi_reduction <add>, %77, %cst_25 [2] : vector<2x17x17xf32> to vector<2x17xf32>
    %79 = vector.shape_cast %78 : vector<2x17xf32> to vector<2x17x1xf32>
    %80 = tpu.reciprocal %79 {approx = true} : vector<2x17x1xf32> -> vector<2x17x1xf32>
    %81 = vector.broadcast %80 : vector<2x17x1xf32> to vector<2x17x17xf32>
    %82 = arith.mulf %77, %81 : vector<2x17x17xf32>
    %83 = arith.truncf %82 : vector<2x17x17xf32> to vector<2x17x17xbf16>
    "tpu.trace_start"() <{level = 10 : i32, message = "blm,bmd->bld"}> : () -> ()
    %cst_26 = arith.constant dense<0.000000e+00> : vector<2x17x8xf32>
    %84 = tpu.matmul %83, %71, %cst_26 {dimension_numbers = #tpu.dot_dimension_numbers<[2], [1], [1], [2], [0, 0, 0, 1, 1, 2], [0], [0]>} : vector<2x17x17xbf16>, vector<2x17x8xbf16>, vector<2x17x8xf32> -> vector<2x17x8xf32>
    "tpu.trace_stop"() : () -> ()
    %85 = vector.shape_cast %84 : vector<2x17x8xf32> to vector<34x8xf32>
    %c0_27 = arith.constant 0 : index
    %c8 = arith.constant 8 : index
    %86 = vector.load %arg15[%c0_27, %c8] : memref<34x32xf32, #tpu.memory_space<vmem>>, vector<34x8xf32>
    tpu.vector_store %arg15[%c0_27, %c8], %85 {strides = array<i32>} : memref<34x32xf32, #tpu.memory_space<vmem>>, vector<34x8xf32>,
    %87 = vector.extract_strided_slice %32 {offsets = [0, 16], sizes = [34, 8], strides = [1, 1]} : vector<34x32xf32> to vector<34x8xf32>
    %cst_28 = arith.constant 0.353553385 : f32
    %88 = vector.broadcast %cst_28 : f32 to vector<34x8xf32>
    %89 = arith.mulf %87, %88 : vector<34x8xf32>
    %90 = vector.shape_cast %89 : vector<34x8xf32> to vector<2x17x8xf32>
    %91 = arith.truncf %90 : vector<2x17x8xf32> to vector<2x17x8xbf16>
    %92 = vector.extract_strided_slice %33 {offsets = [0, 16], sizes = [34, 8], strides = [1, 1]} : vector<34x32xf32> to vector<34x8xf32>
    %93 = vector.shape_cast %92 : vector<34x8xf32> to vector<2x17x8xf32>
    %94 = arith.truncf %93 : vector<2x17x8xf32> to vector<2x17x8xbf16>
    %95 = vector.extract_strided_slice %34 {offsets = [0, 16], sizes = [34, 8], strides = [1, 1]} : vector<34x32xf32> to vector<34x8xf32>
    %96 = vector.shape_cast %95 : vector<34x8xf32> to vector<2x17x8xf32>
    %97 = arith.truncf %96 : vector<2x17x8xf32> to vector<2x17x8xbf16>
    "tpu.trace_start"() <{level = 10 : i32, message = "bld,bmd->blm"}> : () -> ()
    %cst_29 = arith.constant dense<0.000000e+00> : vector<2x17x17xf32>
    %98 = tpu.matmul %91, %94, %cst_29 {dimension_numbers = #tpu.dot_dimension_numbers<[2], [2], [1], [1], [0, 0, 0, 1, 1, 1], [0], [0]>} : vector<2x17x8xbf16>, vector<2x17x8xbf16>, vector<2x17x17xf32> -> vector<2x17x17xf32>
    "tpu.trace_stop"() : () -> ()
    %cst_30 = arith.constant dense<0xFF800000> : vector<2x17xf32>
    %99 = vector.multi_reduction <maximumf>, %98, %cst_30 [2] : vector<2x17x17xf32> to vector<2x17xf32>
    %100 = vector.shape_cast %99 : vector<2x17xf32> to vector<2x17x1xf32>
    %101 = vector.broadcast %100 : vector<2x17x1xf32> to vector<2x17x17xf32>
    %102 = arith.subf %98, %101 : vector<2x17x17xf32>
    %103 = math.exp %102 : vector<2x17x17xf32>
    %cst_31 = arith.constant dense<0.000000e+00> : vector<2x17xf32>
    %104 = vector.multi_reduction <add>, %103, %cst_31 [2] : vector<2x17x17xf32> to vector<2x17xf32>
    %105 = vector.shape_cast %104 : vector<2x17xf32> to vector<2x17x1xf32>
    %106 = tpu.reciprocal %105 {approx = true} : vector<2x17x1xf32> -> vector<2x17x1xf32>
    %107 = vector.broadcast %106 : vector<2x17x1xf32> to vector<2x17x17xf32>
    %108 = arith.mulf %103, %107 : vector<2x17x17xf32>
    %109 = arith.truncf %108 : vector<2x17x17xf32> to vector<2x17x17xbf16>
    "tpu.trace_start"() <{level = 10 : i32, message = "blm,bmd->bld"}> : () -> ()
    %cst_32 = arith.constant dense<0.000000e+00> : vector<2x17x8xf32>
    %110 = tpu.matmul %109, %97, %cst_32 {dimension_numbers = #tpu.dot_dimension_numbers<[2], [1], [1], [2], [0, 0, 0, 1, 1, 2], [0], [0]>} : vector<2x17x17xbf16>, vector<2x17x8xbf16>, vector<2x17x8xf32> -> vector<2x17x8xf32>
    "tpu.trace_stop"() : () -> ()
    %111 = vector.shape_cast %110 : vector<2x17x8xf32> to vector<34x8xf32>
    %c0_33 = arith.constant 0 : index
    %c16 = arith.constant 16 : index
    %112 = vector.load %arg15[%c0_33, %c16] : memref<34x32xf32, #tpu.memory_space<vmem>>, vector<34x8xf32>
    tpu.vector_store %arg15[%c0_33, %c16], %111 {strides = array<i32>} : memref<34x32xf32, #tpu.memory_space<vmem>>, vector<34x8xf32>,
    %113 = vector.extract_strided_slice %32 {offsets = [0, 24], sizes = [34, 8], strides = [1, 1]} : vector<34x32xf32> to vector<34x8xf32>
    %cst_34 = arith.constant 0.353553385 : f32
    %114 = vector.broadcast %cst_34 : f32 to vector<34x8xf32>
    %115 = arith.mulf %113, %114 : vector<34x8xf32>
    %116 = vector.shape_cast %115 : vector<34x8xf32> to vector<2x17x8xf32>
    %117 = arith.truncf %116 : vector<2x17x8xf32> to vector<2x17x8xbf16>
    %118 = vector.extract_strided_slice %33 {offsets = [0, 24], sizes = [34, 8], strides = [1, 1]} : vector<34x32xf32> to vector<34x8xf32>
    %119 = vector.shape_cast %118 : vector<34x8xf32> to vector<2x17x8xf32>
    %120 = arith.truncf %119 : vector<2x17x8xf32> to vector<2x17x8xbf16>
    %121 = vector.extract_strided_slice %34 {offsets = [0, 24], sizes = [34, 8], strides = [1, 1]} : vector<34x32xf32> to vector<34x8xf32>
    %122 = vector.shape_cast %121 : vector<34x8xf32> to vector<2x17x8xf32>
    %123 = arith.truncf %122 : vector<2x17x8xf32> to vector<2x17x8xbf16>
    "tpu.trace_start"() <{level = 10 : i32, message = "bld,bmd->blm"}> : () -> ()
    %cst_35 = arith.constant dense<0.000000e+00> : vector<2x17x17xf32>
    %124 = tpu.matmul %117, %120, %cst_35 {dimension_numbers = #tpu.dot_dimension_numbers<[2], [2], [1], [1], [0, 0, 0, 1, 1, 1], [0], [0]>} : vector<2x17x8xbf16>, vector<2x17x8xbf16>, vector<2x17x17xf32> -> vector<2x17x17xf32>
    "tpu.trace_stop"() : () -> ()
    %cst_36 = arith.constant dense<0xFF800000> : vector<2x17xf32>
    %125 = vector.multi_reduction <maximumf>, %124, %cst_36 [2] : vector<2x17x17xf32> to vector<2x17xf32>
    %126 = vector.shape_cast %125 : vector<2x17xf32> to vector<2x17x1xf32>
    %127 = vector.broadcast %126 : vector<2x17x1xf32> to vector<2x17x17xf32>
    %128 = arith.subf %124, %127 : vector<2x17x17xf32>
    %129 = math.exp %128 : vector<2x17x17xf32>
    %cst_37 = arith.constant dense<0.000000e+00> : vector<2x17xf32>
    %130 = vector.multi_reduction <add>, %129, %cst_37 [2] : vector<2x17x17xf32> to vector<2x17xf32>
    %131 = vector.shape_cast %130 : vector<2x17xf32> to vector<2x17x1xf32>
    %132 = tpu.reciprocal %131 {approx = true} : vector<2x17x1xf32> -> vector<2x17x1xf32>
    %133 = vector.broadcast %132 : vector<2x17x1xf32> to vector<2x17x17xf32>
    %134 = arith.mulf %129, %133 : vector<2x17x17xf32>
    %135 = arith.truncf %134 : vector<2x17x17xf32> to vector<2x17x17xbf16>
    "tpu.trace_start"() <{level = 10 : i32, message = "blm,bmd->bld"}> : () -> ()
    %cst_38 = arith.constant dense<0.000000e+00> : vector<2x17x8xf32>
    %136 = tpu.matmul %135, %123, %cst_38 {dimension_numbers = #tpu.dot_dimension_numbers<[2], [1], [1], [2], [0, 0, 0, 1, 1, 2], [0], [0]>} : vector<2x17x17xbf16>, vector<2x17x8xbf16>, vector<2x17x8xf32> -> vector<2x17x8xf32>
    "tpu.trace_stop"() : () -> ()
    %137 = vector.shape_cast %136 : vector<2x17x8xf32> to vector<34x8xf32>
    %c0_39 = arith.constant 0 : index
    %c24 = arith.constant 24 : index
    %138 = vector.load %arg15[%c0_39, %c24] : memref<34x32xf32, #tpu.memory_space<vmem>>, vector<34x8xf32>
    tpu.vector_store %arg15[%c0_39, %c24], %137 {strides = array<i32>} : memref<34x32xf32, #tpu.memory_space<vmem>>, vector<34x8xf32>,
    %c0_40 = arith.constant 0 : index
    %c0_41 = arith.constant 0 : index
    %139 = vector.load %arg15[%c0_40, %c0_41] : memref<34x32xf32, #tpu.memory_space<vmem>>, vector<34x32xf32>
    %140 = arith.truncf %139 : vector<34x32xf32> to vector<34x32xbf16>
    %c0_42 = arith.constant 0 : index
    %c0_43 = arith.constant 0 : index
    %141 = vector.load %arg6[%c0_42, %c0_43] : memref<32x32xbf16, #tpu.memory_space<vmem>>, vector<32x32xbf16>
    %cst_44 = arith.constant dense<0.000000e+00> : vector<34x32xf32>
    %142 = tpu.matmul %140, %141, %cst_44 {dimension_numbers = #tpu.dot_dimension_numbers<[1], [0], [0], [1], [0, 0, 1, 1], [], []>} : vector<34x32xbf16>, vector<32x32xbf16>, vector<34x32xf32> -> vector<34x32xf32>
    %143 = arith.addf %1, %142 : vector<34x32xf32>
    %c0_45 = arith.constant 0 : index
    %c0_46 = arith.constant 0 : index
    %144 = vector.load %arg7[%c0_45, %c0_46] : memref<1x32xf32, #tpu.memory_space<vmem>>, vector<1x32xf32>
    %145 = vector.broadcast %144 : vector<1x32xf32> to vector<34x32xf32>
    %146 = arith.addf %143, %145 : vector<34x32xf32>
    %cst_47 = arith.constant dense<0.000000e+00> : vector<34xf32>
    %147 = vector.multi_reduction <add>, %146, %cst_47 [1] : vector<34x32xf32> to vector<34xf32>
    %148 = vector.shape_cast %147 : vector<34xf32> to vector<34x1xf32>
    %cst_48 = arith.constant 3.200000e+01 : f32
    %149 = vector.broadcast %cst_48 : f32 to vector<34x1xf32>
    %150 = arith.divf %148, %149 : vector<34x1xf32>
    %151 = vector.broadcast %150 : vector<34x1xf32> to vector<34x32xf32>
    %152 = arith.subf %146, %151 : vector<34x32xf32>
    %153 = arith.mulf %152, %152 : vector<34x32xf32>
    %cst_49 = arith.constant dense<0.000000e+00> : vector<34xf32>
    %154 = vector.multi_reduction <add>, %153, %cst_49 [1] : vector<34x32xf32> to vector<34xf32>
    %155 = vector.shape_cast %154 : vector<34xf32> to vector<34x1xf32>
    %cst_50 = arith.constant 3.200000e+01 : f32
    %156 = vector.broadcast %cst_50 : f32 to vector<34x1xf32>
    %157 = arith.divf %155, %156 : vector<34x1xf32>
    %158 = vector.broadcast %150 : vector<34x1xf32> to vector<34x32xf32>
    %159 = arith.subf %146, %158 : vector<34x32xf32>
    %cst_51 = arith.constant 9.99999974E-6 : f32
    %160 = vector.broadcast %cst_51 : f32 to vector<34x1xf32>
    %161 = arith.addf %157, %160 : vector<34x1xf32>
    %162 = math.rsqrt %161 : vector<34x1xf32>
    %163 = vector.broadcast %162 : vector<34x1xf32> to vector<34x32xf32>
    %164 = arith.mulf %159, %163 : vector<34x32xf32>
    %c0_52 = arith.constant 0 : index
    %c0_53 = arith.constant 0 : index
    %165 = vector.load %arg8[%c0_52, %c0_53] : memref<1x32xf32, #tpu.memory_space<vmem>>, vector<1x32xf32>
    %166 = vector.broadcast %165 : vector<1x32xf32> to vector<34x32xf32>
    %167 = arith.mulf %164, %166 : vector<34x32xf32>
    %c0_54 = arith.constant 0 : index
    %c0_55 = arith.constant 0 : index
    %168 = vector.load %arg9[%c0_54, %c0_55] : memref<1x32xf32, #tpu.memory_space<vmem>>, vector<1x32xf32>
    %169 = vector.broadcast %168 : vector<1x32xf32> to vector<34x32xf32>
    %170 = arith.addf %167, %169 : vector<34x32xf32>
    %171 = arith.truncf %170 : vector<34x32xf32> to vector<34x32xbf16>
    %c0_56 = arith.constant 0 : index
    %c0_57 = arith.constant 0 : index
    %172 = vector.load %arg10[%c0_56, %c0_57] : memref<32x128xbf16, #tpu.memory_space<vmem>>, vector<32x128xbf16>
    %cst_58 = arith.constant dense<0.000000e+00> : vector<34x128xf32>
    %173 = tpu.matmul %171, %172, %cst_58 {dimension_numbers = #tpu.dot_dimension_numbers<[1], [0], [0], [1], [0, 0, 1, 1], [], []>} : vector<34x32xbf16>, vector<32x128xbf16>, vector<34x128xf32> -> vector<34x128xf32>
    %c0_59 = arith.constant 0 : index
    %c0_60 = arith.constant 0 : index
    %174 = vector.load %arg11[%c0_59, %c0_60] : memref<1x128xf32, #tpu.memory_space<vmem>>, vector<1x128xf32>
    %175 = vector.broadcast %174 : vector<1x128xf32> to vector<34x128xf32>
    %176 = arith.addf %173, %175 : vector<34x128xf32>
    %cst_61 = arith.constant 1.702000e+00 : f32
    %177 = vector.broadcast %cst_61 : f32 to vector<34x128xf32>
    %178 = arith.mulf %177, %176 : vector<34x128xf32>
    %179 = arith.negf %178 : vector<34x128xf32>
    %180 = math.exp %179 : vector<34x128xf32>
    %cst_62 = arith.constant 1.000000e+00 : f32
    %181 = vector.broadcast %cst_62 : f32 to vector<34x128xf32>
    %182 = arith.addf %181, %180 : vector<34x128xf32>
    %183 = arith.divf %181, %182 : vector<34x128xf32>
    %184 = arith.mulf %176, %183 : vector<34x128xf32>
    %185 = arith.truncf %184 : vector<34x128xf32> to vector<34x128xbf16>
    %c0_63 = arith.constant 0 : index
    %c0_64 = arith.constant 0 : index
    %186 = vector.load %arg12[%c0_63, %c0_64] : memref<128x32xbf16, #tpu.memory_space<vmem>>, vector<128x32xbf16>
    %cst_65 = arith.constant dense<0.000000e+00> : vector<34x32xf32>
    %187 = tpu.matmul %185, %186, %cst_65 {dimension_numbers = #tpu.dot_dimension_numbers<[1], [0], [0], [1], [0, 0, 1, 1], [], []>} : vector<34x128xbf16>, vector<128x32xbf16>, vector<34x32xf32> -> vector<34x32xf32>
    %c0_66 = arith.constant 0 : index
    %c0_67 = arith.constant 0 : index
    %188 = vector.load %arg13[%c0_66, %c0_67] : memref<1x32xf32, #tpu.memory_space<vmem>>, vector<1x32xf32>
    %189 = vector.broadcast %188 : vector<1x32xf32> to vector<34x32xf32>
    %190 = arith.addf %187, %189 : vector<34x32xf32>
    %191 = arith.addf %146, %190 : vector<34x32xf32>
    %192 = vector.shape_cast %191 : vector<34x32xf32> to vector<2x17x32xf32>
    %c0_68 = arith.constant 0 : index
    %c0_69 = arith.constant 0 : index
    %c0_70 = arith.constant 0 : index
    %193 = vector.load %arg14[%c0_68, %c0_69, %c0_70] : memref<2x17x32xf32, #tpu.memory_space<vmem>>, vector<2x17x32xf32>
    tpu.vector_store %arg14[%c0_68, %c0_69, %c0_70], %192 {strides = array<i32>} : memref<2x17x32xf32, #tpu.memory_space<vmem>>, vector<2x17x32xf32>,
    return
  }
  func.func @transform_0(%arg0: i32) -> (i32, i32, i32) {
    %c0_i32 = arith.constant 0 : i32
    %c0_i32_0 = arith.constant 0 : i32
    %c0_i32_1 = arith.constant 0 : i32
    return %arg0, %c0_i32, %c0_i32_0 : i32, i32, i32
  }
  func.func @transform_1(%arg0: i32) -> (i32, i32) {
    %c0_i32 = arith.constant 0 : i32
    %c0_i32_0 = arith.constant 0 : i32
    %c0_i32_1 = arith.constant 0 : i32
    return %c0_i32, %c0_i32_0 : i32, i32
  }
  func.func @transform_2(%arg0: i32) -> (i32, i32) {
    %c0_i32 = arith.constant 0 : i32
    %c0_i32_0 = arith.constant 0 : i32
    %c0_i32_1 = arith.constant 0 : i32
    return %c0_i32, %c0_i32_0 : i32, i32
  }
  func.func @transform_3(%arg0: i32) -> (i32, i32) {
    %c0_i32 = arith.constant 0 : i32
    %c0_i32_0 = arith.constant 0 : i32
    %c0_i32_1 = arith.constant 0 : i32
    return %c0_i32, %c0_i32_0 : i32, i32
  }
  func.func @transform_4(%arg0: i32) -> (i32, i32) {
    %c0_i32 = arith.constant 0 : i32
    %c0_i32_0 = arith.constant 0 : i32
    %c0_i32_1 = arith.constant 0 : i32
    return %c0_i32, %c0_i32_0 : i32, i32
  }
  func.func @transform_5(%arg0: i32) -> (i32, i32) {
    %c0_i32 = arith.constant 0 : i32
    %c0_i32_0 = arith.constant 0 : i32
    %c0_i32_1 = arith.constant 0 : i32
    return %c0_i32, %c0_i32_0 : i32, i32
  }
  func.func @transform_6(%arg0: i32) -> (i32, i32) {
    %c0_i32 = arith.constant 0 : i32
    %c0_i32_0 = arith.constant 0 : i32
    %c0_i32_1 = arith.constant 0 : i32
    return %c0_i32, %c0_i32_0 : i32, i32
  }
  func.func @transform_7(%arg0: i32) -> (i32, i32) {
    %c0_i32 = arith.constant 0 : i32
    %c0_i32_0 = arith.constant 0 : i32
    %c0_i32_1 = arith.constant 0 : i32
    return %c0_i32, %c0_i32_0 : i32, i32
  }
  func.func @transform_8(%arg0: i32) -> (i32, i32) {
    %c0_i32 = arith.constant 0 : i32
    %c0_i32_0 = arith.constant 0 : i32
    %c0_i32_1 = arith.constant 0 : i32
    return %c0_i32, %c0_i32_0 : i32, i32
  }
  func.func @transform_9(%arg0: i32) -> (i32, i32) {
    %c0_i32 = arith.constant 0 : i32
    %c0_i32_0 = arith.constant 0 : i32
    %c0_i32_1 = arith.constant 0 : i32
    return %c0_i32, %c0_i32_0 : i32, i32
  }
  func.func @transform_10(%arg0: i32) -> (i32, i32) {
    %c0_i32 = arith.constant 0 : i32
    %c0_i32_0 = arith.constant 0 : i32
    %c0_i32_1 = arith.constant 0 : i32
    return %c0_i32, %c0_i32_0 : i32, i32
  }
  func.func @transform_11(%arg0: i32) -> (i32, i32) {
    %c0_i32 = arith.constant 0 : i32
    %c0_i32_0 = arith.constant 0 : i32
    %c0_i32_1 = arith.constant 0 : i32
    return %c0_i32, %c0_i32_0 : i32, i32
  }
  func.func @transform_12(%arg0: i32) -> (i32, i32) {
    %c0_i32 = arith.constant 0 : i32
    %c0_i32_0 = arith.constant 0 : i32
    %c0_i32_1 = arith.constant 0 : i32
    return %c0_i32, %c0_i32_0 : i32, i32
  }
  func.func @transform_13(%arg0: i32) -> (i32, i32, i32) {
    %c0_i32 = arith.constant 0 : i32
    %c0_i32_0 = arith.constant 0 : i32
    %c0_i32_1 = arith.constant 0 : i32
    return %arg0, %c0_i32, %c0_i32_0 : i32, i32, i32
  }
}

</mosaic_0001>

<bundles_post_ra>
// kernel: vision_transformer_forward.2
= control target key start
LH: loop header
LB: loop body
LE: loop exit
PB: predicated region body
PF: predicated region fallthrough
CT: control target
= control target key end

     0   :  { %vm164_vm0 = vcmask 261120   ;;  %vm177_vm1 = vcmask 254976   ;;  %v4761_v44 = vmov 32.0   ;;  %s4763_s26 = smov 64   ;;  %s4765_s27 = smov 120   ;;  %s7085_s0 = inlined_call_operand.vmem [shape: f32[2,17,32], index: 0, kind: input, shape index: {}]   ;;  %s7086_s1 = inlined_call_operand.vmem [shape: f32[1,32], index: 1, kind: input, shape index: {}]   ;;  %s7087_s2 = inlined_call_operand.vmem [shape: f32[1,32], index: 2, kind: input, shape index: {}]   ;;  %s7088_s4 = inlined_call_operand.vmem [shape: f32[1,96], index: 4, kind: input, shape index: {}]   ;;  %s7089_s3 = inlined_call_operand.vmem [shape: bf16[32,96], index: 3, kind: input, shape index: {}]   ;;  %s7090_s6 = inlined_call_operand.vmem [shape: f32[1,32], index: 6, kind: input, shape index: {}]   ;;  %s7091_s5 = inlined_call_operand.vmem [shape: bf16[32,32], index: 5, kind: input, shape index: {}]   ;;  %s7092_s7 = inlined_call_operand.vmem [shape: f32[1,32], index: 7, kind: input, shape index: {}]   ;;  %s7093_s8 = inlined_call_operand.vmem [shape: f32[1,32], index: 8, kind: input, shape index: {}]   ;;  %s7094_s10 = inlined_call_operand.vmem [shape: f32[1,128], index: 10, kind: input, shape index: {}]   ;;  %s7095_s9 = inlined_call_operand.vmem [shape: bf16[32,128], index: 9, kind: input, shape index: {}]   ;;  %s7096_s12 = inlined_call_operand.vmem [shape: f32[1,32], index: 12, kind: input, shape index: {}]   ;;  %s7097_s11 = inlined_call_operand.vmem [shape: bf16[128,32], index: 11, kind: input, shape index: {}]   ;;  %s7098_s13 = inlined_call_operand.vmem [shape: f32[2,17,32], index: 13, kind: output, shape index: {}]  }
   0x1   :  { %v4850_v0 = vld [vmem:[%s7085_s0] sm:$0xff]  ;;  %v4884_v8 = vld [vmem:[%s7085_s0 + $0x8] sm:$0xff]  ;;  %v4919_v18 = vld [vmem:[%s7085_s0 + $0x18] sm:$0xff]  ;;  %4623 = vrcp.f32 %v4761_v44  ;;  %s4766_s28 = smov 88   ;;  %s4767_s29 = smov 56  }
   0x2   :  { %7256 = vst [vmem:[#allocation3_spill] sm:$0xff] %v4850_v0  ;;  %v4853_v1 = vrot.slane %v4850_v0, 1  ;;  %v4856_v2 = vrot.slane %v4850_v0, 2  ;;  %v4859_v3 = vrot.slane %v4850_v0, 3  ;;  %v4863_v4 = vrot.slane %v4850_v0, 4  ;;  %v4956_v28 = vld [vmem:[%s7085_s0 + $0x20] sm:$0xff] }
   0x3   :  { %113 = vst [vmem:[#allocation1] ss:$9 sm:$0xff] %v4850_v0  ;;  %v4866_v5 = vrot.slane %v4850_v0, 5  ;;  %v4870_v6 = vrot.slane %v4850_v0, 6  ;;  %v4874_v7 = vrot.slane %v4850_v0, 7  ;;  %v4887_v9 = vrot.slane %v4884_v8, 1 }
   0x4   :  { %7257 = vst [vmem:[#allocation4_spill] sm:$0xff] %v4853_v1  ;;  %v4890_v10 = vrot.slane %v4884_v8, 2  ;;  %v4893_v12 = vrot.slane %v4884_v8, 3  ;;  %v4897_v14 = vrot.slane %v4884_v8, 4  ;;  %v4901_v15 = vrot.slane %v4884_v8, 5  ;;  %s4768_s30 = smov 80  }
   0x5   :  { %7258 = vst [vmem:[#allocation5_spill] sm:$0xff] %v4856_v2  ;;  %v4905_v16 = vrot.slane %v4884_v8, 6  ;;  %v4909_v17 = vrot.slane %v4884_v8, 7  ;;  %v4924_v19 = vld [vmem:[%s7085_s0 + $0x10] sm:$0x1]  ;;  %v4927_v20 = vrot.slane %v4919_v18, 1 }
   0x6   :  { %7259 = vst [vmem:[#allocation6_spill] sm:$0xff] %v4859_v3  ;;  %v4930_v22 = vrot.slane %v4919_v18, 2  ;;  %v4934_v24 = vrot.slane %v4919_v18, 3  ;;  %v4938_v25 = vrot.slane %v4919_v18, 4  ;;  %v4942_v26 = vrot.slane %v4919_v18, 5  ;;  %s4769_s14 = smov 112  }
   0x7   :  { %7260 = vst [vmem:[#allocation7_spill] sm:$0xff] %v4863_v4  ;;  %v4946_v27 = vrot.slane %v4919_v18, 6  ;;  %v4959_v29 = vrot.slane %v4919_v18, 7  ;;  %v4962_v30 = vrot.slane %v4956_v28, 1  ;;  %v4965_v32 = vrot.slane %v4956_v28, 2  ;;  %v4624_v45 = vpop.eup %4623  ;;  %s4770_s15 = smov 48  }
   0x8   :  { %7261 = vst [vmem:[#allocation8_spill] sm:$0xff] %v4866_v5  ;;  %v4969_v34 = vrot.slane %v4956_v28, 3  ;;  %v4973_v35 = vrot.slane %v4956_v28, 4  ;;  %v4977_v36 = vrot.slane %v4956_v28, 5  ;;  %v4981_v37 = vrot.slane %v4956_v28, 6  ;;  %s4771_s16 = smov 72  }
   0x9   :  { %115 = vst [vmem:[#allocation1 + $0x1] ss:$9 sm:$0xff] %v4853_v1  ;;  %v4989_v38 = vrot.slane %v4956_v28, 7  ;;  %v4994_v39 = vld [vmem:[%s7085_s0 + $0x28] sm:$0x1]  ;;  %v182_v46 = vmul.f32 32.0, %v4624_v45  ;;  %vm186_vm2 = vweird.f32 %v4624_v45 }
   0xa   :  { %7262 = vst [vmem:[#allocation9_spill] sm:$0xff] %v4870_v6  ;;  %s4772_s17 = smov 104   ;;  %s4773_s18 = smov 40  }
   0xb   :  { %117 = vst [vmem:[#allocation1 + $0x2] ss:$9 sm:$0xff] %v4856_v2  ;;  %v183_v47 = vsub.f32 1.0, %v182_v46  ;;  %s4774_s19 = smov 8   ;;  %s4775_s0 = smov 16  }
   0xc   :  { %7263 = vst [vmem:[#allocation10_spill] sm:$0xff] %v4874_v7  ;;  %s4776_s20 = smov 24  }
   0xd   :  { %119 = vst [vmem:[#allocation1 + $0x3] ss:$9 sm:$0xff] %v4859_v3  ;;  %v184_v48 = vmul.f32 %v4624_v45, %v183_v47 }
   0xe   :  { %121 = vst [vmem:[#allocation1 + $0x4] ss:$9 sm:$0xff] %v4863_v4 }
   0xf   :  { %123 = vst [vmem:[#allocation1 + $0x5] ss:$9 sm:$0xff] %v4866_v5  ;;  %v185_v49 = vadd.f32 %v4624_v45, %v184_v48 }
  0x10   :  { %125 = vst [vmem:[#allocation1 + $0x6] ss:$9 sm:$0xff] %v4870_v6 }
  0x11   :  { %127 = vst [vmem:[#allocation1 + $0x7] ss:$9 sm:$0xff] %v4874_v7  ;;  %v5000_v50 = vsel %vm186_vm2, %v4624_v45, %v185_v49 }
  0x12   :  { %7264 = vst [vmem:[#allocation11_spill] sm:$0xff] %v4884_v8 }
  0x13   :  { %7265 = vst [vmem:[#allocation12_spill] sm:$0xff] %v4887_v9 }
  0x14   :  { %7266 = vst [vmem:[#allocation13_spill] sm:$0xff] %v4890_v10 }
  0x15   :  { %7267 = vst [vmem:[#allocation14_spill] sm:$0xff] %v4893_v12 }
  0x16   :  { %7268 = vst [vmem:[#allocation15_spill] sm:$0xff] %v4897_v14 }
  0x17   :  { %7269 = vst [vmem:[#allocation16_spill] sm:$0xff] %v4901_v15 }
  0x18   :  { %v128_v11 = vld [vmem:[#allocation1] sm:$0xff]  ;;  %7270 = vst [vmem:[#allocation17_spill] sm:$0xff] %v4905_v16 }
  0x19   :  { %v165_v13 = vsel %vm164_vm0, %v128_v11, 0.0  ;;  %129 = vst [vmem:[#allocation1] ss:$9 sm:$0xff] %v4884_v8 }
  0x1a   :  { %166 = vadd.xlane.f32.xlu0 %v165_v13  ;;  %130 = vst [vmem:[#allocation1 + $0x1] ss:$9 sm:$0xff] %v4887_v9 }
  0x1b   :  { %131 = vst [vmem:[#allocation1 + $0x2] ss:$9 sm:$0xff] %v4890_v10 }
  0x1c   :  { %7271 = vst [vmem:[#allocation18_spill] sm:$0xff] %v4909_v17 }
  0x1d   :  { %132 = vst [vmem:[#allocation1 + $0x3] ss:$9 sm:$0xff] %v4893_v12 }
  0x1e   :  { %133 = vst [vmem:[#allocation1 + $0x4] ss:$9 sm:$0xff] %v4897_v14 }
  0x1f   :  { %134 = vst [vmem:[#allocation1 + $0x5] ss:$9 sm:$0xff] %v4901_v15 }
  0x20   :  { %135 = vst [vmem:[#allocation1 + $0x6] ss:$9 sm:$0xff] %v4905_v16 }
  0x21   :  { %136 = vst [vmem:[#allocation1 + $0x7] ss:$9 sm:$0xff] %v4909_v17 }
  0x22   :  { %7272 = vst [vmem:[#allocation19_spill] sm:$0xff] %v4919_v18 }
  0x23   :  { %7273 = vst [vmem:[#allocation20_spill] sm:$0xff] %v4924_v19 }
  0x24   :  { %7274 = vst [vmem:[#allocation21_spill] sm:$0xff] %v4927_v20 }
  0x25   :  { %7275 = vst [vmem:[#allocation22_spill] sm:$0xff] %v4930_v22 }
  0x26   :  { %7276 = vst [vmem:[#allocation23_spill] sm:$0xff] %v4934_v24 }
  0x27   :  { %7277 = vst [vmem:[#allocation24_spill] sm:$0xff] %v4938_v25 }
  0x28   :  { %v137_v21 = vld [vmem:[#allocation1] sm:$0xff]  ;;  %7278 = vst [vmem:[#allocation25_spill] sm:$0xff] %v4942_v26 }
  0x29   :  { %v168_v23 = vsel %vm164_vm0, %v137_v21, 0.0  ;;  %138 = vst [vmem:[#allocation1] ss:$9 sm:$0xff] %v4924_v19 }
  0x2a   :  { %169 = vadd.xlane.f32.xlu0 %v168_v23  ;;  %139 = vst [vmem:[#allocation1 + $0x1] ss:$9 sm:$0xff] %v4919_v18 }
  0x2b   :  { %140 = vst [vmem:[#allocation1 + $0x2] ss:$9 sm:$0xff] %v4927_v20 }
  0x2c   :  { %7279 = vst [vmem:[#allocation26_spill] sm:$0xff] %v4946_v27 }
  0x2d   :  { %141 = vst [vmem:[#allocation1 + $0x3] ss:$9 sm:$0xff] %v4930_v22 }
  0x2e   :  { %142 = vst [vmem:[#allocation1 + $0x4] ss:$9 sm:$0xff] %v4934_v24 }
  0x2f   :  { %143 = vst [vmem:[#allocation1 + $0x5] ss:$9 sm:$0xff] %v4938_v25 }
  0x30   :  { %144 = vst [vmem:[#allocation1 + $0x6] ss:$9 sm:$0xff] %v4942_v26 }
  0x31   :  { %145 = vst [vmem:[#allocation1 + $0x7] ss:$9 sm:$0xff] %v4946_v27 }
  0x32   :  { %7280 = vst [vmem:[#allocation27_spill] sm:$0xff] %v4956_v28 }
  0x33   :  { %7281 = vst [vmem:[#allocation28_spill] sm:$0xff] %v4959_v29 }
  0x34   :  { %7282 = vst [vmem:[#allocation29_spill] sm:$0xff] %v4962_v30 }
  0x35   :  { %7283 = vst [vmem:[#allocation30_spill] sm:$0xff] %v4965_v32 }
  0x36   :  { %7284 = vst [vmem:[#allocation31_spill] sm:$0xff] %v4969_v34 }
  0x37   :  { %7285 = vst [vmem:[#allocation32_spill] sm:$0xff] %v4973_v35 }
  0x38   :  { %v146_v31 = vld [vmem:[#allocation1] sm:$0xff]  ;;  %7286 = vst [vmem:[#allocation33_spill] sm:$0xff] %v4977_v36 }
  0x39   :  { %v171_v33 = vsel %vm164_vm0, %v146_v31, 0.0  ;;  %147 = vst [vmem:[#allocation1] ss:$9 sm:$0xff] %v4959_v29 }
  0x3a   :  { %172 = vadd.xlane.f32.xlu1 %v171_v33  ;;  %148 = vst [vmem:[#allocation1 + $0x1] ss:$9 sm:$0xff] %v4956_v28 }
  0x3b   :  { %149 = vst [vmem:[#allocation1 + $0x2] ss:$9 sm:$0xff] %v4962_v30 }
  0x3c   :  { %7287 = vst [vmem:[#allocation34_spill] sm:$0xff] %v4981_v37 }
  0x3d   :  { %150 = vst [vmem:[#allocation1 + $0x3] ss:$9 sm:$0xff] %v4965_v32 }
  0x3e   :  { %151 = vst [vmem:[#allocation1 + $0x4] ss:$9 sm:$0xff] %v4969_v34 }
  0x3f   :  { %152 = vst [vmem:[#allocation1 + $0x5] ss:$9 sm:$0xff] %v4973_v35 }
  0x40   :  { %153 = vst [vmem:[#allocation1 + $0x6] ss:$9 sm:$0xff] %v4977_v36 }
  0x41   :  { %154 = vst [vmem:[#allocation1 + $0x7] ss:$9 sm:$0xff] %v4981_v37 }
  0x42   :  { %7288 = vst [vmem:[#allocation35_spill] sm:$0xff] %v4989_v38 }
  0x43   :  { %7289 = vst [vmem:[#allocation36_spill] sm:$0xff] %v4994_v39 }
  0x44   :  { %7290 = vst [vmem:[#allocation37_spill] sm:$0xff] %v5000_v50 }
  0x48   :  { %v155_v40 = vld [vmem:[#allocation1] sm:$0xff] }
  0x49   :  { %v174_v41 = vsel %vm164_vm0, %v155_v40, 0.0  ;;  %156 = vst [vmem:[#allocation1] ss:$9 sm:$0xff] %v4989_v38 }
  0x4a   :  { %175 = vadd.xlane.f32.xlu1 %v174_v41  ;;  %157 = vst [vmem:[#allocation1 + $0x1] ss:$9 sm:$0xff] %v4994_v39 }
  0x51   :  { %v158_v42 = vld [vmem:[#allocation1] sm:$0xff] }
  0x52   :  { %v178_v43 = vsel %vm177_vm1, %v158_v42, 0.0 }
  0x53   :  { %179 = vadd.xlane.f32.xlu2 %v178_v43 }
  0x8d   :  { %v167_v51 = vpop.xlane.xlu0 %166 }
  0x8e   :  { %v188_v52 = vmul.f32 %v5000_v50, %v167_v51 }
  0x90   :  { %v198_v53 = vperm.slane %v188_v52, 0  ;;  %v199_v54 = vperm.slane %v188_v52, 1  ;;  %v200_v55 = vperm.slane %v188_v52, 2  ;;  %v201_v56 = vperm.slane %v188_v52, 3 }
  0x91   :  { %v202_v57 = vperm.slane %v188_v52, 4  ;;  %v203_v58 = vperm.slane %v188_v52, 5  ;;  %v204_v59 = vperm.slane %v188_v52, 6  ;;  %v205_v60 = vperm.slane %v188_v52, 7 }
  0x92   :  { %v5004_v61 = vsub.f32 %v4850_v0, %v198_v53  ;;  %v5007_v62 = vsub.f32 %v4853_v1, %v199_v54  ;;  %v5010_v63 = vsub.f32 %v4856_v2, %v200_v55  ;;  %v5013_v11 = vsub.f32 %v4859_v3, %v201_v56 }
  0x93   :  { %v5016_v13 = vsub.f32 %v4863_v4, %v202_v57  ;;  %v5019_v21 = vsub.f32 %v4866_v5, %v203_v58  ;;  %v5022_v23 = vsub.f32 %v4870_v6, %v204_v59  ;;  %v5031_v41 = vsub.f32 %v4874_v7, %v205_v60 }
  0x94   :  { %v300_v31 = vmul.f32 %v5004_v61, %v5004_v61  ;;  %v301_v33 = vmul.f32 %v5007_v62, %v5007_v62  ;;  %v302_v40 = vmul.f32 %v5010_v63, %v5010_v63  ;;  %v303_v42 = vmul.f32 %v5013_v11, %v5013_v11 }
  0x95   :  { %v304_v43 = vmul.f32 %v5016_v13, %v5016_v13  ;;  %v305_v44 = vmul.f32 %v5019_v21, %v5019_v21  ;;  %v306_v45 = vmul.f32 %v5022_v23, %v5022_v23  ;;  %v307_v46 = vmul.f32 %v5031_v41, %v5031_v41 }
  0x96   :  { %368 = vst [vmem:[#allocation1] ss:$9 sm:$0xff] %v300_v31 }
  0x97   :  { %370 = vst [vmem:[#allocation1 + $0x1] ss:$9 sm:$0xff] %v301_v33 }
  0x98   :  { %372 = vst [vmem:[#allocation1 + $0x2] ss:$9 sm:$0xff] %v302_v40 }
  0x99   :  { %374 = vst [vmem:[#allocation1 + $0x3] ss:$9 sm:$0xff] %v303_v42 }
  0x9a   :  { %376 = vst [vmem:[#allocation1 + $0x4] ss:$9 sm:$0xff] %v304_v43 }
  0x9b   :  { %378 = vst [vmem:[#allocation1 + $0x5] ss:$9 sm:$0xff] %v305_v44 }
  0x9c   :  { %380 = vst [vmem:[#allocation1 + $0x6] ss:$9 sm:$0xff] %v306_v45 }
  0x9d   :  { %v170_v47 = vpop.xlane.xlu0 %169  ;;  %382 = vst [vmem:[#allocation1 + $0x7] ss:$9 sm:$0xff] %v307_v46 }
  0x9e   :  { %v189_v48 = vmul.f32 %v5000_v50, %v170_v47 }
  0xa0   :  { %v206_v49 = vperm.slane %v189_v48, 0  ;;  %v207_v51 = vperm.slane %v189_v48, 1  ;;  %v208_v52 = vperm.slane %v189_v48, 2  ;;  %v209_v53 = vperm.slane %v189_v48, 3 }
  0xa1   :  { %v210_v54 = vperm.slane %v189_v48, 4  ;;  %v211_v55 = vperm.slane %v189_v48, 5  ;;  %v212_v56 = vperm.slane %v189_v48, 6  ;;  %v213_v57 = vperm.slane %v189_v48, 7 }
  0xa2   :  { %v5045_v58 = vsub.f32 %v4884_v8, %v206_v49  ;;  %v5048_v59 = vsub.f32 %v4887_v9, %v207_v51  ;;  %v5051_v60 = vsub.f32 %v4890_v10, %v208_v52  ;;  %v5054_v31 = vsub.f32 %v4893_v12, %v209_v53 }
  0xa3   :  { %v5057_v33 = vsub.f32 %v4897_v14, %v210_v54  ;;  %v5060_v40 = vsub.f32 %v4901_v15, %v211_v55  ;;  %v5063_v42 = vsub.f32 %v4905_v16, %v212_v56  ;;  %v5072_v47 = vsub.f32 %v4909_v17, %v213_v57 }
  0xa4   :  { %v308_v43 = vmul.f32 %v5045_v58, %v5045_v58  ;;  %v309_v44 = vmul.f32 %v5048_v59, %v5048_v59  ;;  %v310_v45 = vmul.f32 %v5051_v60, %v5051_v60  ;;  %v383_v46 = vld [vmem:[#allocation1] sm:$0xff]  ;;  %v311_v48 = vmul.f32 %v5054_v31, %v5054_v31 }
  0xa5   :  { %v312_v49 = vmul.f32 %v5057_v33, %v5057_v33  ;;  %v419_v51 = vsel %vm164_vm0, %v383_v46, 0.0  ;;  %v313_v52 = vmul.f32 %v5060_v40, %v5060_v40  ;;  %v314_v53 = vmul.f32 %v5063_v42, %v5063_v42 }
  0xa6   :  { %384 = vst [vmem:[#allocation1] ss:$9 sm:$0xff] %v308_v43  ;;  %420 = vadd.xlane.f32.xlu2 %v419_v51  ;;  %v315_v54 = vmul.f32 %v5072_v47, %v5072_v47 }
  0xa7   :  { %385 = vst [vmem:[#allocation1 + $0x1] ss:$9 sm:$0xff] %v309_v44 }
  0xa8   :  { %386 = vst [vmem:[#allocation1 + $0x2] ss:$9 sm:$0xff] %v310_v45 }
  0xa9   :  { %387 = vst [vmem:[#allocation1 + $0x3] ss:$9 sm:$0xff] %v311_v48 }
  0xaa   :  { %388 = vst [vmem:[#allocation1 + $0x4] ss:$9 sm:$0xff] %v312_v49 }
  0xab   :  { %389 = vst [vmem:[#allocation1 + $0x5] ss:$9 sm:$0xff] %v313_v52 }
  0xac   :  { %390 = vst [vmem:[#allocation1 + $0x6] ss:$9 sm:$0xff] %v314_v53 }
  0xad   :  { %v173_v55 = vpop.xlane.xlu1 %172  ;;  %391 = vst [vmem:[#allocation1 + $0x7] ss:$9 sm:$0xff] %v315_v54 }
  0xae   :  { %v190_v56 = vmul.f32 %v5000_v50, %v173_v55 }
  0xb0   :  { %v214_v57 = vperm.slane %v190_v56, 0  ;;  %v215_v43 = vperm.slane %v190_v56, 1  ;;  %v216_v46 = vperm.slane %v190_v56, 2  ;;  %v217_v44 = vperm.slane %v190_v56, 3 }
  0xb1   :  { %v218_v51 = vperm.slane %v190_v56, 4  ;;  %v219_v17 = vperm.slane %v190_v56, 5  ;;  %v220_v16 = vperm.slane %v190_v56, 6  ;;  %v221_v15 = vperm.slane %v190_v56, 7 }
  0xb2   :  { %v5087_v45 = vsub.f32 %v4924_v19, %v214_v57  ;;  %v5090_v48 = vsub.f32 %v4919_v18, %v215_v43  ;;  %v5093_v49 = vsub.f32 %v4927_v20, %v216_v46  ;;  %v5096_v52 = vsub.f32 %v4930_v22, %v217_v44 }
  0xb3   :  { %v5099_v53 = vsub.f32 %v4934_v24, %v218_v51  ;;  %v5102_v54 = vsub.f32 %v4938_v25, %v219_v17  ;;  %v5105_v55 = vsub.f32 %v4942_v26, %v220_v16  ;;  %v5114_v44 = vsub.f32 %v4946_v27, %v221_v15 }
  0xb4   :  { %v316_v56 = vmul.f32 %v5087_v45, %v5087_v45  ;;  %v317_v57 = vmul.f32 %v5090_v48, %v5090_v48  ;;  %v318_v43 = vmul.f32 %v5093_v49, %v5093_v49  ;;  %v392_v46 = vld [vmem:[#allocation1] sm:$0xff]  ;;  %v319_v17 = vmul.f32 %v5096_v52, %v5096_v52 }
  0xb5   :  { %v320_v16 = vmul.f32 %v5099_v53, %v5099_v53  ;;  %v422_v51 = vsel %vm164_vm0, %v392_v46, 0.0  ;;  %v321_v26 = vmul.f32 %v5102_v54, %v5102_v54  ;;  %v322_v25 = vmul.f32 %v5105_v55, %v5105_v55 }
  0xb6   :  { %393 = vst [vmem:[#allocation1] ss:$9 sm:$0xff] %v316_v56  ;;  %423 = vadd.xlane.f32.xlu0 %v422_v51  ;;  %v323_v15 = vmul.f32 %v5114_v44, %v5114_v44 }
  0xb7   :  { %394 = vst [vmem:[#allocation1 + $0x1] ss:$9 sm:$0xff] %v317_v57 }
  0xb8   :  { %395 = vst [vmem:[#allocation1 + $0x2] ss:$9 sm:$0xff] %v318_v43 }
  0xb9   :  { %396 = vst [vmem:[#allocation1 + $0x3] ss:$9 sm:$0xff] %v319_v17 }
  0xba   :  { %397 = vst [vmem:[#allocation1 + $0x4] ss:$9 sm:$0xff] %v320_v16 }
  0xbb   :  { %398 = vst [vmem:[#allocation1 + $0x5] ss:$9 sm:$0xff] %v321_v26 }
  0xbc   :  { %399 = vst [vmem:[#allocation1 + $0x6] ss:$9 sm:$0xff] %v322_v25 }
  0xbd   :  { %v176_v27 = vpop.xlane.xlu1 %175  ;;  %400 = vst [vmem:[#allocation1 + $0x7] ss:$9 sm:$0xff] %v323_v15 }
  0xbe   :  { %v191_v56 = vmul.f32 %v5000_v50, %v176_v27 }
  0xc0   :  { %v222_v46 = vperm.slane %v191_v56, 0  ;;  %v223_v24 = vperm.slane %v191_v56, 1  ;;  %v224_v22 = vperm.slane %v191_v56, 2  ;;  %v225_v57 = vperm.slane %v191_v56, 3 }
  0xc1   :  { %v226_v51 = vperm.slane %v191_v56, 4  ;;  %v227_v20 = vperm.slane %v191_v56, 5  ;;  %v228_v18 = vperm.slane %v191_v56, 6  ;;  %v229_v19 = vperm.slane %v191_v56, 7 }
  0xc2   :  { %v5129_v43 = vsub.f32 %v4959_v29, %v222_v46  ;;  %v5132_v17 = vsub.f32 %v4956_v28, %v223_v24  ;;  %v5135_v25 = vsub.f32 %v4962_v30, %v224_v22  ;;  %v5138_v26 = vsub.f32 %v4965_v32, %v225_v57 }
  0xc3   :  { %v5141_v27 = vsub.f32 %v4969_v34, %v226_v51  ;;  %v5144_v16 = vsub.f32 %v4973_v35, %v227_v20  ;;  %v5147_v15 = vsub.f32 %v4977_v36, %v228_v18  ;;  %v5156_v57 = vsub.f32 %v4981_v37, %v229_v19 }
  0xc4   :  { %v324_v56 = vmul.f32 %v5129_v43, %v5129_v43  ;;  %v325_v24 = vmul.f32 %v5132_v17, %v5132_v17  ;;  %v326_v22 = vmul.f32 %v5135_v25, %v5135_v25  ;;  %v401_v46 = vld [vmem:[#allocation1] sm:$0xff]  ;;  %v327_v20 = vmul.f32 %v5138_v26, %v5138_v26 }
  0xc5   :  { %7291 = vst [vmem:[#allocation38_spill] sm:$0xff] %v5141_v27  ;;  %v328_v18 = vmul.f32 %v5141_v27, %v5141_v27  ;;  %v425_v36 = vsel %vm164_vm0, %v401_v46, 0.0  ;;  %v329_v35 = vmul.f32 %v5144_v16, %v5144_v16  ;;  %v330_v19 = vmul.f32 %v5147_v15, %v5147_v15 }
  0xc6   :  { %7292 = vst [vmem:[#allocation39_spill] sm:$0xff] %v5144_v16  ;;  %v180_v51 = vpop.xlane.xlu2 %179  ;;  %426 = vadd.xlane.f32.xlu1 %v425_v36  ;;  %v331_v37 = vmul.f32 %v5156_v57, %v5156_v57 }
  0xc7   :  { %7293 = vst [vmem:[#allocation40_spill] sm:$0xff] %v5147_v15  ;;  %v192_v34 = vmul.f32 %v5000_v50, %v180_v51 }
  0xc8   :  { %7294 = vst [vmem:[#allocation41_spill] sm:$0xff] %v5156_v57 }
  0xc9   :  { %402 = vst [vmem:[#allocation1] ss:$9 sm:$0xff] %v324_v56  ;;  %v230_v32 = vperm.slane %v192_v34, 0  ;;  %v231_v56 = vperm.slane %v192_v34, 1 }
  0xca   :  { %403 = vst [vmem:[#allocation1 + $0x1] ss:$9 sm:$0xff] %v325_v24 }
  0xcb   :  { %404 = vst [vmem:[#allocation1 + $0x2] ss:$9 sm:$0xff] %v326_v22  ;;  %v5171_v46 = vsub.f32 %v4989_v38, %v230_v32  ;;  %v5174_v24 = vsub.f32 %v4994_v39, %v231_v56  ;;  %v5186_v38 = vld [vmem:[%s7086_s1] ss:$0 sm:$0xff] }
  0xcc   :  { %405 = vst [vmem:[#allocation1 + $0x3] ss:$9 sm:$0xff] %v327_v20  ;;  %v5200_v39 = vrot.slane %v5186_v38, 3  ;;  %v5212_v30 = vrot.slane %v5186_v38, 7  ;;  %v5234_v10 = vrot.slane %v5186_v38, 1 }
  0xcd   :  { %406 = vst [vmem:[#allocation1 + $0x4] ss:$9 sm:$0xff] %v328_v18  ;;  %v332_v36 = vmul.f32 %v5171_v46, %v5171_v46  ;;  %v333_v22 = vmul.f32 %v5174_v24, %v5174_v24 }
  0xce   :  { %407 = vst [vmem:[#allocation1 + $0x5] ss:$9 sm:$0xff] %v329_v35 }
  0xcf   :  { %408 = vst [vmem:[#allocation1 + $0x6] ss:$9 sm:$0xff] %v330_v19 }
  0xd0   :  { %409 = vst [vmem:[#allocation1 + $0x7] ss:$9 sm:$0xff] %v331_v37 }
  0xd1   :  { %7295 = vst [vmem:[#allocation42_spill] sm:$0xff] %v5171_v46 }
  0xd2   :  { %7296 = vst [vmem:[#allocation43_spill] sm:$0xff] %v5174_v24 }
  0xd7   :  { %v410_v51 = vld [vmem:[#allocation1] sm:$0xff] }
  0xd8   :  { %411 = vst [vmem:[#allocation1] ss:$9 sm:$0xff] %v332_v36  ;;  %v428_v20 = vsel %vm164_vm0, %v410_v51, 0.0 }
  0xd9   :  { %412 = vst [vmem:[#allocation1 + $0x1] ss:$9 sm:$0xff] %v333_v22  ;;  %429 = vadd.xlane.f32.xlu2 %v428_v20 }
  0xe0   :  { %v413_v34 = vld [vmem:[#allocation1] sm:$0xff] }
  0xe1   :  { %v431_v35 = vsel %vm177_vm1, %v413_v34, 0.0  ;;  %v5192_v34 = vld [vmem:[%s7087_s2] ss:$0 sm:$0xff] }
  0xe2   :  { %432 = vadd.xlane.f32.xlu0 %v431_v35  ;;  %v5195_v35 = vrot.slane %v5186_v38, 2  ;;  %v5222_v28 = vrot.slane %v5192_v34, 4  ;;  %v5225_v14 = vrot.slane %v5192_v34, 5  ;;  %v5228_v12 = vrot.slane %v5192_v34, 6 }
 0x119   :  { %v421_v32 = vpop.xlane.xlu2 %420 }
 0x11a   :  { %v434_v37 = vmul.f32 %v421_v32, %v5000_v50 }
 0x11c   :  { %v439_v18 = vadd.f32 1e-05, %v434_v37 }
 0x11e   :  { %4625 = vrsqrt.f32 %v439_v18  ;;  %vm450_vm4 = vweird.f32 %v439_v18 }
 0x124   :  { %v4626_v19 = vpop.eup %4625 }
 0x125   :  { %v445_v56 = vmul.f32 %v4626_v19, %v439_v18  ;;  %vm451_vm3 = vweird.f32 %v4626_v19  ;;  %v5231_v18 = vrot.slane %v5192_v34, 7 }
 0x126   :  { %vm452_vm5 = vmor %vm450_vm4, %vm451_vm3  ;;  %vm1115_vm4 = vcmask 64512  }
 0x127   :  { %v446_v36 = vmul.f32 %v4626_v19, %v445_v56  ;;  %v5203_v56 = vrot.slane %v5186_v38, 4 }
 0x129   :  { %v424_v51 = vpop.xlane.xlu0 %423  ;;  %v447_v22 = vmul.f32 0.5, %v446_v36  ;;  %v5206_v36 = vrot.slane %v5186_v38, 5 }
 0x12a   :  { %v435_v20 = vmul.f32 %v424_v51, %v5000_v50  ;;  %v5209_v51 = vrot.slane %v5186_v38, 6 }
 0x12b   :  { %v448_v32 = vsub.f32 1.5, %v447_v22  ;;  %v5216_v22 = vrot.slane %v5192_v34, 2 }
 0x12c   :  { %v5197_v37 = vadd.f32 1e-05, %v435_v20  ;;  %v5219_v20 = vrot.slane %v5192_v34, 3 }
 0x12d   :  { %v449_v29 = vmul.f32 %v4626_v19, %v448_v32 }
 0x12e   :  { %4627 = vrsqrt.f32 %v5197_v37  ;;  %vm460_vm7 = vweird.f32 %v5197_v37 }
 0x12f   :  { %v453_v32 = vsel %vm452_vm5, %v4626_v19, %v449_v29  ;;  %vm1196_vm5 = vcmask 138240  }
 0x130   :  { %v499_v8 = vperm.slane %v453_v32, 0  ;;  %v500_v9 = vperm.slane %v453_v32, 1  ;;  %v501_v7 = vperm.slane %v453_v32, 2  ;;  %v502_v6 = vperm.slane %v453_v32, 3 }
 0x131   :  { %v503_v5 = vperm.slane %v453_v32, 4  ;;  %v504_v4 = vperm.slane %v453_v32, 5  ;;  %v505_v3 = vperm.slane %v453_v32, 6  ;;  %v506_v2 = vperm.slane %v453_v32, 7 }
 0x132   :  { %v567_v1 = vmul.f32 %v499_v8, %v5004_v61  ;;  %v568_v0 = vmul.f32 %v500_v9, %v5007_v62  ;;  %v569_v24 = vmul.f32 %v501_v7, %v5010_v63  ;;  %v570_v46 = vmul.f32 %v502_v6, %v5013_v11 }
 0x133   :  { %v571_v19 = vmul.f32 %v503_v5, %v5016_v13  ;;  %v572_v57 = vmul.f32 %v504_v4, %v5019_v21  ;;  %v573_v15 = vmul.f32 %v505_v3, %v5022_v23  ;;  %v574_v16 = vmul.f32 %v506_v2, %v5031_v41 }
 0x134   :  { %v4628_v29 = vpop.eup %4627  ;;  %v619_v27 = vmul.f32 %v5186_v38, %v567_v1  ;;  %v621_v32 = vmul.f32 %v5195_v35, %v569_v24  ;;  %v622_v8 = vmul.f32 %v5200_v39, %v570_v46  ;;  %v5257_v63 = vrot.slane %v5192_v34, 1 }
 0x135   :  { %v455_v9 = vmul.f32 %v4628_v29, %v5197_v37  ;;  %v623_v7 = vmul.f32 %v5203_v56, %v571_v19  ;;  %v624_v6 = vmul.f32 %v5206_v36, %v572_v57  ;;  %v625_v5 = vmul.f32 %v5209_v51, %v573_v15 }
 0x136   :  { %v626_v4 = vmul.f32 %v5212_v30, %v574_v16  ;;  %v671_v3 = vadd.f32 %v5192_v34, %v619_v27  ;;  %v673_v2 = vadd.f32 %v5216_v22, %v621_v32  ;;  %v674_v1 = vadd.f32 %v5219_v20, %v622_v8 }
 0x137   :  { %v456_v61 = vmul.f32 %v4628_v29, %v455_v9  ;;  %v675_v62 = vadd.f32 %v5222_v28, %v623_v7  ;;  %v676_v13 = vadd.f32 %v5225_v14, %v624_v6  ;;  %v620_v23 = vmul.f32 %v5234_v10, %v568_v0 }
 0x138   :  { %739 = vst [vmem:[#allocation1] ss:$9 sm:$0xff] %v671_v3  ;;  %v677_v27 = vadd.f32 %v5228_v12, %v625_v5  ;;  %v678_v16 = vadd.f32 %v5231_v18, %v626_v4  ;;  %vm461_vm6 = vweird.f32 %v4628_v29 }
 0x139   :  { %v427_v11 = vpop.xlane.xlu1 %426  ;;  %v457_v21 = vmul.f32 0.5, %v456_v61  ;;  %743 = vst [vmem:[#allocation1 + $0x2] ss:$9 sm:$0xff] %v673_v2  ;;  %v672_v46 = vadd.f32 %v5257_v63, %v620_v23  ;;  %vm462_vm8 = vmor %vm460_vm7, %vm461_vm6  ;;  %vm1203_vm6 = vcmask 131072   ;;  %vm1297_vm7 = vcmask 1040384  }
 0x13a   :  { %v436_v41 = vmul.f32 %v427_v11, %v5000_v50  ;;  %745 = vst [vmem:[#allocation1 + $0x3] ss:$9 sm:$0xff] %v674_v1 }
 0x13b   :  { %v458_v15 = vsub.f32 1.5, %v457_v21  ;;  %747 = vst [vmem:[#allocation1 + $0x4] ss:$9 sm:$0xff] %v675_v62 }
 0x13c   :  { %v5264_v57 = vadd.f32 1e-05, %v436_v41  ;;  %749 = vst [vmem:[#allocation1 + $0x5] ss:$9 sm:$0xff] %v676_v13 }
 0x13d   :  { %v459_v24 = vmul.f32 %v4628_v29, %v458_v15  ;;  %751 = vst [vmem:[#allocation1 + $0x6] ss:$9 sm:$0xff] %v677_v27 }
 0x13e   :  { %753 = vst [vmem:[#allocation1 + $0x7] ss:$9 sm:$0xff] %v678_v16  ;;  %4629 = vrsqrt.f32 %v5264_v57  ;;  %vm470_vm10 = vweird.f32 %v5264_v57 }
 0x13f   :  { %v463_v0 = vsel %vm462_vm8, %v4628_v29, %v459_v24  ;;  %741 = vst [vmem:[#allocation1 + $0x1] ss:$9 sm:$0xff] %v672_v46  ;;  %v4584_v46 = vld [vmem:[%s7089_s3 + $0x8] sm:$0xff]  ;;  %vm1458_vm8 = vcmask 58368  }
 0x140   :  { %v507_v19 = vperm.slane %v463_v0, 0  ;;  %v508_v32 = vperm.slane %v463_v0, 1  ;;  %v509_v8 = vperm.slane %v463_v0, 2  ;;  %v510_v9 = vperm.slane %v463_v0, 3  ;;  %828 = vmatpush.bf16.msra.mxu0 %v4584_v46 }
 0x141   :  { %v511_v7 = vperm.slane %v463_v0, 4  ;;  %v512_v6 = vperm.slane %v463_v0, 5  ;;  %v513_v5 = vperm.slane %v463_v0, 6  ;;  %v514_v4 = vperm.slane %v463_v0, 7 }
 0x142   :  { %v575_v3 = vmul.f32 %v507_v19, %v5045_v58  ;;  %v576_v2 = vmul.f32 %v508_v32, %v5048_v59  ;;  %v577_v37 = vmul.f32 %v509_v8, %v5051_v60  ;;  %v578_v1 = vmul.f32 %v510_v9, %v5054_v31 }
 0x143   :  { %v579_v29 = vmul.f32 %v511_v7, %v5057_v33  ;;  %v580_v61 = vmul.f32 %v512_v6, %v5060_v40  ;;  %v581_v62 = vmul.f32 %v513_v5, %v5063_v42  ;;  %v582_v11 = vmul.f32 %v514_v4, %v5072_v47  ;;  %v4583_v6 = vld [vmem:[%s7089_s3] sm:$0xff] }
 0x144   :  { %v627_v13 = vmul.f32 %v5186_v38, %v575_v3  ;;  %v629_v21 = vmul.f32 %v5195_v35, %v577_v37  ;;  %v630_v58 = vmul.f32 %v5200_v39, %v578_v1  ;;  %v4630_v23 = vpop.eup %4629  ;;  %v628_v16 = vmul.f32 %v5234_v10, %v576_v2  ;;  %829 = vmatpush.bf16.msra.mxu0 %v4583_v6 }
 0x145   :  { %v631_v59 = vmul.f32 %v5203_v56, %v579_v29  ;;  %v632_v60 = vmul.f32 %v5206_v36, %v580_v61  ;;  %v633_v31 = vmul.f32 %v5209_v51, %v581_v62  ;;  %v634_v33 = vmul.f32 %v5212_v30, %v582_v11 }
 0x146   :  { %v679_v40 = vadd.f32 %v5192_v34, %v627_v13  ;;  %v681_v42 = vadd.f32 %v5216_v22, %v629_v21  ;;  %v682_v47 = vadd.f32 %v5219_v20, %v630_v58  ;;  %v5288_v27 = vld [vmem:[#allocation1] sm:$0xff]  ;;  %v465_v0 = vmul.f32 %v4630_v23, %v5264_v57 }
 0x147   :  { %v683_v41 = vadd.f32 %v5222_v28, %v631_v59  ;;  %v684_v24 = vadd.f32 %v5225_v14, %v632_v60  ;;  %v685_v19 = vadd.f32 %v5228_v12, %v633_v31  ;;  %v686_v32 = vadd.f32 %v5231_v18, %v634_v33 }
 0x148   :  { %755 = vst [vmem:[#allocation1] ss:$9 sm:$0xff] %v679_v40  ;;  %v466_v8 = vmul.f32 %v4630_v23, %v465_v0  ;;  %v680_v7 = vadd.f32 %v5257_v63, %v628_v16  ;;  %vm471_vm9 = vweird.f32 %v4630_v23 }
 0x149   :  { %757 = vst [vmem:[#allocation1 + $0x2] ss:$9 sm:$0xff] %v681_v42  ;;  %vm472_vm11 = vmor %vm470_vm10, %vm471_vm9  ;;  %vm2008_vm9 = vcmask 130112   ;;  %vm2563_vm10 = vcmask 195712  }
 0x14a   :  { %758 = vst [vmem:[#allocation1 + $0x3] ss:$9 sm:$0xff] %v682_v47  ;;  %v467_v5 = vmul.f32 0.5, %v466_v8 }
 0x14b   :  { %759 = vst [vmem:[#allocation1 + $0x4] ss:$9 sm:$0xff] %v683_v41 }
 0x14c   :  { %v430_v15 = vpop.xlane.xlu2 %429  ;;  %760 = vst [vmem:[#allocation1 + $0x5] ss:$9 sm:$0xff] %v684_v24  ;;  %v468_v4 = vsub.f32 1.5, %v467_v5 }
 0x14d   :  { %v437_v9 = vmul.f32 %v430_v15, %v5000_v50  ;;  %761 = vst [vmem:[#allocation1 + $0x6] ss:$9 sm:$0xff] %v685_v19 }
 0x14e   :  { %762 = vst [vmem:[#allocation1 + $0x7] ss:$9 sm:$0xff] %v686_v32  ;;  %v469_v2 = vmul.f32 %v4630_v23, %v468_v4 }
 0x14f   :  { %v5303_v3 = vadd.f32 1e-05, %v437_v9  ;;  %756 = vst [vmem:[#allocation1 + $0x1] ss:$9 sm:$0xff] %v680_v7 }
 0x150   :  { %v473_v37 = vsel %vm472_vm11, %v4630_v23, %v469_v2  ;;  %vm3118_vm11 = vcmask 261312  }
 0x151   :  { %4631 = vrsqrt.f32 %v5303_v3  ;;  %v515_v1 = vperm.slane %v473_v37, 0  ;;  %v516_v29 = vperm.slane %v473_v37, 1  ;;  %v517_v61 = vperm.slane %v473_v37, 2 }
 0x152   :  { %v518_v62 = vperm.slane %v473_v37, 3  ;;  %v519_v11 = vperm.slane %v473_v37, 4  ;;  %v520_v13 = vperm.slane %v473_v37, 5  ;;  %v521_v21 = vperm.slane %v473_v37, 6 }
 0x153   :  { %v522_v58 = vperm.slane %v473_v37, 7  ;;  %v583_v60 = vmul.f32 %v515_v1, %v5087_v45  ;;  %v584_v31 = vmul.f32 %v516_v29, %v5090_v48  ;;  %v585_v33 = vmul.f32 %v517_v61, %v5093_v49 }
 0x154   :  { %v586_v57 = vmul.f32 %v518_v62, %v5096_v52  ;;  %v587_v23 = vmul.f32 %v519_v11, %v5099_v53  ;;  %v588_v40 = vmul.f32 %v520_v13, %v5102_v54  ;;  %v589_v42 = vmul.f32 %v521_v21, %v5105_v55 }
 0x155   :  { %v433_v59 = vpop.xlane.xlu0 %432  ;;  %v590_v47 = vmul.f32 %v522_v58, %v5114_v44  ;;  %v635_v41 = vmul.f32 %v5186_v38, %v583_v60  ;;  %v637_v16 = vmul.f32 %v5195_v35, %v585_v33  ;;  %v636_v19 = vmul.f32 %v5234_v10, %v584_v31 }
 0x156   :  { %v638_v45 = vmul.f32 %v5200_v39, %v586_v57  ;;  %v438_v48 = vmul.f32 %v433_v59, %v5000_v50  ;;  %v639_v49 = vmul.f32 %v5203_v56, %v587_v23  ;;  %v640_v52 = vmul.f32 %v5206_v36, %v588_v40  ;;  %v763_v54 = vld [vmem:[#allocation1] sm:$0xff] }
 0x157   :  { %v4632_v15 = vpop.eup %4631  ;;  %v641_v53 = vmul.f32 %v5209_v51, %v589_v42  ;;  %v642_v55 = vmul.f32 %v5212_v30, %v590_v47  ;;  %v687_v44 = vadd.f32 %v5192_v34, %v635_v41  ;;  %v689_v46 = vadd.f32 %v5216_v22, %v637_v16  ;;  %v7297_v42 = vld [vmem:[#allocation38_spill] sm:$0xff]  ;;  %v7298_v41 = vld [vmem:[#allocation39_spill] sm:$0xff] }
 0x158   :  { %v690_v24 = vadd.f32 %v5219_v20, %v638_v45  ;;  %v691_v0 = vadd.f32 %v5222_v28, %v639_v49  ;;  %v692_v32 = vadd.f32 %v5225_v14, %v640_v52  ;;  %v475_v8 = vmul.f32 %v4632_v15, %v5303_v3  ;;  %v7299_v45 = vld [vmem:[#allocation40_spill] sm:$0xff] }
 0x159   :  { %764 = vst [vmem:[#allocation1] ss:$9 sm:$0xff] %v687_v44  ;;  %v5330_v9 = vadd.f32 1e-05, %v438_v48  ;;  %v790_v7 = vpack.c.bf16 %v763_v54, %v5288_v27  ;;  %v693_v6 = vadd.f32 %v5228_v12, %v641_v53  ;;  %v694_v5 = vadd.f32 %v5231_v18, %v642_v55 }
 0x15a   :  { %766 = vst [vmem:[#allocation1 + $0x2] ss:$9 sm:$0xff] %v689_v46  ;;  %v476_v4 = vmul.f32 %v4632_v15, %v475_v8  ;;  %v688_v2 = vadd.f32 %v5257_v63, %v636_v19  ;;  %vm481_vm12 = vweird.f32 %v4632_v15  ;;  %vm480_vm13 = vweird.f32 %v5303_v3  ;;  %v7301_v8 = vld [vmem:[#allocation42_spill] sm:$0xff] }
 0x15b   :  { %767 = vst [vmem:[#allocation1 + $0x3] ss:$9 sm:$0xff] %v690_v24  ;;  %4633 = vrsqrt.f32 %v5330_v9  ;;  %4489 = vmatmul.msk.bf16.vlgmr.msra.gmra.mxu0 %vm164_vm0, %v790_v7  ;;  %vm482_vm14 = vmor %vm480_vm13, %vm481_vm12  ;;  %vm490_vm2 = vweird.f32 %v5330_v9  ;;  %vm2013_vm12 = vcmask 123968   ;;  %vm2568_vm13 = vcmask 189568  }
 0x15c   :  { %768 = vst [vmem:[#allocation1 + $0x4] ss:$9 sm:$0xff] %v691_v0  ;;  %v477_v37 = vmul.f32 0.5, %v476_v4 }
 0x15d   :  { %769 = vst [vmem:[#allocation1 + $0x5] ss:$9 sm:$0xff] %v692_v32 }
 0x15e   :  { %770 = vst [vmem:[#allocation1 + $0x6] ss:$9 sm:$0xff] %v693_v6  ;;  %v478_v1 = vsub.f32 1.5, %v477_v37 }
 0x15f   :  { %771 = vst [vmem:[#allocation1 + $0x7] ss:$9 sm:$0xff] %v694_v5 }
 0x160   :  { %765 = vst [vmem:[#allocation1 + $0x1] ss:$9 sm:$0xff] %v688_v2  ;;  %v479_v29 = vmul.f32 %v4632_v15, %v478_v1 }
 0x161   :  { %v4634_v27 = vpop.eup %4633 }
 0x162   :  { %v483_v61 = vsel %vm482_vm14, %v4632_v15, %v479_v29  ;;  %v485_v62 = vmul.f32 %v4634_v27, %v5330_v9  ;;  %v7300_v15 = vld [vmem:[#allocation41_spill] sm:$0xff]  ;;  %vm491_vm15 = vweird.f32 %v4634_v27  ;;  %vm3123_vm14 = vcmask 255168  }
 0x163   :  { %v523_v11 = vperm.slane %v483_v61, 0  ;;  %v524_v13 = vperm.slane %v483_v61, 1  ;;  %v525_v21 = vperm.slane %v483_v61, 2  ;;  %v526_v58 = vperm.slane %v483_v61, 3  ;;  %vm492_vm3 = vmor %vm490_vm2, %vm491_vm15 }
 0x164   :  { %v527_v59 = vperm.slane %v483_v61, 4  ;;  %v528_v60 = vperm.slane %v483_v61, 5  ;;  %v529_v31 = vperm.slane %v483_v61, 6  ;;  %v530_v33 = vperm.slane %v483_v61, 7 }
 0x165   :  { %v591_v57 = vmul.f32 %v523_v11, %v5129_v43  ;;  %v592_v23 = vmul.f32 %v524_v13, %v5132_v17  ;;  %v593_v40 = vmul.f32 %v525_v21, %v5135_v25  ;;  %v594_v3 = vmul.f32 %v526_v58, %v5138_v26 }
 0x166   :  { %v595_v47 = vmul.f32 %v527_v59, %v7297_v42  ;;  %v596_v16 = vmul.f32 %v528_v60, %v7298_v41  ;;  %v597_v48 = vmul.f32 %v529_v31, %v7299_v45  ;;  %v598_v49 = vmul.f32 %v530_v33, %v7300_v15 }
 0x167   :  { %v643_v52 = vmul.f32 %v5186_v38, %v591_v57  ;;  %v645_v53 = vmul.f32 %v5195_v35, %v593_v40  ;;  %v646_v43 = vmul.f32 %v5200_v39, %v594_v3  ;;  %v486_v54 = vmul.f32 %v4634_v27, %v485_v62  ;;  %v772_v17 = vld [vmem:[#allocation1] sm:$0xff] }
 0x168   :  { %v647_v25 = vmul.f32 %v5203_v56, %v595_v47  ;;  %v648_v26 = vmul.f32 %v5206_v36, %v596_v16  ;;  %v649_v55 = vmul.f32 %v5209_v51, %v597_v48  ;;  %v650_v44 = vmul.f32 %v5212_v30, %v598_v49 }
 0x169   :  { %v695_v46 = vadd.f32 %v5192_v34, %v643_v52  ;;  %v697_v24 = vadd.f32 %v5216_v22, %v645_v53  ;;  %v698_v0 = vadd.f32 %v5219_v20, %v646_v43  ;;  %v487_v19 = vmul.f32 0.5, %v486_v54 }
 0x16a   :  { %v699_v35 = vadd.f32 %v5222_v28, %v647_v25  ;;  %v700_v39 = vadd.f32 %v5225_v14, %v648_v26  ;;  %v644_v56 = vmul.f32 %v5234_v10, %v592_v23  ;;  %v701_v36 = vadd.f32 %v5228_v12, %v649_v55  ;;  %v7302_v12 = vld [vmem:[#allocation43_spill] sm:$0xff] }
 0x16b   :  { %773 = vst [vmem:[#allocation1] ss:$9 sm:$0xff] %v695_v46  ;;  %v488_v32 = vsub.f32 1.5, %v487_v19  ;;  %v702_v30 = vadd.f32 %v5231_v18, %v650_v44 }
 0x16c   :  { %775 = vst [vmem:[#allocation1 + $0x2] ss:$9 sm:$0xff] %v697_v24  ;;  %v696_v28 = vadd.f32 %v5257_v63, %v644_v56 }
 0x16d   :  { %776 = vst [vmem:[#allocation1 + $0x3] ss:$9 sm:$0xff] %v698_v0  ;;  %v489_v51 = vmul.f32 %v4634_v27, %v488_v32 }
 0x16e   :  { %777 = vst [vmem:[#allocation1 + $0x4] ss:$9 sm:$0xff] %v699_v35 }
 0x16f   :  { %778 = vst [vmem:[#allocation1 + $0x5] ss:$9 sm:$0xff] %v700_v39  ;;  %v493_v14 = vsel %vm492_vm3, %v4634_v27, %v489_v51 }
 0x170   :  { %779 = vst [vmem:[#allocation1 + $0x6] ss:$9 sm:$0xff] %v701_v36  ;;  %v531_v22 = vperm.slane %v493_v14, 0  ;;  %v532_v20 = vperm.slane %v493_v14, 1 }
 0x171   :  { %780 = vst [vmem:[#allocation1 + $0x7] ss:$9 sm:$0xff] %v702_v30 }
 0x172   :  { %v599_v7 = vmul.f32 %v531_v22, %v7301_v8  ;;  %v600_v6 = vmul.f32 %v532_v20, %v7302_v12  ;;  %774 = vst [vmem:[#allocation1 + $0x1] ss:$9 sm:$0xff] %v696_v28 }
 0x174   :  { %v651_v18 = vmul.f32 %v5186_v38, %v599_v7  ;;  %v652_v5 = vmul.f32 %v5234_v10, %v600_v6  ;;  %v5376_v38 = vld [vmem:[%s7088_s4] ss:$0 sm:$0xff]  ;;  %s4762_s4 = smov 96  }
 0x176   :  { %v703_v9 = vadd.f32 %v5192_v34, %v651_v18  ;;  %v704_v4 = vadd.f32 %v5257_v63, %v652_v5 }
 0x179   :  { %v781_v2 = vld [vmem:[#allocation1] sm:$0xff] }
 0x17a   :  { %782 = vst [vmem:[#allocation1] ss:$9 sm:$0xff] %v703_v9  ;;  %v791_v37 = vpack.c.bf16 %v781_v2, %v772_v17 }
 0x17b   :  { %783 = vst [vmem:[#allocation1 + $0x1] ss:$9 sm:$0xff] %v704_v4 }
 0x17c   :  { %4490 = vmatmul.msk.bf16.gmra.mxu0 %vm164_vm0, %v791_v37 }
 0x182   :  { %v784_v1 = vld [vmem:[#allocation1] sm:$0xff] }
 0x183   :  { %v792_v27 = vpack.c.bf16 %v784_v1, %v784_v1 }
 0x18c   :  { %4491 = vmatmul.msk.bf16.gmra.mxu0 %vm164_vm0, %v792_v27 }
 0x1d8   :  { %v831_v10 = vpop.f32.mrf.mxu0 }
 0x1d9   :  { %v5379_v34 = vadd.f32 %v5376_v38, %v831_v10 }
 0x1db   :  { %v5382_v63 = vmul.f32 0.35355338, %v5379_v34  ;;  %v5540_v8 = vrot.slane %v5379_v34, 1  ;;  %v5545_v12 = vrot.slane %v5379_v34, 2  ;;  %v5549_v6 = vrot.slane %v5379_v34, 3 }
 0x1dc   :  { %v5553_v18 = vrot.slane %v5379_v34, 4  ;;  %v5557_v5 = vrot.slane %v5379_v34, 5  ;;  %v5561_v9 = vrot.slane %v5379_v34, 6  ;;  %v5565_v4 = vrot.slane %v5379_v34, 7 }
 0x1dd   :  { %v5385_v29 = vrot.slane %v5382_v63, 1  ;;  %v5388_v61 = vrot.slane %v5382_v63, 2  ;;  %v5391_v62 = vrot.slane %v5382_v63, 3  ;;  %884 = vst [vmem:[#allocation1] ss:$9 sm:$0xff] %v5382_v63  ;;  %v5395_v11 = vrot.slane %v5382_v63, 4 }
 0x1de   :  { %v5398_v13 = vrot.slane %v5382_v63, 5  ;;  %v5402_v21 = vrot.slane %v5382_v63, 6  ;;  %v5406_v59 = vrot.slane %v5382_v63, 7 }
 0x1df   :  { %886 = vst [vmem:[#allocation1 + $0x1] ss:$9 sm:$0xff] %v5385_v29 }
 0x1e0   :  { %888 = vst [vmem:[#allocation1 + $0x2] ss:$9 sm:$0xff] %v5388_v61  ;;  %v833_v58 = vpop.f32.mrf.mxu0 }
 0x1e1   :  { %890 = vst [vmem:[#allocation1 + $0x3] ss:$9 sm:$0xff] %v5391_v62  ;;  %v5411_v60 = vadd.f32 %v5376_v38, %v833_v58 }
 0x1e2   :  { %892 = vst [vmem:[#allocation1 + $0x4] ss:$9 sm:$0xff] %v5395_v11 }
 0x1e3   :  { %894 = vst [vmem:[#allocation1 + $0x5] ss:$9 sm:$0xff] %v5398_v13  ;;  %v5417_v31 = vmul.f32 0.35355338, %v5411_v60  ;;  %v5571_v2 = vrot.slane %v5411_v60, 1  ;;  %v5574_v1 = vrot.slane %v5411_v60, 2 }
 0x1e4   :  { %896 = vst [vmem:[#allocation1 + $0x6] ss:$9 sm:$0xff] %v5402_v21  ;;  %v5578_v27 = vrot.slane %v5411_v60, 3  ;;  %v5586_v10 = vrot.slane %v5411_v60, 5  ;;  %v5590_v58 = vrot.slane %v5411_v60, 6 }
 0x1e5   :  { %898 = vst [vmem:[#allocation1 + $0x7] ss:$9 sm:$0xff] %v5406_v59  ;;  %v5420_v33 = vrot.slane %v5417_v31, 1  ;;  %v5423_v57 = vrot.slane %v5417_v31, 2  ;;  %v5428_v40 = vrot.slane %v5417_v31, 3  ;;  %v5431_v3 = vrot.slane %v5417_v31, 4 }
 0x1e6   :  { %v5435_v42 = vrot.slane %v5417_v31, 5  ;;  %v5439_v47 = vrot.slane %v5417_v31, 6  ;;  %v5443_v41 = vrot.slane %v5417_v31, 7 }
 0x1e7   :  { %7303 = vst [vmem:[#allocation38_spill] sm:$0xff] %v5420_v33 }
 0x1e8   :  { %7304 = vst [vmem:[#allocation39_spill] sm:$0xff] %v5423_v57 }
 0x1e9   :  { %7305 = vst [vmem:[#allocation40_spill] sm:$0xff] %v5428_v40 }
 0x1ea   :  { %7306 = vst [vmem:[#allocation41_spill] sm:$0xff] %v5431_v3 }
 0x1eb   :  { %7307 = vst [vmem:[#allocation42_spill] sm:$0xff] %v5435_v42 }
 0x1ec   :  { %v5425_v23 = vld [vmem:[#allocation1] sm:$0xff]  ;;  %7308 = vst [vmem:[#allocation43_spill] sm:$0xff] %v5439_v47 }
 0x1ed   :  { %900 = vst [vmem:[#allocation1] ss:$9 sm:$0xff] %v5417_v31 }
 0x1ee   :  { %901 = vst [vmem:[#allocation1 + $0x1] ss:$9 sm:$0xff] %v5420_v33 }
 0x1ef   :  { %902 = vst [vmem:[#allocation1 + $0x2] ss:$9 sm:$0xff] %v5423_v57 }
 0x1f0   :  { %7309 = vst [vmem:[#allocation44_spill] sm:$0xff] %v5443_v41 }
 0x1f1   :  { %903 = vst [vmem:[#allocation1 + $0x3] ss:$9 sm:$0xff] %v5428_v40 }
 0x1f2   :  { %904 = vst [vmem:[#allocation1 + $0x4] ss:$9 sm:$0xff] %v5431_v3 }
 0x1f3   :  { %905 = vst [vmem:[#allocation1 + $0x5] ss:$9 sm:$0xff] %v5435_v42 }
 0x1f4   :  { %906 = vst [vmem:[#allocation1 + $0x6] ss:$9 sm:$0xff] %v5439_v47 }
 0x1f5   :  { %907 = vst [vmem:[#allocation1 + $0x7] ss:$9 sm:$0xff] %v5443_v41 }
 0x1f9   :  { %v836_v16 = vpop.f32.mrf.mxu0 }
 0x1fa   :  { %v5451_v45 = vadd.f32 %v5376_v38, %v836_v16  ;;  %v5594_v16 = vrot.slane %v5411_v60, 7 }
 0x1fc   :  { %v5453_v48 = vld [vmem:[#allocation1] sm:$0xff]  ;;  %v5456_v15 = vmul.f32 0.35355338, %v5451_v45 }
 0x1fe   :  { %7310 = vst [vmem:[#allocation45_spill] sm:$0xff] %v5456_v15  ;;  %v5460_v52 = vrot.slane %v5456_v15, 1  ;;  %v5463_v53 = vrot.slane %v5456_v15, 2  ;;  %v5468_v54 = vrot.slane %v5456_v15, 3  ;;  %v5472_v17 = vrot.slane %v5456_v15, 4 }
 0x1ff   :  { %909 = vst [vmem:[#allocation1] ss:$9 sm:$0xff] %v5456_v15  ;;  %v5479_v26 = vrot.slane %v5456_v15, 5  ;;  %v5483_v55 = vrot.slane %v5456_v15, 6  ;;  %v5487_v46 = vrot.slane %v5456_v15, 7 }
 0x200   :  { %7311 = vst [vmem:[#allocation46_spill] sm:$0xff] %v5460_v52 }
 0x201   :  { %v838_v49 = vpop.f32.mrf.mxu0  ;;  %7312 = vst [vmem:[#allocation47_spill] sm:$0xff] %v5463_v53 }
 0x202   :  { %7313 = vst [vmem:[#allocation48_spill] sm:$0xff] %v5468_v54  ;;  %v5476_v25 = vadd.f32 %v5376_v38, %v838_v49 }
 0x203   :  { %7314 = vst [vmem:[#allocation49_spill] sm:$0xff] %v5472_v17 }
 0x204   :  { %7315 = vst [vmem:[#allocation50_spill] sm:$0xff] %v5479_v26  ;;  %v5492_v24 = vmul.f32 0.35355338, %v5476_v25 }
 0x205   :  { %7316 = vst [vmem:[#allocation51_spill] sm:$0xff] %v5483_v55 }
 0x206   :  { %v5465_v43 = vld [vmem:[#allocation1] sm:$0xff]  ;;  %7317 = vst [vmem:[#allocation52_spill] sm:$0xff] %v5487_v46  ;;  %v5497_v19 = vrot.slane %v5492_v24, 1  ;;  %v5500_v35 = vrot.slane %v5492_v24, 2  ;;  %v5505_v32 = vrot.slane %v5492_v24, 3  ;;  %v5509_v56 = vrot.slane %v5492_v24, 4 }
 0x207   :  { %911 = vst [vmem:[#allocation1] ss:$9 sm:$0xff] %v5460_v52  ;;  %v5516_v30 = vrot.slane %v5492_v24, 5  ;;  %v5520_v51 = vrot.slane %v5492_v24, 6  ;;  %v5524_v28 = vrot.slane %v5492_v24, 7 }
 0x208   :  { %912 = vst [vmem:[#allocation1 + $0x1] ss:$9 sm:$0xff] %v5463_v53 }
 0x209   :  { %913 = vst [vmem:[#allocation1 + $0x2] ss:$9 sm:$0xff] %v5468_v54  ;;  %v841_v44 = vpop.f32.mrf.mxu0 }
 0x20a   :  { %914 = vst [vmem:[#allocation1 + $0x3] ss:$9 sm:$0xff] %v5472_v17  ;;  %v5513_v36 = vadd.f32 %v5376_v38, %v841_v44  ;;  %v5582_v38 = vrot.slane %v5411_v60, 4  ;;  %v5601_v44 = vrot.slane %v5451_v45, 1 }
 0x20b   :  { %915 = vst [vmem:[#allocation1 + $0x4] ss:$9 sm:$0xff] %v5479_v26  ;;  %v5637_v26 = vrot.slane %v5476_v25, 3 }
 0x20c   :  { %916 = vst [vmem:[#allocation1 + $0x5] ss:$9 sm:$0xff] %v5483_v55  ;;  %v5529_v14 = vmul.f32 0.35355338, %v5513_v36  ;;  %v5634_v55 = vrot.slane %v5476_v25, 2 }
 0x20d   :  { %7318 = vst [vmem:[#allocation53_spill] sm:$0xff] %v5492_v24 }
 0x20e   :  { %917 = vst [vmem:[#allocation1 + $0x6] ss:$9 sm:$0xff] %v5487_v46  ;;  %v5534_v22 = vrot.slane %v5529_v14, 1  ;;  %v5631_v46 = vrot.slane %v5476_v25, 1 }
 0x20f   :  { %918 = vst [vmem:[#allocation1 + $0x7] ss:$9 sm:$0xff] %v5492_v24 }
 0x210   :  { %7319 = vst [vmem:[#allocation54_spill] sm:$0xff] %v5497_v19 }
 0x211   :  { %v843_v0 = vpop.f32.mrf.mxu0  ;;  %7320 = vst [vmem:[#allocation55_spill] sm:$0xff] %v5500_v35 }
 0x212   :  { %7321 = vst [vmem:[#allocation56_spill] sm:$0xff] %v5505_v32  ;;  %v5604_v0 = vrot.slane %v5451_v45, 2 }
 0x213   :  { %7322 = vst [vmem:[#allocation57_spill] sm:$0xff] %v5509_v56 }
 0x214   :  { %7323 = vst [vmem:[#allocation58_spill] sm:$0xff] %v5513_v36 }
 0x215   :  { %7324 = vst [vmem:[#allocation59_spill] sm:$0xff] %v5516_v30 }
 0x216   :  { %v5502_v39 = vld [vmem:[#allocation1] sm:$0xff]  ;;  %7325 = vst [vmem:[#allocation60_spill] sm:$0xff] %v5520_v51 }
 0x217   :  { %920 = vst [vmem:[#allocation1] ss:$9 sm:$0xff] %v5497_v19 }
 0x218   :  { %921 = vst [vmem:[#allocation1 + $0x1] ss:$9 sm:$0xff] %v5500_v35 }
 0x219   :  { %922 = vst [vmem:[#allocation1 + $0x2] ss:$9 sm:$0xff] %v5505_v32  ;;  %v5623_v32 = vrot.slane %v5451_v45, 7 }
 0x21a   :  { %923 = vst [vmem:[#allocation1 + $0x3] ss:$9 sm:$0xff] %v5509_v56  ;;  %v5619_v56 = vrot.slane %v5451_v45, 6 }
 0x21b   :  { %7326 = vst [vmem:[#allocation61_spill] sm:$0xff] %v5524_v28 }
 0x21c   :  { %924 = vst [vmem:[#allocation1 + $0x4] ss:$9 sm:$0xff] %v5516_v30 }
 0x21d   :  { %925 = vst [vmem:[#allocation1 + $0x5] ss:$9 sm:$0xff] %v5520_v51  ;;  %v5615_v51 = vrot.slane %v5451_v45, 5 }
 0x21e   :  { %7327 = vst [vmem:[#allocation62_spill] sm:$0xff] %v5529_v14 }
 0x21f   :  { %926 = vst [vmem:[#allocation1 + $0x6] ss:$9 sm:$0xff] %v5524_v28  ;;  %v5611_v28 = vrot.slane %v5451_v45, 4 }
 0x220   :  { %927 = vst [vmem:[#allocation1 + $0x7] ss:$9 sm:$0xff] %v5529_v14 }
 0x221   :  { %7328 = vst [vmem:[#allocation63_spill] sm:$0xff] %v5534_v22 }
 0x222   :  { %7329 = vst [vmem:[#allocation64_spill] sm:$0xff] %v5631_v46 }
 0x223   :  { %7330 = vst [vmem:[#allocation65_spill] sm:$0xff] %v5634_v55 }
 0x224   :  { %7331 = vst [vmem:[#allocation66_spill] sm:$0xff] %v5637_v26 }
 0x227   :  { %v5536_v20 = vld [vmem:[#allocation1] sm:$0xff] }
 0x228   :  { %929 = vst [vmem:[#allocation1] ss:$9 sm:$0xff] %v5534_v22  ;;  %v5607_v22 = vrot.slane %v5451_v45, 3 }
 0x22f   :  { %v5542_v7 = vld [vmem:[#allocation1] sm:$0xff] }
 0x230   :  { %977 = vst [vmem:[#allocation1] ss:$9 sm:$0xff] %v5379_v34 }
 0x231   :  { %979 = vst [vmem:[#allocation1 + $0x1] ss:$9 sm:$0xff] %v5540_v8 }
 0x232   :  { %981 = vst [vmem:[#allocation1 + $0x2] ss:$9 sm:$0xff] %v5545_v12 }
 0x233   :  { %983 = vst [vmem:[#allocation1 + $0x3] ss:$9 sm:$0xff] %v5549_v6 }
 0x234   :  { %985 = vst [vmem:[#allocation1 + $0x4] ss:$9 sm:$0xff] %v5553_v18 }
 0x235   :  { %987 = vst [vmem:[#allocation1 + $0x5] ss:$9 sm:$0xff] %v5557_v5 }
 0x236   :  { %989 = vst [vmem:[#allocation1 + $0x6] ss:$9 sm:$0xff] %v5561_v9 }
 0x237   :  { %991 = vst [vmem:[#allocation1 + $0x7] ss:$9 sm:$0xff] %v5565_v4 }
 0x23e   :  { %v992_v37 = vld [vmem:[#allocation1] sm:$0xff] }
 0x23f   :  { %993 = vst [vmem:[#allocation1] ss:$9 sm:$0xff] %v5411_v60  ;;  %v1030_v14 = vpack.c.bf16 %v992_v37, %v992_v37 }
 0x240   :  { %994 = vst [vmem:[#allocation1 + $0x1] ss:$9 sm:$0xff] %v5571_v2 }
 0x241   :  { %995 = vst [vmem:[#allocation1 + $0x2] ss:$9 sm:$0xff] %v5574_v1  ;;  %v1106_v37 = vunpack.c.l.b16 %v1030_v14 }
 0x242   :  { %996 = vst [vmem:[#allocation1 + $0x3] ss:$9 sm:$0xff] %v5578_v27 }
 0x243   :  { %997 = vst [vmem:[#allocation1 + $0x4] ss:$9 sm:$0xff] %v5582_v38 }
 0x244   :  { %998 = vst [vmem:[#allocation1 + $0x5] ss:$9 sm:$0xff] %v5586_v10 }
 0x245   :  { %999 = vst [vmem:[#allocation1 + $0x6] ss:$9 sm:$0xff] %v5590_v58 }
 0x246   :  { %1000 = vst [vmem:[#allocation1 + $0x7] ss:$9 sm:$0xff] %v5594_v16 }
 0x24d   :  { %v1001_v49 = vld [vmem:[#allocation1] sm:$0xff] }
 0x24e   :  { %1002 = vst [vmem:[#allocation1] ss:$9 sm:$0xff] %v5451_v45  ;;  %v1031_v30 = vpack.c.bf16 %v1001_v49, %v1001_v49 }
 0x250   :  { %v1107_v35 = vunpack.c.l.b16 %v1031_v30 }
 0x252   :  { %v1109_v19 = vpack.c.b16 %v1107_v35, %v1106_v37  ;;  %v5641_v35 = vrot.slane %v5476_v25, 4  ;;  %v5661_v37 = vrot.slane %v5513_v36, 1 }
 0x254   :  { %1111 = vrot.lane.b32.xlu2 %v1109_v19, %s4762_s4  ;;  %7332 = vst [vmem:[#allocation67_spill] sm:$0xff] %v5641_v35  ;;  %v5650_v19 = vrot.slane %v5476_v25, 6 }
 0x255   :  { %v1003_v50 = vld [vmem:[#allocation1] sm:$0xff]  ;;  %7336 = vst [vmem:[#allocation71_spill] sm:$0xff] %v5661_v37 }
 0x256   :  { %1004 = vst [vmem:[#allocation1] ss:$9 sm:$0xff] %v5601_v44  ;;  %v1032_v49 = vpack.c.bf16 %v1003_v50, %v1003_v50  ;;  %v5646_v50 = vrot.slane %v5476_v25, 5 }
 0x257   :  { %1005 = vst [vmem:[#allocation1 + $0x1] ss:$9 sm:$0xff] %v5604_v0 }
 0x258   :  { %1006 = vst [vmem:[#allocation1 + $0x2] ss:$9 sm:$0xff] %v5607_v22  ;;  %v1108_v24 = vunpack.c.l.b16 %v1032_v49 }
 0x259   :  { %1007 = vst [vmem:[#allocation1 + $0x3] ss:$9 sm:$0xff] %v5611_v28 }
 0x25a   :  { %1008 = vst [vmem:[#allocation1 + $0x4] ss:$9 sm:$0xff] %v5615_v51  ;;  %v1110_v30 = vpack.c.b16 %v1108_v24, %v1108_v24  ;;  %v5654_v24 = vrot.slane %v5476_v25, 7 }
 0x25b   :  { %1009 = vst [vmem:[#allocation1 + $0x5] ss:$9 sm:$0xff] %v5619_v56 }
 0x25c   :  { %1010 = vst [vmem:[#allocation1 + $0x6] ss:$9 sm:$0xff] %v5623_v32  ;;  %1113 = vrot.lane.b32.xlu1 %v1110_v30, %s4762_s4 }
 0x25d   :  { %1011 = vst [vmem:[#allocation1 + $0x7] ss:$9 sm:$0xff] %v5476_v25 }
 0x25e   :  { %7333 = vst [vmem:[#allocation68_spill] sm:$0xff] %v5646_v50 }
 0x25f   :  { %7334 = vst [vmem:[#allocation69_spill] sm:$0xff] %v5650_v19 }
 0x260   :  { %7335 = vst [vmem:[#allocation70_spill] sm:$0xff] %v5654_v24 }
 0x264   :  { %v1012_v14 = vld [vmem:[#allocation1] sm:$0xff] }
 0x265   :  { %1013 = vst [vmem:[#allocation1] ss:$9 sm:$0xff] %v5631_v46  ;;  %v1033_v49 = vpack.c.bf16 %v1012_v14, %v1012_v14 }
 0x266   :  { %1014 = vst [vmem:[#allocation1 + $0x1] ss:$9 sm:$0xff] %v5634_v55 }
 0x267   :  { %1015 = vst [vmem:[#allocation1 + $0x2] ss:$9 sm:$0xff] %v5637_v26  ;;  %v1157_v54 = vunpack.c.l.b16 %v1033_v49 }
 0x268   :  { %1016 = vst [vmem:[#allocation1 + $0x3] ss:$9 sm:$0xff] %v5641_v35 }
 0x269   :  { %1017 = vst [vmem:[#allocation1 + $0x4] ss:$9 sm:$0xff] %v5646_v50 }
 0x26a   :  { %1018 = vst [vmem:[#allocation1 + $0x5] ss:$9 sm:$0xff] %v5650_v19 }
 0x26b   :  { %1019 = vst [vmem:[#allocation1 + $0x6] ss:$9 sm:$0xff] %v5654_v24 }
 0x26c   :  { %1020 = vst [vmem:[#allocation1 + $0x7] ss:$9 sm:$0xff] %v5513_v36 }
 0x273   :  { %v1021_v30 = vld [vmem:[#allocation1] sm:$0xff] }
 0x274   :  { %1022 = vst [vmem:[#allocation1] ss:$9 sm:$0xff] %v5661_v37  ;;  %v1034_v17 = vpack.c.bf16 %v1021_v30, %v1021_v30  ;;  %v938_v30 = vpack.c.bf16 %v5453_v48, %v5453_v48 }
 0x276   :  { %v1158_v53 = vunpack.c.l.b16 %v1034_v17 }
 0x278   :  { %v1160_v52 = vpack.c.b16 %v1158_v53, %v1157_v54 }
 0x27a   :  { %1162 = vrot.lane.b32.xlu2 %v1160_v52, %s4762_s4 }
 0x27b   :  { %v1023_v15 = vld [vmem:[#allocation1] sm:$0xff] }
 0x27c   :  { %1036 = vst [vmem:[#allocation1] ss:$9 sm:$0xff] %v5379_v34  ;;  %v1035_v41 = vpack.c.bf16 %v1023_v15, %v1023_v15 }
 0x27d   :  { %1038 = vst [vmem:[#allocation1 + $0x1] ss:$9 sm:$0xff] %v5540_v8 }
 0x27e   :  { %1040 = vst [vmem:[#allocation1 + $0x2] ss:$9 sm:$0xff] %v5545_v12  ;;  %v1159_v47 = vunpack.c.l.b16 %v1035_v41 }
 0x27f   :  { %1042 = vst [vmem:[#allocation1 + $0x3] ss:$9 sm:$0xff] %v5549_v6 }
 0x280   :  { %1044 = vst [vmem:[#allocation1 + $0x4] ss:$9 sm:$0xff] %v5553_v18  ;;  %v1161_v14 = vpack.c.b16 %v1159_v47, %v1159_v47 }
 0x281   :  { %1046 = vst [vmem:[#allocation1 + $0x5] ss:$9 sm:$0xff] %v5557_v5 }
 0x282   :  { %1048 = vst [vmem:[#allocation1 + $0x6] ss:$9 sm:$0xff] %v5561_v9  ;;  %1164 = vrot.lane.b32.xlu0 %v1161_v14, %s4762_s4 }
 0x283   :  { %1050 = vst [vmem:[#allocation1 + $0x7] ss:$9 sm:$0xff] %v5565_v4 }
 0x28a   :  { %v5674_v52 = vld [vmem:[#allocation1] sm:$0xff] }
 0x28b   :  { %1052 = vst [vmem:[#allocation1] ss:$9 sm:$0xff] %v5411_v60 }
 0x28c   :  { %1053 = vst [vmem:[#allocation1 + $0x1] ss:$9 sm:$0xff] %v5571_v2 }
 0x28d   :  { %1054 = vst [vmem:[#allocation1 + $0x2] ss:$9 sm:$0xff] %v5574_v1 }
 0x28e   :  { %1055 = vst [vmem:[#allocation1 + $0x3] ss:$9 sm:$0xff] %v5578_v27 }
 0x28f   :  { %1056 = vst [vmem:[#allocation1 + $0x4] ss:$9 sm:$0xff] %v5582_v38 }
 0x290   :  { %1057 = vst [vmem:[#allocation1 + $0x5] ss:$9 sm:$0xff] %v5586_v10 }
 0x291   :  { %1058 = vst [vmem:[#allocation1 + $0x6] ss:$9 sm:$0xff] %v5590_v58 }
 0x292   :  { %1059 = vst [vmem:[#allocation1 + $0x7] ss:$9 sm:$0xff] %v5594_v16 }
 0x299   :  { %v5684_v47 = vld [vmem:[#allocation1] sm:$0xff] }
 0x29a   :  { %1061 = vst [vmem:[#allocation1] ss:$9 sm:$0xff] %v5451_v45 }
 0x2a1   :  { %v5687_v41 = vld [vmem:[#allocation1] sm:$0xff] }
 0x2a2   :  { %1063 = vst [vmem:[#allocation1] ss:$9 sm:$0xff] %v5601_v44 }
 0x2a3   :  { %1064 = vst [vmem:[#allocation1 + $0x1] ss:$9 sm:$0xff] %v5604_v0 }
 0x2a4   :  { %1065 = vst [vmem:[#allocation1 + $0x2] ss:$9 sm:$0xff] %v5607_v22 }
 0x2a5   :  { %1066 = vst [vmem:[#allocation1 + $0x3] ss:$9 sm:$0xff] %v5611_v28 }
 0x2a6   :  { %1067 = vst [vmem:[#allocation1 + $0x4] ss:$9 sm:$0xff] %v5615_v51 }
 0x2a7   :  { %1068 = vst [vmem:[#allocation1 + $0x5] ss:$9 sm:$0xff] %v5619_v56 }
 0x2a8   :  { %1069 = vst [vmem:[#allocation1 + $0x6] ss:$9 sm:$0xff] %v5623_v32 }
 0x2a9   :  { %1070 = vst [vmem:[#allocation1 + $0x7] ss:$9 sm:$0xff] %v5476_v25 }
 0x2ae   :  { %v1112_v49 = vpop.permute.xlu2 %1111 }
 0x2af   :  { %v1123_v14 = vsel %vm1115_vm4, %v1112_v49, 0 }
 0x2b0   :  { %v5697_v15 = vld [vmem:[#allocation1] sm:$0xff] }
 0x2b1   :  { %1072 = vst [vmem:[#allocation1] ss:$9 sm:$0xff] %v5631_v46 }
 0x2b2   :  { %1073 = vst [vmem:[#allocation1 + $0x1] ss:$9 sm:$0xff] %v5634_v55 }
 0x2b3   :  { %1074 = vst [vmem:[#allocation1 + $0x2] ss:$9 sm:$0xff] %v5637_v26 }
 0x2b4   :  { %1075 = vst [vmem:[#allocation1 + $0x3] ss:$9 sm:$0xff] %v5641_v35 }
 0x2b5   :  { %1076 = vst [vmem:[#allocation1 + $0x4] ss:$9 sm:$0xff] %v5646_v50 }
 0x2b6   :  { %1077 = vst [vmem:[#allocation1 + $0x5] ss:$9 sm:$0xff] %v5650_v19 }
 0x2b7   :  { %1078 = vst [vmem:[#allocation1 + $0x6] ss:$9 sm:$0xff] %v5654_v24  ;;  %v937_v24 = vpack.c.bf16 %v5425_v23, %v5425_v23  ;;  %v941_v23 = vpack.c.bf16 %v5536_v20, %v5536_v20 }
 0x2b8   :  { %1079 = vst [vmem:[#allocation1 + $0x7] ss:$9 sm:$0xff] %v5513_v36  ;;  %v1099_v36 = vunpack.c.l.b16 %v938_v30 }
 0x2b9   :  { %v1098_v19 = vunpack.c.l.b16 %v937_v24 }
 0x2bb   :  { %v1101_v50 = vpack.c.b16 %v1099_v36, %v1098_v19  ;;  %v940_v36 = vpack.c.bf16 %v5502_v39, %v5502_v39 }
 0x2bf   :  { %v5707_v53 = vld [vmem:[#allocation1] sm:$0xff] }
 0x2c0   :  { %1081 = vst [vmem:[#allocation1] ss:$9 sm:$0xff] %v5661_v37  ;;  %v939_v37 = vpack.c.bf16 %v5465_v43, %v5465_v43  ;;  %v1149_v43 = vunpack.c.l.b16 %v940_v36 }
 0x2ce   :  { %v1114_v54 = vpop.permute.xlu1 %1113 }
 0x2cf   :  { %v1126_v17 = vsel %vm1115_vm4, %v1114_v54, 0  ;;  %v1100_v54 = vunpack.c.l.b16 %v939_v37 }
 0x2d0   :  { %1134 = vmatpush.bf16.xpose.msra.mxu1 %v1126_v17 }
 0x2d1   :  { %v1102_v48 = vpack.c.b16 %v1100_v54, %v1100_v54 }
 0x2d4   :  { %v1163_v49 = vpop.permute.xlu2 %1162 }
 0x2d5   :  { %v1173_v24 = vsel %vm1115_vm4, %v1163_v49, 0 }
 0x2d8   :  { %1135 = vmatpush.bf16.xpose.msra.mxu1 %v1123_v14 }
 0x2df   :  { %4492 = vmatmul.msk.bf16.vlgmr.msra.gmra.mxu1 %vm1115_vm4, %v1101_v50  ;;  %v1150_v50 = vunpack.c.l.b16 %v941_v23 }
 0x2e1   :  { %v1152_v19 = vpack.c.b16 %v1150_v50, %v1149_v43 }
 0x2ef   :  { %4493 = vmatmul.msk.bf16.gmra.mxu1 %vm1115_vm4, %v1102_v48 }
 0x2f4   :  { %v1165_v17 = vpop.permute.xlu0 %1164 }
 0x2f5   :  { %v1176_v35 = vsel %vm1115_vm4, %v1165_v17, 0 }
 0x2f6   :  { %1184 = vmatpush.bf16.xpose.msra.mxu2 %v1176_v35  ;;  %v942_v35 = vpack.c.bf16 %v5542_v7, %v5542_v7 }
 0x2f8   :  { %v1151_v37 = vunpack.c.l.b16 %v942_v35  ;;  %v1091_v35 = vpack.c.bf16 %v5687_v41, %v5687_v41 }
 0x2fa   :  { %v1153_v30 = vpack.c.b16 %v1151_v37, %v1151_v37  ;;  %v1283_v37 = vunpack.c.l.b16 %v1091_v35 }
 0x2fe   :  { %1185 = vmatpush.bf16.xpose.msra.mxu2 %v1173_v24 }
 0x305   :  { %4494 = vmatmul.msk.bf16.vlgmr.msra.gmra.mxu2 %vm1115_vm4, %v1152_v19 }
 0x315   :  { %4495 = vmatmul.msk.bf16.gmra.mxu2 %vm1115_vm4, %v1153_v30  ;;  %v1082_v30 = vld [vmem:[#allocation1] sm:$0xff] }
 0x35c   :  { %v1137_v20 = vpop.f32.mrf.mxu1 }
 0x35d   :  { %v1197_v14 = vsel %vm1196_vm5, %v1137_v20, -inf }
 0x35e   :  { %1198 = vmax.xlane.f32.xlu1 %v1197_v14  ;;  %v1285_v14 = vpack.c.b16 %v1283_v37, %v1283_v37 }
 0x364   :  { %v1139_v54 = vpop.f32.mrf.mxu1 }
 0x365   :  { %v1200_v39 = vsel %vm1196_vm5, %v1139_v54, -inf }
 0x366   :  { %1201 = vmax.xlane.f32.xlu0 %v1200_v39  ;;  %v1094_v39 = vpack.c.bf16 %v1082_v30, %v1082_v30 }
 0x36c   :  { %v1142_v17 = vpop.f32.mrf.mxu1 }
 0x36d   :  { %v1204_v48 = vsel %vm1203_vm6, %v1142_v17, -inf }
 0x36e   :  { %1205 = vmax.xlane.f32.xlu2 %v1204_v48  ;;  %v1334_v48 = vunpack.c.l.b16 %v1094_v39 }
 0x374   :  { %v1144_v49 = vpop.f32.mrf.mxu1 }
 0x375   :  { %v1336_v49 = vpack.c.b16 %v1334_v48, %v1334_v48 }
 0x388   :  { %v1187_v7 = vpop.f32.mrf.mxu2 }
 0x389   :  { %v1207_v23 = vsel %vm1196_vm5, %v1187_v7, -inf }
 0x38a   :  { %1208 = vmax.xlane.f32.xlu1 %v1207_v23 }
 0x390   :  { %v1189_v24 = vpop.f32.mrf.mxu2 }
 0x391   :  { %v1210_v36 = vsel %vm1196_vm5, %v1189_v24, -inf }
 0x392   :  { %1211 = vmax.xlane.f32.xlu0 %v1210_v36 }
 0x398   :  { %v1192_v50 = vpop.f32.mrf.mxu2 }
 0x399   :  { %v1213_v43 = vsel %vm1203_vm6, %v1192_v50, -inf }
 0x39a   :  { %1214 = vmax.xlane.f32.xlu2 %v1213_v43 }
 0x3a0   :  { %v1194_v19 = vpop.f32.mrf.mxu2 }
 0x3b2   :  { %1288 = vrot.lane.b32.xlu2 %v1285_v14, %s4763_s26 }
 0x3ba   :  { %1339 = vrot.lane.b32.xlu2 %v1336_v49, %s4763_s26 }
 0x3d1   :  { %v1199_v23 = vpop.xlane.xlu1 %1198 }
 0x3d2   :  { %v1216_v36 = vsub.f32 %v1137_v20, %v1199_v23  ;;  %v1090_v20 = vpack.c.bf16 %v5684_v47, %v5684_v47 }
 0x3d4   :  { %v1222_v26 = vmul.f32 1.442695, %v1216_v36 }
 0x3d6   :  { %4635 = vpow2.f32 %v1222_v26 }
 0x3d9   :  { %v1202_v43 = vpop.xlane.xlu0 %1201 }
 0x3da   :  { %v1217_v19 = vsub.f32 %v1139_v54, %v1202_v43  ;;  %v1282_v54 = vunpack.c.l.b16 %v1090_v20  ;;  %v1093_v43 = vpack.c.bf16 %v5707_v53, %v5707_v53 }
 0x3dc   :  { %v4636_v55 = vpop.eup %4635  ;;  %v1224_v46 = vmul.f32 1.442695, %v1217_v19  ;;  %v1333_v47 = vunpack.c.l.b16 %v1093_v43 }
 0x3dd   :  { %v1234_v41 = vsel %vm1196_vm5, %v4636_v55, 0.0 }
 0x3de   :  { %4637 = vpow2.f32 %v1224_v46  ;;  %1235 = vadd.xlane.f32.xlu1 %v1234_v41  ;;  %v1089_v46 = vpack.c.bf16 %v5674_v52, %v5674_v52  ;;  %v1092_v41 = vpack.c.bf16 %v5697_v15, %v5697_v15 }
 0x3e0   :  { %v1281_v49 = vunpack.c.l.b16 %v1089_v46 }
 0x3e1   :  { %v1206_v35 = vpop.xlane.xlu2 %1205 }
 0x3e2   :  { %v1218_v37 = vsub.f32 %v1142_v17, %v1206_v35  ;;  %v1284_v36 = vpack.c.b16 %v1282_v54, %v1281_v49 }
 0x3e4   :  { %v4638_v30 = vpop.eup %4637  ;;  %v1226_v14 = vmul.f32 1.442695, %v1218_v37  ;;  %v1332_v37 = vunpack.c.l.b16 %v1092_v41 }
 0x3e5   :  { %v1237_v39 = vsel %vm1196_vm5, %v4638_v30, 0.0 }
 0x3e6   :  { %4639 = vpow2.f32 %v1226_v14  ;;  %1238 = vadd.xlane.f32.xlu0 %v1237_v39  ;;  %v1335_v52 = vpack.c.b16 %v1333_v47, %v1332_v37 }
 0x3ec   :  { %v5742_v48 = vpop.eup %4639 }
 0x3ed   :  { %v1240_v26 = vsel %vm1203_vm6, %v5742_v48, 0.0 }
 0x3ee   :  { %1241 = vadd.xlane.f32.xlu0 %v1240_v26 }
 0x3f7   :  { %1286 = vrot.lane.b32.xlu1 %v1284_v36, %s4763_s26 }
 0x3fd   :  { %v1209_v17 = vpop.xlane.xlu1 %1208 }
 0x3fe   :  { %v1219_v23 = vsub.f32 %v1187_v7, %v1209_v17  ;;  %v4764_v17 = vmov 0  }
 0x3ff   :  { %1337 = vrot.lane.b32.xlu1 %v1335_v52, %s4763_s26 }
 0x400   :  { %v1228_v19 = vmul.f32 1.442695, %v1219_v23 }
 0x402   :  { %4641 = vpow2.f32 %v1228_v19 }
 0x405   :  { %v1212_v35 = vpop.xlane.xlu0 %1211 }
 0x406   :  { %v1220_v14 = vsub.f32 %v1189_v24, %v1212_v35  ;;  %v5758_v24 = vsel %vm1297_vm7, 65535, %v4764_v17 }
 0x408   :  { %v4642_v39 = vpop.eup %4641  ;;  %v1230_v26 = vmul.f32 1.442695, %v1220_v14 }
 0x409   :  { %v1243_v7 = vsel %vm1196_vm5, %v4642_v39, 0.0 }
 0x40a   :  { %4643 = vpow2.f32 %v1230_v26  ;;  %1244 = vadd.xlane.f32.xlu0 %v1243_v7 }
 0x40d   :  { %v1215_v53 = vpop.xlane.xlu2 %1214 }
 0x40e   :  { %v1221_v20 = vsub.f32 %v1192_v50, %v1215_v53 }
 0x410   :  { %v4644_v46 = vpop.eup %4643  ;;  %v1232_v54 = vmul.f32 1.442695, %v1221_v20 }
 0x411   :  { %v1246_v15 = vsel %vm1196_vm5, %v4644_v46, 0.0 }
 0x412   :  { %4645 = vpow2.f32 %v1232_v54  ;;  %1247 = vadd.xlane.f32.xlu0 %v1246_v15 }
 0x415   :  { %v1289_v49 = vpop.permute.xlu2 %1288 }
 0x416   :  { %v1301_v23 = vand.u32 %v5758_v24, %v1289_v49 }
 0x418   :  { %v4646_v36 = vpop.eup %4645  ;;  %1309 = vmatpush.bf16.msra.mxu3 %v1301_v23 }
 0x419   :  { %v1249_v43 = vsel %vm1203_vm6, %v4646_v36, 0.0 }
 0x41a   :  { %1250 = vadd.xlane.f32.xlu0 %v1249_v43 }
 0x41d   :  { %v1340_v7 = vpop.permute.xlu2 %1339 }
 0x41e   :  { %v1349_v20 = vand.u32 %v1340_v7, %v5758_v24 }
 0x451   :  { %v1236_v19 = vpop.xlane.xlu1 %1235 }
 0x452   :  { %4647 = vrcp.f32 %v1236_v19 }
 0x458   :  { %v4648_v41 = vpop.eup %4647 }
 0x459   :  { %v1239_v50 = vpop.xlane.xlu0 %1238  ;;  %v1258_v35 = vmul.f32 %v4648_v41, %v4636_v55 }
 0x45a   :  { %4649 = vrcp.f32 %v1239_v50 }
 0x45b   :  { %v1264_v26 = vpack.c.bf16 %v1258_v35, %v1258_v35 }
 0x45d   :  { %v1273_v15 = vunpack.c.l.b16 %v1264_v26 }
 0x460   :  { %v4650_v47 = vpop.eup %4649 }
 0x461   :  { %v1259_v37 = vmul.f32 %v4650_v47, %v4638_v30  ;;  %v1242_v14 = vpop.xlane.xlu0 %1241 }
 0x462   :  { %4651 = vrcp.f32 %v1242_v14 }
 0x463   :  { %v1265_v52 = vpack.c.bf16 %v1259_v37, %v1259_v37 }
 0x465   :  { %v1274_v53 = vunpack.c.l.b16 %v1265_v52 }
 0x467   :  { %v1276_v17 = vpack.c.b16 %v1274_v53, %v1273_v15 }
 0x468   :  { %v4652_v49 = vpop.eup %4651 }
 0x469   :  { %v1287_v54 = vpop.permute.xlu1 %1286  ;;  %v1260_v23 = vmul.f32 %v4652_v49, %v5742_v48 }
 0x46a   :  { %1310 = vmatpush.bf16.msra.mxu3 %v1287_v54 }
 0x46b   :  { %v1266_v43 = vpack.c.bf16 %v1260_v23, %v1260_v23 }
 0x46d   :  { %4496 = vmatmul.msk.bf16.vlgmr.msra.gmra.mxu3 %vm1196_vm5, %v1276_v17  ;;  %v1275_v19 = vunpack.c.l.b16 %v1266_v43 }
 0x46e   :  { %1357 = vmatpush.bf16.msrb.mxu3 %v1349_v20 }
 0x46f   :  { %v1277_v41 = vpack.c.b16 %v1275_v19, %v1275_v19 }
 0x471   :  { %v1338_v55 = vpop.permute.xlu1 %1337 }
 0x472   :  { %1358 = vmatpush.bf16.msrb.mxu3 %v1338_v55 }
 0x47d   :  { %v1245_v30 = vpop.xlane.xlu0 %1244  ;;  %4497 = vmatmul.msk.bf16.gmra.mxu3 %vm1196_vm5, %v1277_v41 }
 0x47e   :  { %4653 = vrcp.f32 %v1245_v30 }
 0x484   :  { %v4654_v47 = vpop.eup %4653 }
 0x485   :  { %v1248_v50 = vpop.xlane.xlu0 %1247  ;;  %v1261_v35 = vmul.f32 %v4654_v47, %v4642_v39 }
 0x486   :  { %4655 = vrcp.f32 %v1248_v50 }
 0x487   :  { %v1267_v26 = vpack.c.bf16 %v1261_v35, %v1261_v35 }
 0x489   :  { %v1324_v53 = vunpack.c.l.b16 %v1267_v26 }
 0x48c   :  { %v4656_v37 = vpop.eup %4655 }
 0x48d   :  { %v1262_v14 = vmul.f32 %v4656_v37, %v4644_v46  ;;  %v1251_v52 = vpop.xlane.xlu0 %1250 }
 0x48e   :  { %4657 = vrcp.f32 %v1251_v52 }
 0x48f   :  { %v1268_v7 = vpack.c.bf16 %v1262_v14, %v1262_v14 }
 0x491   :  { %v1325_v48 = vunpack.c.l.b16 %v1268_v7 }
 0x493   :  { %v1327_v20 = vpack.c.b16 %v1325_v48, %v1324_v53 }
 0x494   :  { %v4658_v54 = vpop.eup %4657 }
 0x495   :  { %4498 = vmatmul.msk.bf16.vlgmr.msrb.gmra.mxu3 %vm1196_vm5, %v1327_v20  ;;  %v1263_v15 = vmul.f32 %v4658_v54, %v4646_v36 }
 0x497   :  { %v1269_v17 = vpack.c.bf16 %v1263_v15, %v1263_v15 }
 0x499   :  { %v1326_v49 = vunpack.c.l.b16 %v1269_v17 }
 0x49b   :  { %v1328_v23 = vpack.c.b16 %v1326_v49, %v1326_v49 }
 0x4a5   :  { %4499 = vmatmul.msk.bf16.gmra.mxu3 %vm1196_vm5, %v1328_v23 }
 0x4f0   :  { %v1312_v55 = vpop.f32.mrf.mxu3 }
 0x4f1   :  { %v1375_v39 = vrot.slane %v1312_v55, 1  ;;  %v1376_v30 = vrot.slane %v1312_v55, 2  ;;  %v1377_v46 = vrot.slane %v1312_v55, 3  ;;  %1403 = vst [vmem:[#allocation1] ss:$9 sm:$0xff] %v1312_v55  ;;  %v1378_v43 = vrot.slane %v1312_v55, 4 }
 0x4f2   :  { %v1379_v19 = vrot.slane %v1312_v55, 5  ;;  %v1380_v50 = vrot.slane %v1312_v55, 6  ;;  %v1381_v41 = vrot.slane %v1312_v55, 7 }
 0x4f3   :  { %1405 = vst [vmem:[#allocation1 + $0x1] ss:$9 sm:$0xff] %v1375_v39 }
 0x4f4   :  { %1407 = vst [vmem:[#allocation1 + $0x2] ss:$9 sm:$0xff] %v1376_v30 }
 0x4f5   :  { %1409 = vst [vmem:[#allocation1 + $0x3] ss:$9 sm:$0xff] %v1377_v46 }
 0x4f6   :  { %1411 = vst [vmem:[#allocation1 + $0x4] ss:$9 sm:$0xff] %v1378_v43 }
 0x4f7   :  { %1413 = vst [vmem:[#allocation1 + $0x5] ss:$9 sm:$0xff] %v1379_v19 }
 0x4f8   :  { %1415 = vst [vmem:[#allocation1 + $0x6] ss:$9 sm:$0xff] %v1380_v50  ;;  %v1314_v36 = vpop.f32.mrf.mxu3 }
 0x4f9   :  { %1417 = vst [vmem:[#allocation1 + $0x7] ss:$9 sm:$0xff] %v1381_v41  ;;  %v1382_v47 = vrot.slane %v1314_v36, 1  ;;  %v1383_v37 = vrot.slane %v1314_v36, 2  ;;  %v1384_v52 = vrot.slane %v1314_v36, 3  ;;  %v1385_v26 = vrot.slane %v1314_v36, 4 }
 0x4fa   :  { %v1386_v7 = vrot.slane %v1314_v36, 5  ;;  %v1387_v48 = vrot.slane %v1314_v36, 6  ;;  %v1388_v53 = vrot.slane %v1314_v36, 7 }
 0x500   :  { %v1418_v35 = vld [vmem:[#allocation1] sm:$0xff]  ;;  %v1317_v14 = vpop.f32.mrf.mxu3 }
 0x501   :  { %1454 = vst.msk [vmem:[#allocation2] sm:$0xff] %vm1115_vm4, %v1418_v35 }
 0x502   :  { %1419 = vst [vmem:[#allocation1] ss:$9 sm:$0xff] %v1314_v36 }
 0x503   :  { %1420 = vst [vmem:[#allocation1 + $0x1] ss:$9 sm:$0xff] %v1382_v47 }
 0x504   :  { %1421 = vst [vmem:[#allocation1 + $0x2] ss:$9 sm:$0xff] %v1383_v37 }
 0x505   :  { %1422 = vst [vmem:[#allocation1 + $0x3] ss:$9 sm:$0xff] %v1384_v52 }
 0x506   :  { %1423 = vst [vmem:[#allocation1 + $0x4] ss:$9 sm:$0xff] %v1385_v26 }
 0x507   :  { %1424 = vst [vmem:[#allocation1 + $0x5] ss:$9 sm:$0xff] %v1386_v7 }
 0x508   :  { %1425 = vst [vmem:[#allocation1 + $0x6] ss:$9 sm:$0xff] %v1387_v48  ;;  %v1319_v20 = vpop.f32.mrf.mxu3 }
 0x509   :  { %1426 = vst [vmem:[#allocation1 + $0x7] ss:$9 sm:$0xff] %v1388_v53  ;;  %v7337_v20 = vld [vmem:[#allocation43_spill] sm:$0xff] }
 0x510   :  { %v1427_v54 = vld [vmem:[#allocation1] sm:$0xff] }
 0x511   :  { %1455 = vst.msk [vmem:[#allocation2 + $0x8] sm:$0xff] %vm1115_vm4, %v1427_v54  ;;  %v7338_v54 = vld [vmem:[#allocation44_spill] sm:$0xff] }
 0x512   :  { %1428 = vst [vmem:[#allocation1] ss:$9 sm:$0xff] %v1317_v14 }
 0x518   :  { %v1360_v15 = vpop.f32.mrf.mxu3 }
 0x519   :  { %v1389_v17 = vrot.slane %v1360_v15, 1  ;;  %v1390_v49 = vrot.slane %v1360_v15, 2  ;;  %v1391_v23 = vrot.slane %v1360_v15, 3  ;;  %v1392_v55 = vrot.slane %v1360_v15, 4  ;;  %1429 = vst [vmem:[#allocation1 + $0x1] ss:$9 sm:$0xff] %v1360_v15 }
 0x51a   :  { %v1393_v39 = vrot.slane %v1360_v15, 5  ;;  %v1394_v30 = vrot.slane %v1360_v15, 6  ;;  %v1395_v43 = vrot.slane %v1360_v15, 7 }
 0x51b   :  { %1430 = vst [vmem:[#allocation1 + $0x2] ss:$9 sm:$0xff] %v1389_v17  ;;  %v7339_v17 = vld [vmem:[#allocation45_spill] sm:$0xff] }
 0x51c   :  { %1431 = vst [vmem:[#allocation1 + $0x3] ss:$9 sm:$0xff] %v1390_v49 }
 0x51d   :  { %1432 = vst [vmem:[#allocation1 + $0x4] ss:$9 sm:$0xff] %v1391_v23  ;;  %v7340_v23 = vld [vmem:[#allocation46_spill] sm:$0xff] }
 0x51e   :  { %1433 = vst [vmem:[#allocation1 + $0x5] ss:$9 sm:$0xff] %v1392_v55  ;;  %v7341_v55 = vld [vmem:[#allocation47_spill] sm:$0xff] }
 0x51f   :  { %1434 = vst [vmem:[#allocation1 + $0x6] ss:$9 sm:$0xff] %v1393_v39  ;;  %v7342_v39 = vld [vmem:[#allocation48_spill] sm:$0xff] }
 0x520   :  { %v1362_v46 = vpop.f32.mrf.mxu3  ;;  %1435 = vst [vmem:[#allocation1 + $0x7] ss:$9 sm:$0xff] %v1394_v30  ;;  %v7343_v30 = vld [vmem:[#allocation49_spill] sm:$0xff] }
 0x521   :  { %v1396_v50 = vrot.slane %v1362_v46, 1  ;;  %v1397_v36 = vrot.slane %v1362_v46, 2  ;;  %v1398_v47 = vrot.slane %v1362_v46, 3  ;;  %v1399_v35 = vrot.slane %v1362_v46, 4 }
 0x522   :  { %v1400_v37 = vrot.slane %v1362_v46, 5  ;;  %v1401_v14 = vrot.slane %v1362_v46, 6  ;;  %v1402_v26 = vrot.slane %v1362_v46, 7 }
 0x527   :  { %v1436_v19 = vld [vmem:[#allocation1] sm:$0xff] }
 0x528   :  { %v1365_v41 = vpop.f32.mrf.mxu3  ;;  %1437 = vst [vmem:[#allocation1] ss:$9 sm:$0xff] %v1395_v43  ;;  %v7345_v43 = vld [vmem:[#allocation51_spill] sm:$0xff] }
 0x529   :  { %1456 = vst.msk [vmem:[#allocation2 + $0x10] sm:$0xff] %vm1115_vm4, %v1436_v19  ;;  %v7346_v19 = vld [vmem:[#allocation52_spill] sm:$0xff] }
 0x52a   :  { %1438 = vst [vmem:[#allocation1 + $0x1] ss:$9 sm:$0xff] %v1362_v46  ;;  %v7344_v46 = vld [vmem:[#allocation50_spill] sm:$0xff] }
 0x52b   :  { %1439 = vst [vmem:[#allocation1 + $0x2] ss:$9 sm:$0xff] %v1396_v50  ;;  %v7347_v50 = vld [vmem:[#allocation53_spill] sm:$0xff] }
 0x52c   :  { %1440 = vst [vmem:[#allocation1 + $0x3] ss:$9 sm:$0xff] %v1397_v36  ;;  %v7348_v36 = vld [vmem:[#allocation54_spill] sm:$0xff] }
 0x52d   :  { %1441 = vst [vmem:[#allocation1 + $0x4] ss:$9 sm:$0xff] %v1398_v47  ;;  %v7349_v47 = vld [vmem:[#allocation55_spill] sm:$0xff] }
 0x52e   :  { %1442 = vst [vmem:[#allocation1 + $0x5] ss:$9 sm:$0xff] %v1399_v35  ;;  %v7350_v35 = vld [vmem:[#allocation56_spill] sm:$0xff] }
 0x52f   :  { %1443 = vst [vmem:[#allocation1 + $0x6] ss:$9 sm:$0xff] %v1400_v37  ;;  %v7351_v37 = vld [vmem:[#allocation57_spill] sm:$0xff] }
 0x530   :  { %v1367_v52 = vpop.f32.mrf.mxu3  ;;  %1444 = vst [vmem:[#allocation1 + $0x7] ss:$9 sm:$0xff] %v1401_v14  ;;  %v7352_v14 = vld [vmem:[#allocation59_spill] sm:$0xff] }
 0x531   :  { %v7353_v52 = vld [vmem:[#allocation60_spill] sm:$0xff] }
 0x537   :  { %v1445_v7 = vld [vmem:[#allocation1] sm:$0xff] }
 0x538   :  { %1446 = vst [vmem:[#allocation1] ss:$9 sm:$0xff] %v1402_v26  ;;  %v7354_v26 = vld [vmem:[#allocation61_spill] sm:$0xff] }
 0x539   :  { %1457 = vst.msk [vmem:[#allocation2 + $0x18] sm:$0xff] %vm1115_vm4, %v1445_v7  ;;  %v7355_v7 = vld [vmem:[#allocation62_spill] sm:$0xff] }
 0x53a   :  { %1447 = vst [vmem:[#allocation1 + $0x1] ss:$9 sm:$0xff] %v1365_v41 }
 0x541   :  { %v5772_v48 = vld [vmem:[#allocation1] sm:$0xff] }
 0x542   :  { %1460 = vst [vmem:[#allocation1] ss:$9 sm:$0xff] %v5382_v63 }
 0x543   :  { %1462 = vst [vmem:[#allocation1 + $0x1] ss:$9 sm:$0xff] %v5385_v29 }
 0x544   :  { %1464 = vst [vmem:[#allocation1 + $0x2] ss:$9 sm:$0xff] %v5388_v61 }
 0x545   :  { %1466 = vst [vmem:[#allocation1 + $0x3] ss:$9 sm:$0xff] %v5391_v62 }
 0x546   :  { %1468 = vst [vmem:[#allocation1 + $0x4] ss:$9 sm:$0xff] %v5395_v11 }
 0x547   :  { %1470 = vst [vmem:[#allocation1 + $0x5] ss:$9 sm:$0xff] %v5398_v13 }
 0x548   :  { %1472 = vst [vmem:[#allocation1 + $0x6] ss:$9 sm:$0xff] %v5402_v21 }
 0x549   :  { %1474 = vst [vmem:[#allocation1 + $0x7] ss:$9 sm:$0xff] %v5406_v59 }
 0x54a   :  { %1459 = vst.msk [vmem:[#allocation2 + $0x20] sm:$0x3] %vm1458_vm8, %v5772_v48 }
 0x550   :  { %v1475_v53 = vld [vmem:[#allocation1] sm:$0xff] }
 0x551   :  { %1476 = vst [vmem:[#allocation1] ss:$9 sm:$0xff] %v5417_v31 }
 0x552   :  { %1477 = vst [vmem:[#allocation1 + $0x1] ss:$9 sm:$0xff] %v5420_v33 }
 0x553   :  { %1478 = vst [vmem:[#allocation1 + $0x2] ss:$9 sm:$0xff] %v5423_v57 }
 0x554   :  { %1479 = vst [vmem:[#allocation1 + $0x3] ss:$9 sm:$0xff] %v5428_v40 }
 0x555   :  { %1480 = vst [vmem:[#allocation1 + $0x4] ss:$9 sm:$0xff] %v5431_v3 }
 0x556   :  { %1481 = vst [vmem:[#allocation1 + $0x5] ss:$9 sm:$0xff] %v5435_v42 }
 0x557   :  { %1482 = vst [vmem:[#allocation1 + $0x6] ss:$9 sm:$0xff] %v7337_v20 }
 0x558   :  { %1483 = vst [vmem:[#allocation1 + $0x7] ss:$9 sm:$0xff] %v7338_v54 }
 0x55f   :  { %v1484_v15 = vld [vmem:[#allocation1] sm:$0xff] }
 0x560   :  { %1485 = vst [vmem:[#allocation1] ss:$9 sm:$0xff] %v7339_v17 }
 0x567   :  { %v5791_v49 = vld [vmem:[#allocation1] sm:$0xff] }
 0x568   :  { %1487 = vst [vmem:[#allocation1] ss:$9 sm:$0xff] %v7340_v23 }
 0x569   :  { %1488 = vst [vmem:[#allocation1 + $0x1] ss:$9 sm:$0xff] %v7341_v55 }
 0x56a   :  { %1489 = vst [vmem:[#allocation1 + $0x2] ss:$9 sm:$0xff] %v7342_v39 }
 0x56b   :  { %1490 = vst [vmem:[#allocation1 + $0x3] ss:$9 sm:$0xff] %v7343_v30 }
 0x56c   :  { %1491 = vst [vmem:[#allocation1 + $0x4] ss:$9 sm:$0xff] %v7344_v46 }
 0x56d   :  { %1492 = vst [vmem:[#allocation1 + $0x5] ss:$9 sm:$0xff] %v7345_v43  ;;  %v7356_v43 = vld [vmem:[#allocation63_spill] sm:$0xff] }
 0x56e   :  { %1493 = vst [vmem:[#allocation1 + $0x6] ss:$9 sm:$0xff] %v7346_v19  ;;  %v1513_v19 = vpack.c.bf16 %v1475_v53, %v1475_v53 }
 0x56f   :  { %1494 = vst [vmem:[#allocation1 + $0x7] ss:$9 sm:$0xff] %v7347_v50 }
 0x570   :  { %v1640_v46 = vunpack.c.l.b16 %v1513_v19 }
 0x576   :  { %v5801_v41 = vld [vmem:[#allocation1] sm:$0xff] }
 0x577   :  { %1496 = vst [vmem:[#allocation1] ss:$9 sm:$0xff] %v7348_v36  ;;  %v1514_v36 = vpack.c.bf16 %v1484_v15, %v1484_v15  ;;  %v1516_v54 = vpack.c.bf16 %v5801_v41, %v5801_v41 }
 0x578   :  { %1497 = vst [vmem:[#allocation1 + $0x1] ss:$9 sm:$0xff] %v7349_v47 }
 0x579   :  { %1498 = vst [vmem:[#allocation1 + $0x2] ss:$9 sm:$0xff] %v7350_v35  ;;  %v1641_v47 = vunpack.c.l.b16 %v1514_v36  ;;  %v7363_v35 = vld [vmem:[#allocation70_spill] sm:$0xff] }
 0x57a   :  { %1499 = vst [vmem:[#allocation1 + $0x3] ss:$9 sm:$0xff] %v7351_v37 }
 0x57b   :  { %1500 = vst [vmem:[#allocation1 + $0x4] ss:$9 sm:$0xff] %v7352_v14  ;;  %v1643_v30 = vpack.c.b16 %v1641_v47, %v1640_v46  ;;  %v7358_v14 = vld [vmem:[#allocation65_spill] sm:$0xff] }
 0x57c   :  { %1501 = vst [vmem:[#allocation1 + $0x5] ss:$9 sm:$0xff] %v7353_v52  ;;  %v7357_v52 = vld [vmem:[#allocation64_spill] sm:$0xff] }
 0x57d   :  { %1502 = vst [vmem:[#allocation1 + $0x6] ss:$9 sm:$0xff] %v7354_v26  ;;  %1645 = vrot.lane.b32.xlu0 %v1643_v30, %s4765_s27 }
 0x57e   :  { %1503 = vst [vmem:[#allocation1 + $0x7] ss:$9 sm:$0xff] %v7355_v7 }
 0x585   :  { %v5811_v50 = vld [vmem:[#allocation1] sm:$0xff] }
 0x586   :  { %1505 = vst [vmem:[#allocation1] ss:$9 sm:$0xff] %v7356_v43  ;;  %v1517_v17 = vpack.c.bf16 %v5811_v50, %v5811_v50  ;;  %v1515_v50 = vpack.c.bf16 %v5791_v49, %v5791_v49 }
 0x588   :  { %v1695_v42 = vunpack.c.l.b16 %v1517_v17 }
 0x58d   :  { %v5815_v37 = vld [vmem:[#allocation1] sm:$0xff] }
 0x58e   :  { %1519 = vst [vmem:[#allocation1] ss:$9 sm:$0xff] %v5379_v34  ;;  %v1518_v17 = vpack.c.bf16 %v5815_v37, %v5815_v37 }
 0x58f   :  { %1521 = vst [vmem:[#allocation1 + $0x1] ss:$9 sm:$0xff] %v5540_v8 }
 0x590   :  { %1523 = vst [vmem:[#allocation1 + $0x2] ss:$9 sm:$0xff] %v5545_v12  ;;  %v1696_v49 = vunpack.c.l.b16 %v1518_v17 }
 0x591   :  { %1525 = vst [vmem:[#allocation1 + $0x3] ss:$9 sm:$0xff] %v5549_v6 }
 0x592   :  { %1527 = vst [vmem:[#allocation1 + $0x4] ss:$9 sm:$0xff] %v5553_v18  ;;  %v1698_v41 = vpack.c.b16 %v1696_v49, %v1696_v49 }
 0x593   :  { %1529 = vst [vmem:[#allocation1 + $0x5] ss:$9 sm:$0xff] %v5557_v5 }
 0x594   :  { %1531 = vst [vmem:[#allocation1 + $0x6] ss:$9 sm:$0xff] %v5561_v9 }
 0x595   :  { %1533 = vst [vmem:[#allocation1 + $0x7] ss:$9 sm:$0xff] %v5565_v4 }
 0x59c   :  { %v1534_v53 = vld [vmem:[#allocation1] sm:$0xff] }
 0x59d   :  { %1535 = vst [vmem:[#allocation1] ss:$9 sm:$0xff] %v5411_v60  ;;  %v1572_v46 = vpack.c.bf16 %v1534_v53, %v1534_v53 }
 0x59e   :  { %1536 = vst [vmem:[#allocation1 + $0x1] ss:$9 sm:$0xff] %v5571_v2 }
 0x59f   :  { %1537 = vst [vmem:[#allocation1 + $0x2] ss:$9 sm:$0xff] %v5574_v1  ;;  %v1652_v36 = vunpack.c.l.b16 %v1572_v46  ;;  %v7359_v46 = vld [vmem:[#allocation66_spill] sm:$0xff] }
 0x5a0   :  { %1538 = vst [vmem:[#allocation1 + $0x3] ss:$9 sm:$0xff] %v5578_v27 }
 0x5a1   :  { %1539 = vst [vmem:[#allocation1 + $0x4] ss:$9 sm:$0xff] %v5582_v38 }
 0x5a2   :  { %1540 = vst [vmem:[#allocation1 + $0x5] ss:$9 sm:$0xff] %v5586_v10 }
 0x5a3   :  { %1541 = vst [vmem:[#allocation1 + $0x6] ss:$9 sm:$0xff] %v5590_v58 }
 0x5a4   :  { %1542 = vst [vmem:[#allocation1 + $0x7] ss:$9 sm:$0xff] %v5594_v16 }
 0x5ab   :  { %v1543_v15 = vld [vmem:[#allocation1] sm:$0xff] }
 0x5ac   :  { %1544 = vst [vmem:[#allocation1] ss:$9 sm:$0xff] %v5451_v45  ;;  %v1573_v19 = vpack.c.bf16 %v1543_v15, %v1543_v15 }
 0x5ae   :  { %v1653_v47 = vunpack.c.l.b16 %v1573_v19  ;;  %v7360_v19 = vld [vmem:[#allocation67_spill] sm:$0xff] }
 0x5b0   :  { %v1655_v43 = vpack.c.b16 %v1653_v47, %v1652_v36  ;;  %v7361_v36 = vld [vmem:[#allocation68_spill] sm:$0xff]  ;;  %v7362_v47 = vld [vmem:[#allocation69_spill] sm:$0xff] }
 0x5b2   :  { %1657 = vrot.lane.b32.xlu1 %v1655_v43, %s4766_s28  ;;  %v7364_v43 = vld [vmem:[#allocation58_spill] sm:$0xff] }
 0x5b3   :  { %v1545_v30 = vld [vmem:[#allocation1] sm:$0xff] }
 0x5b4   :  { %1546 = vst [vmem:[#allocation1] ss:$9 sm:$0xff] %v5601_v44  ;;  %v1574_v53 = vpack.c.bf16 %v1545_v30, %v1545_v30 }
 0x5b5   :  { %1547 = vst [vmem:[#allocation1 + $0x1] ss:$9 sm:$0xff] %v5604_v0 }
 0x5b6   :  { %1548 = vst [vmem:[#allocation1 + $0x2] ss:$9 sm:$0xff] %v5607_v22  ;;  %v1654_v7 = vunpack.c.l.b16 %v1574_v53  ;;  %v7365_v53 = vld [vmem:[#allocation71_spill] sm:$0xff] }
 0x5b7   :  { %1549 = vst [vmem:[#allocation1 + $0x3] ss:$9 sm:$0xff] %v5611_v28 }
 0x5b8   :  { %1550 = vst [vmem:[#allocation1 + $0x4] ss:$9 sm:$0xff] %v5615_v51  ;;  %v1656_v15 = vpack.c.b16 %v1654_v7, %v1654_v7 }
 0x5b9   :  { %1551 = vst [vmem:[#allocation1 + $0x5] ss:$9 sm:$0xff] %v5619_v56 }
 0x5ba   :  { %1552 = vst [vmem:[#allocation1 + $0x6] ss:$9 sm:$0xff] %v5623_v32  ;;  %1659 = vrot.lane.b32.xlu2 %v1656_v15, %s4766_s28 }
 0x5bb   :  { %1553 = vst [vmem:[#allocation1 + $0x7] ss:$9 sm:$0xff] %v5476_v25 }
 0x5c2   :  { %v1554_v26 = vld [vmem:[#allocation1] sm:$0xff] }
 0x5c3   :  { %1555 = vst [vmem:[#allocation1] ss:$9 sm:$0xff] %v7357_v52  ;;  %v1575_v30 = vpack.c.bf16 %v1554_v26, %v1554_v26 }
 0x5c4   :  { %1556 = vst [vmem:[#allocation1 + $0x1] ss:$9 sm:$0xff] %v7358_v14 }
 0x5c5   :  { %1557 = vst [vmem:[#allocation1 + $0x2] ss:$9 sm:$0xff] %v7359_v46  ;;  %v1706_v55 = vunpack.c.l.b16 %v1575_v30  ;;  %v1694_v30 = vunpack.c.l.b16 %v1516_v54 }
 0x5c6   :  { %1558 = vst [vmem:[#allocation1 + $0x3] ss:$9 sm:$0xff] %v7360_v19 }
 0x5c7   :  { %1559 = vst [vmem:[#allocation1 + $0x4] ss:$9 sm:$0xff] %v7361_v36 }
 0x5c8   :  { %1560 = vst [vmem:[#allocation1 + $0x5] ss:$9 sm:$0xff] %v7362_v47 }
 0x5c9   :  { %1561 = vst [vmem:[#allocation1 + $0x6] ss:$9 sm:$0xff] %v7363_v35 }
 0x5ca   :  { %1562 = vst [vmem:[#allocation1 + $0x7] ss:$9 sm:$0xff] %v7364_v43 }
 0x5d1   :  { %v1563_v7 = vld [vmem:[#allocation1] sm:$0xff] }
 0x5d2   :  { %1564 = vst [vmem:[#allocation1] ss:$9 sm:$0xff] %v7365_v53  ;;  %v1576_v39 = vpack.c.bf16 %v1563_v7, %v1563_v7 }
 0x5d4   :  { %v1707_v23 = vunpack.c.l.b16 %v1576_v39 }
 0x5d6   :  { %v1709_v15 = vpack.c.b16 %v1707_v23, %v1706_v55  ;;  %v1697_v23 = vpack.c.b16 %v1695_v42, %v1694_v30 }
 0x5d8   :  { %1711 = vrot.lane.b32.xlu1 %v1709_v15, %s4766_s28 }
 0x5d9   :  { %v1565_v20 = vld [vmem:[#allocation1] sm:$0xff] }
 0x5da   :  { %1578 = vst [vmem:[#allocation1] ss:$9 sm:$0xff] %v5379_v34  ;;  %v1577_v26 = vpack.c.bf16 %v1565_v20, %v1565_v20  ;;  %v1642_v20 = vunpack.c.l.b16 %v1515_v50 }
 0x5db   :  { %1580 = vst [vmem:[#allocation1 + $0x1] ss:$9 sm:$0xff] %v5540_v8 }
 0x5dc   :  { %1582 = vst [vmem:[#allocation1 + $0x2] ss:$9 sm:$0xff] %v5545_v12  ;;  %v1708_v39 = vunpack.c.l.b16 %v1577_v26  ;;  %v1644_v54 = vpack.c.b16 %v1642_v20, %v1642_v20 }
 0x5dd   :  { %1584 = vst [vmem:[#allocation1 + $0x3] ss:$9 sm:$0xff] %v5549_v6 }
 0x5de   :  { %1586 = vst [vmem:[#allocation1 + $0x4] ss:$9 sm:$0xff] %v5553_v18  ;;  %v1710_v55 = vpack.c.b16 %v1708_v39, %v1708_v39 }
 0x5df   :  { %1588 = vst [vmem:[#allocation1 + $0x5] ss:$9 sm:$0xff] %v5557_v5 }
 0x5e0   :  { %1590 = vst [vmem:[#allocation1 + $0x6] ss:$9 sm:$0xff] %v5561_v9  ;;  %1699 = vrot.lane.b32.xlu1 %v1697_v23, %s4765_s27  ;;  %1713 = vrot.lane.b32.xlu2 %v1710_v55, %s4766_s28 }
 0x5e1   :  { %1592 = vst [vmem:[#allocation1 + $0x7] ss:$9 sm:$0xff] %v5565_v4 }
 0x5e8   :  { %v5872_v42 = vld [vmem:[#allocation1] sm:$0xff]  ;;  %1647 = vrot.lane.b32.xlu2 %v1644_v54, %s4765_s27 }
 0x5e9   :  { %1594 = vst [vmem:[#allocation1] ss:$9 sm:$0xff] %v5411_v60 }
 0x5ea   :  { %1595 = vst [vmem:[#allocation1 + $0x1] ss:$9 sm:$0xff] %v5571_v2 }
 0x5eb   :  { %1596 = vst [vmem:[#allocation1 + $0x2] ss:$9 sm:$0xff] %v5574_v1 }
 0x5ec   :  { %1597 = vst [vmem:[#allocation1 + $0x3] ss:$9 sm:$0xff] %v5578_v27 }
 0x5ed   :  { %1598 = vst [vmem:[#allocation1 + $0x4] ss:$9 sm:$0xff] %v5582_v38 }
 0x5ee   :  { %1599 = vst [vmem:[#allocation1 + $0x5] ss:$9 sm:$0xff] %v5586_v10 }
 0x5ef   :  { %1600 = vst [vmem:[#allocation1 + $0x6] ss:$9 sm:$0xff] %v5590_v58  ;;  %v1646_v55 = vpop.permute.xlu0 %1645 }
 0x5f0   :  { %1601 = vst [vmem:[#allocation1 + $0x7] ss:$9 sm:$0xff] %v5594_v16  ;;  %1701 = vrot.lane.b32.xlu2 %v1698_v41, %s4765_s27 }
 0x5f7   :  { %v5885_v48 = vld [vmem:[#allocation1] sm:$0xff] }
 0x5f8   :  { %1603 = vst [vmem:[#allocation1] ss:$9 sm:$0xff] %v5451_v45 }
 0x5ff   :  { %v1604_v37 = vld [vmem:[#allocation1] sm:$0xff] }
 0x600   :  { %1605 = vst [vmem:[#allocation1] ss:$9 sm:$0xff] %v5601_v44 }
 0x601   :  { %1606 = vst [vmem:[#allocation1 + $0x1] ss:$9 sm:$0xff] %v5604_v0 }
 0x602   :  { %1607 = vst [vmem:[#allocation1 + $0x2] ss:$9 sm:$0xff] %v5607_v22 }
 0x603   :  { %1608 = vst [vmem:[#allocation1 + $0x3] ss:$9 sm:$0xff] %v5611_v28 }
 0x604   :  { %1609 = vst [vmem:[#allocation1 + $0x4] ss:$9 sm:$0xff] %v5615_v51 }
 0x605   :  { %1610 = vst [vmem:[#allocation1 + $0x5] ss:$9 sm:$0xff] %v5619_v56 }
 0x606   :  { %1611 = vst [vmem:[#allocation1 + $0x6] ss:$9 sm:$0xff] %v5623_v32 }
 0x607   :  { %1612 = vst [vmem:[#allocation1 + $0x7] ss:$9 sm:$0xff] %v5476_v25 }
 0x60e   :  { %v5896_v7 = vld [vmem:[#allocation1] sm:$0xff] }
 0x60f   :  { %1614 = vst [vmem:[#allocation1] ss:$9 sm:$0xff] %v7357_v52 }
 0x610   :  { %1615 = vst [vmem:[#allocation1 + $0x1] ss:$9 sm:$0xff] %v7358_v14 }
 0x611   :  { %1616 = vst [vmem:[#allocation1 + $0x2] ss:$9 sm:$0xff] %v7359_v46 }
 0x612   :  { %1617 = vst [vmem:[#allocation1 + $0x3] ss:$9 sm:$0xff] %v7360_v19 }
 0x613   :  { %1618 = vst [vmem:[#allocation1 + $0x4] ss:$9 sm:$0xff] %v7361_v36 }
 0x614   :  { %1619 = vst [vmem:[#allocation1 + $0x5] ss:$9 sm:$0xff] %v7362_v47  ;;  %v1660_v26 = vpop.permute.xlu2 %1659 }
 0x615   :  { %1620 = vst [vmem:[#allocation1 + $0x6] ss:$9 sm:$0xff] %v7363_v35  ;;  %v1671_v30 = vsel %vm1115_vm4, %v1660_v26, 0 }
 0x616   :  { %1621 = vst [vmem:[#allocation1 + $0x7] ss:$9 sm:$0xff] %v7364_v43  ;;  %1679 = vmatpush.bf16.xpose.msrb.mxu1 %v1671_v30 }
 0x61d   :  { %v5906_v15 = vld [vmem:[#allocation1] sm:$0xff] }
 0x61e   :  { %1623 = vst [vmem:[#allocation1] ss:$9 sm:$0xff] %v7365_v53  ;;  %v1633_v53 = vpack.c.bf16 %v1604_v37, %v1604_v37 }
 0x624   :  { %v1658_v39 = vpop.permute.xlu1 %1657 }
 0x625   :  { %v1668_v23 = vsel %vm1115_vm4, %v1658_v39, 0 }
 0x626   :  { %1680 = vmatpush.bf16.xpose.msrb.mxu1 %v1668_v23 }
 0x62d   :  { %4500 = vmatmul.msk.bf16.vlgmr.msrb.gmra.mxu1 %vm1115_vm4, %v1646_v55 }
 0x63a   :  { %v1714_v50 = vpop.permute.xlu2 %1713 }
 0x63b   :  { %v1725_v20 = vsel %vm1115_vm4, %v1714_v50, 0 }
 0x63c   :  { %1733 = vmatpush.bf16.xpose.msrb.mxu2 %v1725_v20 }
 0x642   :  { %v1648_v54 = vpop.permute.xlu2 %1647 }
 0x643   :  { %4501 = vmatmul.msk.bf16.gmra.mxu1 %vm1115_vm4, %v1648_v54 }
 0x64a   :  { %v1712_v17 = vpop.permute.xlu1 %1711  ;;  %v1702_v26 = vpop.permute.xlu2 %1701 }
 0x64b   :  { %v1722_v49 = vsel %vm1115_vm4, %v1712_v17, 0 }
 0x64c   :  { %1734 = vmatpush.bf16.xpose.msrb.mxu2 %v1722_v49 }
 0x652   :  { %v1700_v41 = vpop.permute.xlu1 %1699 }
 0x653   :  { %4502 = vmatmul.msk.bf16.vlgmr.msrb.gmra.mxu2 %vm1115_vm4, %v1700_v41 }
 0x663   :  { %4503 = vmatmul.msk.bf16.gmra.mxu2 %vm1115_vm4, %v1702_v26 }
 0x6aa   :  { %v1682_v30 = vpop.f32.mrf.mxu1 }
 0x6ab   :  { %v1745_v39 = vsel %vm1196_vm5, %v1682_v30, -inf }
 0x6ac   :  { %1746 = vmax.xlane.f32.xlu1 %v1745_v39  ;;  %v1830_v39 = vunpack.c.l.b16 %v1633_v53 }
 0x6b2   :  { %v1684_v23 = vpop.f32.mrf.mxu1 }
 0x6b3   :  { %v1748_v55 = vsel %vm1196_vm5, %v1684_v23, -inf }
 0x6b4   :  { %1749 = vmax.xlane.f32.xlu2 %v1748_v55  ;;  %v1832_v55 = vpack.c.b16 %v1830_v39, %v1830_v39 }
 0x6c0   :  { %v1687_v50 = vpop.f32.mrf.mxu1 }
 0x6c1   :  { %v1751_v20 = vsel %vm1203_vm6, %v1687_v50, -inf }
 0x6c2   :  { %1752 = vmax.xlane.f32.xlu0 %v1751_v20 }
 0x6c8   :  { %v1689_v54 = vpop.f32.mrf.mxu1 }
 0x6d6   :  { %v1736_v17 = vpop.f32.mrf.mxu2 }
 0x6d7   :  { %v1754_v49 = vsel %vm1196_vm5, %v1736_v17, -inf }
 0x6d8   :  { %1755 = vmax.xlane.f32.xlu0 %v1754_v49 }
 0x6de   :  { %v1738_v41 = vpop.f32.mrf.mxu2 }
 0x6df   :  { %v1757_v26 = vsel %vm1196_vm5, %v1738_v41, -inf }
 0x6e0   :  { %1758 = vmax.xlane.f32.xlu1 %v1757_v26 }
 0x6e6   :  { %v1741_v43 = vpop.f32.mrf.mxu2 }
 0x6e7   :  { %v1760_v35 = vsel %vm1203_vm6, %v1741_v43, -inf }
 0x6e8   :  { %1761 = vmax.xlane.f32.xlu2 %v1760_v35 }
 0x6ec   :  { %1835 = vrot.lane.b32.xlu0 %v1832_v55, %s4767_s29 }
 0x6ee   :  { %v1743_v20 = vpop.f32.mrf.mxu2 }
 0x71f   :  { %v1747_v54 = vpop.xlane.xlu1 %1746 }
 0x720   :  { %v1763_v47 = vsub.f32 %v1682_v30, %v1747_v54  ;;  %v1632_v30 = vpack.c.bf16 %v5885_v48, %v5885_v48 }
 0x722   :  { %v1769_v36 = vmul.f32 1.442695, %v1763_v47 }
 0x724   :  { %4659 = vpow2.f32 %v1769_v36 }
 0x727   :  { %v1750_v49 = vpop.xlane.xlu2 %1749 }
 0x728   :  { %v1764_v19 = vsub.f32 %v1684_v23, %v1750_v49  ;;  %v1829_v23 = vunpack.c.l.b16 %v1632_v30  ;;  %v1624_v49 = vld [vmem:[#allocation1] sm:$0xff] }
 0x72a   :  { %v5924_v46 = vpop.eup %4659  ;;  %v1771_v26 = vmul.f32 1.442695, %v1764_v19  ;;  %v1631_v19 = vpack.c.bf16 %v5872_v42, %v5872_v42 }
 0x72b   :  { %v1781_v53 = vsel %vm1196_vm5, %v5924_v46, 0.0 }
 0x72c   :  { %4661 = vpow2.f32 %v1771_v26  ;;  %1782 = vadd.xlane.f32.xlu1 %v1781_v53  ;;  %v1828_v54 = vunpack.c.l.b16 %v1631_v19 }
 0x72e   :  { %v1831_v26 = vpack.c.b16 %v1829_v23, %v1828_v54 }
 0x732   :  { %v4662_v39 = vpop.eup %4661 }
 0x733   :  { %v1784_v55 = vsel %vm1196_vm5, %v4662_v39, 0.0 }
 0x734   :  { %1785 = vadd.xlane.f32.xlu2 %v1784_v55 }
 0x735   :  { %v1753_v35 = vpop.xlane.xlu0 %1752 }
 0x736   :  { %v1765_v37 = vsub.f32 %v1687_v50, %v1753_v35 }
 0x738   :  { %v1773_v14 = vmul.f32 1.442695, %v1765_v37 }
 0x73a   :  { %4663 = vpow2.f32 %v1773_v14  ;;  %v1636_v14 = vpack.c.bf16 %v1624_v49, %v1624_v49  ;;  %v1634_v49 = vpack.c.bf16 %v5896_v7, %v5896_v7 }
 0x73c   :  { %v1878_v55 = vunpack.c.l.b16 %v1636_v14 }
 0x73e   :  { %v1880_v42 = vpack.c.b16 %v1878_v55, %v1878_v55 }
 0x740   :  { %v4664_v47 = vpop.eup %4663 }
 0x741   :  { %v1787_v36 = vsel %vm1203_vm6, %v4664_v47, 0.0 }
 0x742   :  { %1788 = vadd.xlane.f32.xlu0 %v1787_v36 }
 0x745   :  { %1833 = vrot.lane.b32.xlu1 %v1831_v26, %s4767_s29 }
 0x74b   :  { %v1756_v20 = vpop.xlane.xlu0 %1755 }
 0x74c   :  { %v1766_v50 = vsub.f32 %v1736_v17, %v1756_v20 }
 0x74e   :  { %v1775_v53 = vmul.f32 1.442695, %v1766_v50  ;;  %v1635_v50 = vpack.c.bf16 %v5906_v15, %v5906_v15 }
 0x750   :  { %4665 = vpow2.f32 %v1775_v53  ;;  %v1877_v26 = vunpack.c.l.b16 %v1635_v50  ;;  %v1876_v53 = vunpack.c.l.b16 %v1634_v49 }
 0x753   :  { %v1759_v35 = vpop.xlane.xlu1 %1758 }
 0x754   :  { %v1767_v37 = vsub.f32 %v1738_v41, %v1759_v35  ;;  %v1879_v35 = vpack.c.b16 %v1877_v26, %v1876_v53 }
 0x756   :  { %v4666_v52 = vpop.eup %4665  ;;  %v1777_v48 = vmul.f32 1.442695, %v1767_v37  ;;  %1883 = vrot.lane.b32.xlu0 %v1880_v42, %s4767_s29 }
 0x757   :  { %v1790_v36 = vsel %vm1196_vm5, %v4666_v52, 0.0 }
 0x758   :  { %4667 = vpow2.f32 %v1777_v48  ;;  %1791 = vadd.xlane.f32.xlu2 %v1790_v36 }
 0x75b   :  { %v1762_v41 = vpop.xlane.xlu2 %1761 }
 0x75c   :  { %v1768_v20 = vsub.f32 %v1741_v43, %v1762_v41 }
 0x75e   :  { %v4668_v17 = vpop.eup %4667  ;;  %v1836_v30 = vpop.permute.xlu0 %1835  ;;  %v1779_v54 = vmul.f32 1.442695, %v1768_v20 }
 0x75f   :  { %v1845_v19 = vand.u32 %v1836_v30, %v5758_v24  ;;  %v1793_v23 = vsel %vm1196_vm5, %v4668_v17, 0.0 }
 0x760   :  { %1794 = vadd.xlane.f32.xlu2 %v1793_v23  ;;  %4669 = vpow2.f32 %v1779_v54 }
 0x761   :  { %1853 = vmatpush.bf16.msrb.mxu0 %v1845_v19  ;;  %4597 = vmatpush.bf16.msra.mxu3 %v1845_v19 }
 0x766   :  { %v4670_v14 = vpop.eup %4669 }
 0x767   :  { %v1796_v37 = vsel %vm1203_vm6, %v4670_v14, 0.0 }
 0x76f   :  { %1797 = vadd.xlane.f32.xlu1 %v1796_v37 }
 0x778   :  { %1881 = vrot.lane.b32.xlu2 %v1879_v35, %s4767_s29 }
 0x79f   :  { %v1783_v55 = vpop.xlane.xlu1 %1782 }
 0x7a0   :  { %4671 = vrcp.f32 %v1783_v55 }
 0x7a6   :  { %v4672_v48 = vpop.eup %4671 }
 0x7a7   :  { %v1786_v43 = vpop.xlane.xlu2 %1785  ;;  %v1805_v15 = vmul.f32 %v4672_v48, %v5924_v46 }
 0x7a8   :  { %4673 = vrcp.f32 %v1786_v43 }
 0x7a9   :  { %v1811_v19 = vpack.c.bf16 %v1805_v15, %v1805_v15 }
 0x7ab   :  { %v1820_v20 = vunpack.c.l.b16 %v1811_v19 }
 0x7ae   :  { %v4674_v36 = vpop.eup %4673 }
 0x7af   :  { %v1806_v42 = vmul.f32 %v4674_v36, %v4662_v39 }
 0x7b1   :  { %v1812_v7 = vpack.c.bf16 %v1806_v42, %v1806_v42 }
 0x7b3   :  { %v1821_v23 = vunpack.c.l.b16 %v1812_v7 }
 0x7b5   :  { %v1789_v30 = vpop.xlane.xlu0 %1788  ;;  %v1823_v26 = vpack.c.b16 %v1821_v23, %v1820_v20 }
 0x7b6   :  { %4675 = vrcp.f32 %v1789_v30 }
 0x7b7   :  { %v1834_v50 = vpop.permute.xlu1 %1833 }
 0x7b8   :  { %1854 = vmatpush.bf16.msrb.mxu0 %v1834_v50  ;;  %4598 = vmatpush.bf16.msra.mxu3 %v1834_v50 }
 0x7bb   :  { %4504 = vmatmul.msk.bf16.vlgmr.msrb.gmra.mxu0 %vm1196_vm5, %v1823_v26 }
 0x7bc   :  { %v4676_v41 = vpop.eup %4675 }
 0x7bd   :  { %v1807_v54 = vmul.f32 %v4676_v41, %v4664_v47 }
 0x7bf   :  { %v1813_v49 = vpack.c.bf16 %v1807_v54, %v1807_v54 }
 0x7c1   :  { %v1822_v53 = vunpack.c.l.b16 %v1813_v49 }
 0x7c3   :  { %v1824_v35 = vpack.c.b16 %v1822_v53, %v1822_v53 }
 0x7c5   :  { %4505 = vmatmul.msk.bf16.vlgmr.msra.gmra.mxu3 %vm1196_vm5, %v1824_v35 }
 0x7c8   :  { %v1884_v39 = vpop.permute.xlu0 %1883 }
 0x7c9   :  { %v1893_v37 = vand.u32 %v1884_v39, %v5758_v24 }
 0x7cb   :  { %v1792_v46 = vpop.xlane.xlu2 %1791  ;;  %1901 = vmatpush.bf16.msrb.mxu3 %v1893_v37 }
 0x7cc   :  { %4677 = vrcp.f32 %v1792_v46 }
 0x7d2   :  { %v4678_v43 = vpop.eup %4677 }
 0x7d3   :  { %v1795_v55 = vpop.xlane.xlu2 %1794  ;;  %v1808_v47 = vmul.f32 %v4678_v43, %v4666_v52 }
 0x7d4   :  { %4679 = vrcp.f32 %v1795_v55 }
 0x7d5   :  { %v1814_v36 = vpack.c.bf16 %v1808_v47, %v1808_v47 }
 0x7d7   :  { %v1868_v7 = vunpack.c.l.b16 %v1814_v36 }
 0x7da   :  { %v4680_v48 = vpop.eup %4679 }
 0x7db   :  { %v1809_v15 = vmul.f32 %v4680_v48, %v4668_v17  ;;  %v1882_v42 = vpop.permute.xlu2 %1881 }
 0x7dc   :  { %1902 = vmatpush.bf16.msrb.mxu3 %v1882_v42 }
 0x7dd   :  { %v1815_v30 = vpack.c.bf16 %v1809_v15, %v1809_v15 }
 0x7df   :  { %v1869_v19 = vunpack.c.l.b16 %v1815_v30 }
 0x7e1   :  { %v1871_v23 = vpack.c.b16 %v1869_v19, %v1868_v7 }
 0x7e2   :  { %v1798_v41 = vpop.xlane.xlu1 %1797 }
 0x7e3   :  { %4506 = vmatmul.msk.bf16.vlgmr.msrb.gmra.mxu3 %vm1196_vm5, %v1871_v23  ;;  %4681 = vrcp.f32 %v1798_v41 }
 0x7e9   :  { %v4682_v20 = vpop.eup %4681 }
 0x7ea   :  { %v1810_v54 = vmul.f32 %v4682_v20, %v4670_v14 }
 0x7ec   :  { %v1816_v50 = vpack.c.bf16 %v1810_v54, %v1810_v54 }
 0x7ee   :  { %v1870_v49 = vunpack.c.l.b16 %v1816_v50 }
 0x7f0   :  { %v1872_v26 = vpack.c.b16 %v1870_v49, %v1870_v49 }
 0x7f3   :  { %4507 = vmatmul.msk.bf16.gmra.mxu3 %vm1196_vm5, %v1872_v26 }
 0x838   :  { %v1856_v52 = vpop.f32.mrf.mxu0 }
 0x839   :  { %v1919_v53 = vrot.slane %v1856_v52, 1  ;;  %v1920_v17 = vrot.slane %v1856_v52, 2  ;;  %v1921_v35 = vrot.slane %v1856_v52, 3  ;;  %1947 = vst [vmem:[#allocation1] ss:$9 sm:$0xff] %v1856_v52  ;;  %v1922_v46 = vrot.slane %v1856_v52, 4 }
 0x83a   :  { %v1923_v39 = vrot.slane %v1856_v52, 5  ;;  %v1924_v37 = vrot.slane %v1856_v52, 6  ;;  %v1925_v55 = vrot.slane %v1856_v52, 7 }
 0x83b   :  { %1949 = vst [vmem:[#allocation1 + $0x1] ss:$9 sm:$0xff] %v1919_v53 }
 0x83c   :  { %1951 = vst [vmem:[#allocation1 + $0x2] ss:$9 sm:$0xff] %v1920_v17 }
 0x83d   :  { %1953 = vst [vmem:[#allocation1 + $0x3] ss:$9 sm:$0xff] %v1921_v35 }
 0x83e   :  { %1955 = vst [vmem:[#allocation1 + $0x4] ss:$9 sm:$0xff] %v1922_v46 }
 0x83f   :  { %1957 = vst [vmem:[#allocation1 + $0x5] ss:$9 sm:$0xff] %v1923_v39 }
 0x840   :  { %1959 = vst [vmem:[#allocation1 + $0x6] ss:$9 sm:$0xff] %v1924_v37  ;;  %v1858_v43 = vpop.f32.mrf.mxu0 }
 0x841   :  { %1961 = vst [vmem:[#allocation1 + $0x7] ss:$9 sm:$0xff] %v1925_v55  ;;  %v1926_v47 = vrot.slane %v1858_v43, 1  ;;  %v1927_v48 = vrot.slane %v1858_v43, 2  ;;  %v1928_v15 = vrot.slane %v1858_v43, 3  ;;  %v1929_v42 = vrot.slane %v1858_v43, 4 }
 0x842   :  { %v1930_v30 = vrot.slane %v1858_v43, 5  ;;  %v1931_v19 = vrot.slane %v1858_v43, 6  ;;  %v1932_v23 = vrot.slane %v1858_v43, 7 }
 0x848   :  { %v1861_v14 = vpop.f32.mrf.mxu3  ;;  %v5951_v36 = vld [vmem:[#allocation1] sm:$0xff] }
 0x849   :  { %7366 = vst [vmem:[#allocation72_spill] sm:$0xff] %v5951_v36 }
 0x84a   :  { %1963 = vst [vmem:[#allocation1] ss:$9 sm:$0xff] %v1858_v43 }
 0x84b   :  { %1964 = vst [vmem:[#allocation1 + $0x1] ss:$9 sm:$0xff] %v1926_v47 }
 0x84c   :  { %1965 = vst [vmem:[#allocation1 + $0x2] ss:$9 sm:$0xff] %v1927_v48 }
 0x84d   :  { %1966 = vst [vmem:[#allocation1 + $0x3] ss:$9 sm:$0xff] %v1928_v15 }
 0x84e   :  { %1967 = vst [vmem:[#allocation1 + $0x4] ss:$9 sm:$0xff] %v1929_v42 }
 0x84f   :  { %1968 = vst [vmem:[#allocation1 + $0x5] ss:$9 sm:$0xff] %v1930_v30 }
 0x850   :  { %v1863_v7 = vpop.f32.mrf.mxu3  ;;  %1969 = vst [vmem:[#allocation1 + $0x6] ss:$9 sm:$0xff] %v1931_v19 }
 0x851   :  { %1970 = vst [vmem:[#allocation1 + $0x7] ss:$9 sm:$0xff] %v1932_v23  ;;  %v7371_v23 = vld [vmem:[#allocation42_spill] sm:$0xff] }
 0x858   :  { %v5953_v41 = vld [vmem:[#allocation1] sm:$0xff] }
 0x859   :  { %7367 = vst [vmem:[#allocation73_spill] sm:$0xff] %v5953_v41  ;;  %v7390_v41 = vld [vmem:[#allocation62_spill] sm:$0xff] }
 0x85a   :  { %1972 = vst [vmem:[#allocation1] ss:$9 sm:$0xff] %v1861_v14 }
 0x866   :  { %v1904_v20 = vpop.f32.mrf.mxu3 }
 0x867   :  { %v1933_v54 = vrot.slane %v1904_v20, 1  ;;  %v1934_v50 = vrot.slane %v1904_v20, 2  ;;  %v1935_v49 = vrot.slane %v1904_v20, 3  ;;  %1973 = vst [vmem:[#allocation1 + $0x1] ss:$9 sm:$0xff] %v1904_v20  ;;  %v1936_v26 = vrot.slane %v1904_v20, 4 }
 0x868   :  { %v1937_v52 = vrot.slane %v1904_v20, 5  ;;  %v1938_v53 = vrot.slane %v1904_v20, 6  ;;  %v1939_v35 = vrot.slane %v1904_v20, 7  ;;  %v7372_v20 = vld [vmem:[#allocation43_spill] sm:$0xff] }
 0x869   :  { %1974 = vst [vmem:[#allocation1 + $0x2] ss:$9 sm:$0xff] %v1933_v54  ;;  %v7373_v54 = vld [vmem:[#allocation44_spill] sm:$0xff] }
 0x86a   :  { %1975 = vst [vmem:[#allocation1 + $0x3] ss:$9 sm:$0xff] %v1934_v50 }
 0x86b   :  { %1976 = vst [vmem:[#allocation1 + $0x4] ss:$9 sm:$0xff] %v1935_v49  ;;  %v7374_v49 = vld [vmem:[#allocation45_spill] sm:$0xff] }
 0x86c   :  { %1977 = vst [vmem:[#allocation1 + $0x5] ss:$9 sm:$0xff] %v1936_v26 }
 0x86d   :  { %1978 = vst [vmem:[#allocation1 + $0x6] ss:$9 sm:$0xff] %v1937_v52  ;;  %v7375_v52 = vld [vmem:[#allocation46_spill] sm:$0xff] }
 0x86e   :  { %1979 = vst [vmem:[#allocation1 + $0x7] ss:$9 sm:$0xff] %v1938_v53  ;;  %v1906_v17 = vpop.f32.mrf.mxu3  ;;  %v7376_v53 = vld [vmem:[#allocation47_spill] sm:$0xff] }
 0x86f   :  { %v1940_v46 = vrot.slane %v1906_v17, 1  ;;  %v1941_v37 = vrot.slane %v1906_v17, 2  ;;  %v1942_v55 = vrot.slane %v1906_v17, 3  ;;  %v1943_v14 = vrot.slane %v1906_v17, 4 }
 0x870   :  { %v1944_v43 = vrot.slane %v1906_v17, 5  ;;  %v1945_v47 = vrot.slane %v1906_v17, 6  ;;  %v1946_v15 = vrot.slane %v1906_v17, 7 }
 0x875   :  { %v5955_v39 = vld [vmem:[#allocation1] sm:$0xff] }
 0x876   :  { %7368 = vst [vmem:[#allocation74_spill] sm:$0xff] %v5955_v39  ;;  %v1909_v48 = vpop.f32.mrf.mxu3  ;;  %v7389_v39 = vld [vmem:[#allocation61_spill] sm:$0xff] }
 0x877   :  { %1981 = vst [vmem:[#allocation1] ss:$9 sm:$0xff] %v1939_v35  ;;  %v7378_v35 = vld [vmem:[#allocation49_spill] sm:$0xff] }
 0x878   :  { %1982 = vst [vmem:[#allocation1 + $0x1] ss:$9 sm:$0xff] %v1906_v17  ;;  %v7377_v17 = vld [vmem:[#allocation48_spill] sm:$0xff] }
 0x879   :  { %1983 = vst [vmem:[#allocation1 + $0x2] ss:$9 sm:$0xff] %v1940_v46  ;;  %v7379_v46 = vld [vmem:[#allocation50_spill] sm:$0xff] }
 0x87a   :  { %1984 = vst [vmem:[#allocation1 + $0x3] ss:$9 sm:$0xff] %v1941_v37  ;;  %v7380_v37 = vld [vmem:[#allocation51_spill] sm:$0xff] }
 0x87b   :  { %1985 = vst [vmem:[#allocation1 + $0x4] ss:$9 sm:$0xff] %v1942_v55  ;;  %v7381_v55 = vld [vmem:[#allocation52_spill] sm:$0xff] }
 0x87c   :  { %1986 = vst [vmem:[#allocation1 + $0x5] ss:$9 sm:$0xff] %v1943_v14  ;;  %v7382_v14 = vld [vmem:[#allocation53_spill] sm:$0xff] }
 0x87d   :  { %1987 = vst [vmem:[#allocation1 + $0x6] ss:$9 sm:$0xff] %v1944_v43 }
 0x87e   :  { %1988 = vst [vmem:[#allocation1 + $0x7] ss:$9 sm:$0xff] %v1945_v47  ;;  %v1911_v30 = vpop.f32.mrf.mxu3  ;;  %v7383_v47 = vld [vmem:[#allocation54_spill] sm:$0xff] }
 0x87f   :  { %v7386_v30 = vld [vmem:[#allocation57_spill] sm:$0xff] }
 0x885   :  { %v5957_v42 = vld [vmem:[#allocation1] sm:$0xff] }
 0x886   :  { %7369 = vst [vmem:[#allocation75_spill] sm:$0xff] %v5957_v42  ;;  %v7387_v42 = vld [vmem:[#allocation59_spill] sm:$0xff] }
 0x887   :  { %1990 = vst [vmem:[#allocation1] ss:$9 sm:$0xff] %v1946_v15  ;;  %v7385_v15 = vld [vmem:[#allocation56_spill] sm:$0xff] }
 0x888   :  { %1991 = vst [vmem:[#allocation1 + $0x1] ss:$9 sm:$0xff] %v1909_v48  ;;  %v7384_v48 = vld [vmem:[#allocation55_spill] sm:$0xff] }
 0x88f   :  { %v5959_v7 = vld [vmem:[#allocation1] sm:$0xff] }
 0x890   :  { %7370 = vst [vmem:[#allocation76_spill] sm:$0xff] %v5959_v7  ;;  %v7388_v7 = vld [vmem:[#allocation60_spill] sm:$0xff] }
 0x891   :  { %2015 = vst [vmem:[#allocation1] ss:$9 sm:$0xff] %v5382_v63 }
 0x892   :  { %2017 = vst [vmem:[#allocation1 + $0x1] ss:$9 sm:$0xff] %v5385_v29 }
 0x893   :  { %2019 = vst [vmem:[#allocation1 + $0x2] ss:$9 sm:$0xff] %v5388_v61 }
 0x894   :  { %2021 = vst [vmem:[#allocation1 + $0x3] ss:$9 sm:$0xff] %v5391_v62 }
 0x895   :  { %2023 = vst [vmem:[#allocation1 + $0x4] ss:$9 sm:$0xff] %v5395_v11 }
 0x896   :  { %2025 = vst [vmem:[#allocation1 + $0x5] ss:$9 sm:$0xff] %v5398_v13 }
 0x897   :  { %2027 = vst [vmem:[#allocation1 + $0x6] ss:$9 sm:$0xff] %v5402_v21 }
 0x898   :  { %2029 = vst [vmem:[#allocation1 + $0x7] ss:$9 sm:$0xff] %v5406_v59 }
 0x89f   :  { %v5969_v19 = vld [vmem:[#allocation1] sm:$0xff] }
 0x8a0   :  { %2031 = vst [vmem:[#allocation1] ss:$9 sm:$0xff] %v5417_v31 }
 0x8a1   :  { %2032 = vst [vmem:[#allocation1 + $0x1] ss:$9 sm:$0xff] %v5420_v33 }
 0x8a2   :  { %2033 = vst [vmem:[#allocation1 + $0x2] ss:$9 sm:$0xff] %v5423_v57 }
 0x8a3   :  { %2034 = vst [vmem:[#allocation1 + $0x3] ss:$9 sm:$0xff] %v5428_v40 }
 0x8a4   :  { %2035 = vst [vmem:[#allocation1 + $0x4] ss:$9 sm:$0xff] %v5431_v3 }
 0x8a5   :  { %2036 = vst [vmem:[#allocation1 + $0x5] ss:$9 sm:$0xff] %v7371_v23 }
 0x8a6   :  { %2037 = vst [vmem:[#allocation1 + $0x6] ss:$9 sm:$0xff] %v7372_v20 }
 0x8a7   :  { %2038 = vst [vmem:[#allocation1 + $0x7] ss:$9 sm:$0xff] %v7373_v54 }
 0x8ae   :  { %v5979_v50 = vld [vmem:[#allocation1] sm:$0xff] }
 0x8af   :  { %2040 = vst [vmem:[#allocation1] ss:$9 sm:$0xff] %v7374_v49 }
 0x8b6   :  { %v5982_v26 = vld [vmem:[#allocation1] sm:$0xff] }
 0x8b7   :  { %2042 = vst [vmem:[#allocation1] ss:$9 sm:$0xff] %v7375_v52  ;;  %v7400_v52 = vld [vmem:[#allocation71_spill] sm:$0xff] }
 0x8b8   :  { %2043 = vst [vmem:[#allocation1 + $0x1] ss:$9 sm:$0xff] %v7376_v53  ;;  %v7398_v53 = vld [vmem:[#allocation70_spill] sm:$0xff] }
 0x8b9   :  { %2044 = vst [vmem:[#allocation1 + $0x2] ss:$9 sm:$0xff] %v7377_v17  ;;  %v7397_v17 = vld [vmem:[#allocation69_spill] sm:$0xff] }
 0x8ba   :  { %2045 = vst [vmem:[#allocation1 + $0x3] ss:$9 sm:$0xff] %v7378_v35  ;;  %v7396_v35 = vld [vmem:[#allocation68_spill] sm:$0xff] }
 0x8bb   :  { %2046 = vst [vmem:[#allocation1 + $0x4] ss:$9 sm:$0xff] %v7379_v46  ;;  %v7395_v46 = vld [vmem:[#allocation67_spill] sm:$0xff] }
 0x8bc   :  { %2047 = vst [vmem:[#allocation1 + $0x5] ss:$9 sm:$0xff] %v7380_v37  ;;  %v7394_v37 = vld [vmem:[#allocation66_spill] sm:$0xff] }
 0x8bd   :  { %2048 = vst [vmem:[#allocation1 + $0x6] ss:$9 sm:$0xff] %v7381_v55 }
 0x8be   :  { %2049 = vst [vmem:[#allocation1 + $0x7] ss:$9 sm:$0xff] %v7382_v14  ;;  %v7391_v14 = vld [vmem:[#allocation63_spill] sm:$0xff] }
 0x8c5   :  { %v5992_v43 = vld [vmem:[#allocation1] sm:$0xff] }
 0x8c6   :  { %2051 = vst [vmem:[#allocation1] ss:$9 sm:$0xff] %v7383_v47  ;;  %v7393_v47 = vld [vmem:[#allocation65_spill] sm:$0xff]  ;;  %v2071_v3 = vpack.c.bf16 %v5992_v43, %v5992_v43 }
 0x8c7   :  { %2052 = vst [vmem:[#allocation1 + $0x1] ss:$9 sm:$0xff] %v7384_v48  ;;  %v7392_v48 = vld [vmem:[#allocation64_spill] sm:$0xff] }
 0x8c8   :  { %2053 = vst [vmem:[#allocation1 + $0x2] ss:$9 sm:$0xff] %v7385_v15 }
 0x8c9   :  { %2054 = vst [vmem:[#allocation1 + $0x3] ss:$9 sm:$0xff] %v7386_v30 }
 0x8ca   :  { %2055 = vst [vmem:[#allocation1 + $0x4] ss:$9 sm:$0xff] %v7387_v42 }
 0x8cb   :  { %2056 = vst [vmem:[#allocation1 + $0x5] ss:$9 sm:$0xff] %v7388_v7 }
 0x8cc   :  { %2057 = vst [vmem:[#allocation1 + $0x6] ss:$9 sm:$0xff] %v7389_v39 }
 0x8cd   :  { %2058 = vst [vmem:[#allocation1 + $0x7] ss:$9 sm:$0xff] %v7390_v41 }
 0x8d4   :  { %v2059_v36 = vld [vmem:[#allocation1] sm:$0xff] }
 0x8d5   :  { %2060 = vst [vmem:[#allocation1] ss:$9 sm:$0xff] %v7391_v14  ;;  %v2072_v23 = vpack.c.bf16 %v2059_v36, %v2059_v36 }
 0x8d7   :  { %v2250_v57 = vunpack.c.l.b16 %v2072_v23 }
 0x8dc   :  { %v6003_v55 = vld [vmem:[#allocation1] sm:$0xff] }
 0x8dd   :  { %2074 = vst [vmem:[#allocation1] ss:$9 sm:$0xff] %v5379_v34 }
 0x8de   :  { %2076 = vst [vmem:[#allocation1 + $0x1] ss:$9 sm:$0xff] %v5540_v8 }
 0x8df   :  { %2078 = vst [vmem:[#allocation1 + $0x2] ss:$9 sm:$0xff] %v5545_v12 }
 0x8e0   :  { %2080 = vst [vmem:[#allocation1 + $0x3] ss:$9 sm:$0xff] %v5549_v6 }
 0x8e1   :  { %2082 = vst [vmem:[#allocation1 + $0x4] ss:$9 sm:$0xff] %v5553_v18 }
 0x8e2   :  { %2084 = vst [vmem:[#allocation1 + $0x5] ss:$9 sm:$0xff] %v5557_v5 }
 0x8e3   :  { %2086 = vst [vmem:[#allocation1 + $0x6] ss:$9 sm:$0xff] %v5561_v9 }
 0x8e4   :  { %2088 = vst [vmem:[#allocation1 + $0x7] ss:$9 sm:$0xff] %v5565_v4 }
 0x8eb   :  { %v6013_v41 = vld [vmem:[#allocation1] sm:$0xff] }
 0x8ec   :  { %2090 = vst [vmem:[#allocation1] ss:$9 sm:$0xff] %v5411_v60 }
 0x8ed   :  { %2091 = vst [vmem:[#allocation1 + $0x1] ss:$9 sm:$0xff] %v5571_v2 }
 0x8ee   :  { %2092 = vst [vmem:[#allocation1 + $0x2] ss:$9 sm:$0xff] %v5574_v1 }
 0x8ef   :  { %2093 = vst [vmem:[#allocation1 + $0x3] ss:$9 sm:$0xff] %v5578_v27 }
 0x8f0   :  { %2094 = vst [vmem:[#allocation1 + $0x4] ss:$9 sm:$0xff] %v5582_v38 }
 0x8f1   :  { %2095 = vst [vmem:[#allocation1 + $0x5] ss:$9 sm:$0xff] %v5586_v10 }
 0x8f2   :  { %2096 = vst [vmem:[#allocation1 + $0x6] ss:$9 sm:$0xff] %v5590_v58 }
 0x8f3   :  { %2097 = vst [vmem:[#allocation1 + $0x7] ss:$9 sm:$0xff] %v5594_v16 }
 0x8fa   :  { %v2098_v14 = vld [vmem:[#allocation1] sm:$0xff] }
 0x8fb   :  { %2099 = vst [vmem:[#allocation1] ss:$9 sm:$0xff] %v5451_v45 }
 0x902   :  { %v2100_v39 = vld [vmem:[#allocation1] sm:$0xff] }
 0x903   :  { %2101 = vst [vmem:[#allocation1] ss:$9 sm:$0xff] %v5601_v44  ;;  %v2129_v7 = vpack.c.bf16 %v2100_v39, %v2100_v39  ;;  %v7399_v39 = vld [vmem:[#allocation58_spill] sm:$0xff] }
 0x904   :  { %2102 = vst [vmem:[#allocation1 + $0x1] ss:$9 sm:$0xff] %v5604_v0 }
 0x905   :  { %2103 = vst [vmem:[#allocation1 + $0x2] ss:$9 sm:$0xff] %v5607_v22  ;;  %v2209_v42 = vunpack.c.l.b16 %v2129_v7 }
 0x906   :  { %2104 = vst [vmem:[#allocation1 + $0x3] ss:$9 sm:$0xff] %v5611_v28 }
 0x907   :  { %2105 = vst [vmem:[#allocation1 + $0x4] ss:$9 sm:$0xff] %v5615_v51  ;;  %v2211_v15 = vpack.c.b16 %v2209_v42, %v2209_v42 }
 0x908   :  { %2106 = vst [vmem:[#allocation1 + $0x5] ss:$9 sm:$0xff] %v5619_v56 }
 0x909   :  { %2107 = vst [vmem:[#allocation1 + $0x6] ss:$9 sm:$0xff] %v5623_v32  ;;  %2214 = vrot.lane.b32.xlu0 %v2211_v15, %s4768_s30 }
 0x90a   :  { %2108 = vst [vmem:[#allocation1 + $0x7] ss:$9 sm:$0xff] %v5476_v25 }
 0x911   :  { %v2109_v30 = vld [vmem:[#allocation1] sm:$0xff] }
 0x912   :  { %2110 = vst [vmem:[#allocation1] ss:$9 sm:$0xff] %v7392_v48  ;;  %v2130_v42 = vpack.c.bf16 %v2109_v30, %v2109_v30  ;;  %v2249_v30 = vunpack.c.l.b16 %v2071_v3 }
 0x913   :  { %2111 = vst [vmem:[#allocation1 + $0x1] ss:$9 sm:$0xff] %v7393_v47 }
 0x914   :  { %2112 = vst [vmem:[#allocation1 + $0x2] ss:$9 sm:$0xff] %v7394_v37  ;;  %v2261_v54 = vunpack.c.l.b16 %v2130_v42  ;;  %v2252_v36 = vpack.c.b16 %v2250_v57, %v2249_v30  ;;  %v2068_v42 = vpack.c.bf16 %v5969_v19, %v5969_v19  ;;  %v2070_v30 = vpack.c.bf16 %v5982_v26, %v5982_v26 }
 0x915   :  { %2113 = vst [vmem:[#allocation1 + $0x3] ss:$9 sm:$0xff] %v7395_v46 }
 0x916   :  { %2114 = vst [vmem:[#allocation1 + $0x4] ss:$9 sm:$0xff] %v7396_v35  ;;  %v2197_v19 = vunpack.c.l.b16 %v2070_v30 }
 0x917   :  { %2115 = vst [vmem:[#allocation1 + $0x5] ss:$9 sm:$0xff] %v7397_v17 }
 0x918   :  { %2116 = vst [vmem:[#allocation1 + $0x6] ss:$9 sm:$0xff] %v7398_v53 }
 0x919   :  { %2117 = vst [vmem:[#allocation1 + $0x7] ss:$9 sm:$0xff] %v7399_v39 }
 0x920   :  { %v2118_v7 = vld [vmem:[#allocation1] sm:$0xff] }
 0x921   :  { %2119 = vst [vmem:[#allocation1] ss:$9 sm:$0xff] %v7400_v52  ;;  %v2131_v49 = vpack.c.bf16 %v2118_v7, %v2118_v7 }
 0x923   :  { %v2262_v20 = vunpack.c.l.b16 %v2131_v49  ;;  %v2073_v49 = vpack.c.bf16 %v6003_v55, %v6003_v55  ;;  %v2069_v55 = vpack.c.bf16 %v5979_v50, %v5979_v50 }
 0x925   :  { %v2264_v15 = vpack.c.b16 %v2262_v20, %v2261_v54  ;;  %v2128_v54 = vpack.c.bf16 %v2098_v14, %v2098_v14 }
 0x927   :  { %2266 = vrot.lane.b32.xlu2 %v2264_v15, %s4768_s30  ;;  %v2208_v57 = vunpack.c.l.b16 %v2128_v54  ;;  %v2195_v15 = vunpack.c.l.b16 %v2068_v42 }
 0x928   :  { %v2120_v40 = vld [vmem:[#allocation1] sm:$0xff] }
 0x929   :  { %2133 = vst [vmem:[#allocation1] ss:$9 sm:$0xff] %v5379_v34  ;;  %v2132_v33 = vpack.c.bf16 %v2120_v40, %v2120_v40  ;;  %v2251_v40 = vunpack.c.l.b16 %v2073_v49 }
 0x92a   :  { %2135 = vst [vmem:[#allocation1 + $0x1] ss:$9 sm:$0xff] %v5540_v8 }
 0x92b   :  { %2137 = vst [vmem:[#allocation1 + $0x2] ss:$9 sm:$0xff] %v5545_v12  ;;  %v2263_v7 = vunpack.c.l.b16 %v2132_v33  ;;  %v2127_v33 = vpack.c.bf16 %v6013_v41, %v6013_v41  ;;  %v2253_v14 = vpack.c.b16 %v2251_v40, %v2251_v40  ;;  %v2196_v41 = vunpack.c.l.b16 %v2069_v55 }
 0x92c   :  { %2139 = vst [vmem:[#allocation1 + $0x3] ss:$9 sm:$0xff] %v5549_v6 }
 0x92d   :  { %2141 = vst [vmem:[#allocation1 + $0x4] ss:$9 sm:$0xff] %v5553_v18  ;;  %v2265_v20 = vpack.c.b16 %v2263_v7, %v2263_v7  ;;  %v2207_v3 = vunpack.c.l.b16 %v2127_v33  ;;  %v2198_v50 = vpack.c.b16 %v2196_v41, %v2195_v15  ;;  %v2199_v7 = vpack.c.b16 %v2197_v19, %v2197_v19 }
 0x92e   :  { %2143 = vst [vmem:[#allocation1 + $0x5] ss:$9 sm:$0xff] %v5557_v5 }
 0x92f   :  { %2145 = vst [vmem:[#allocation1 + $0x6] ss:$9 sm:$0xff] %v5561_v9  ;;  %2254 = vrot.lane.b32.xlu2 %v2252_v36, %s4769_s14  ;;  %2268 = vrot.lane.b32.xlu0 %v2265_v20, %s4768_s30  ;;  %v2210_v23 = vpack.c.b16 %v2208_v57, %v2207_v3 }
 0x930   :  { %2147 = vst [vmem:[#allocation1 + $0x7] ss:$9 sm:$0xff] %v5565_v4 }
 0x937   :  { %v6061_v43 = vld [vmem:[#allocation1] sm:$0xff]  ;;  %2212 = vrot.lane.b32.xlu0 %v2210_v23, %s4768_s30  ;;  %2256 = vrot.lane.b32.xlu2 %v2253_v14, %s4769_s14 }
 0x938   :  { %2149 = vst [vmem:[#allocation1] ss:$9 sm:$0xff] %v5411_v60 }
 0x939   :  { %2150 = vst [vmem:[#allocation1 + $0x1] ss:$9 sm:$0xff] %v5571_v2 }
 0x93a   :  { %2151 = vst [vmem:[#allocation1 + $0x2] ss:$9 sm:$0xff] %v5574_v1 }
 0x93b   :  { %2152 = vst [vmem:[#allocation1 + $0x3] ss:$9 sm:$0xff] %v5578_v27 }
 0x93c   :  { %2153 = vst [vmem:[#allocation1 + $0x4] ss:$9 sm:$0xff] %v5582_v38 }
 0x93d   :  { %2154 = vst [vmem:[#allocation1 + $0x5] ss:$9 sm:$0xff] %v5586_v10 }
 0x93e   :  { %2155 = vst [vmem:[#allocation1 + $0x6] ss:$9 sm:$0xff] %v5590_v58 }
 0x93f   :  { %2156 = vst [vmem:[#allocation1 + $0x7] ss:$9 sm:$0xff] %v5594_v16  ;;  %2200 = vrot.lane.b32.xlu0 %v2198_v50, %s4769_s14 }
 0x946   :  { %v6078_v36 = vld [vmem:[#allocation1] sm:$0xff] }
 0x947   :  { %2158 = vst [vmem:[#allocation1] ss:$9 sm:$0xff] %v5451_v45  ;;  %2202 = vrot.lane.b32.xlu0 %v2199_v7, %s4769_s14 }
 0x94e   :  { %v2159_v20 = vld [vmem:[#allocation1] sm:$0xff] }
 0x94f   :  { %2160 = vst [vmem:[#allocation1] ss:$9 sm:$0xff] %v5601_v44 }
 0x950   :  { %2161 = vst [vmem:[#allocation1 + $0x1] ss:$9 sm:$0xff] %v5604_v0 }
 0x951   :  { %2162 = vst [vmem:[#allocation1 + $0x2] ss:$9 sm:$0xff] %v5607_v22 }
 0x952   :  { %2163 = vst [vmem:[#allocation1 + $0x3] ss:$9 sm:$0xff] %v5611_v28 }
 0x953   :  { %2164 = vst [vmem:[#allocation1 + $0x4] ss:$9 sm:$0xff] %v5615_v51 }
 0x954   :  { %2165 = vst [vmem:[#allocation1 + $0x5] ss:$9 sm:$0xff] %v5619_v56 }
 0x955   :  { %2166 = vst [vmem:[#allocation1 + $0x6] ss:$9 sm:$0xff] %v5623_v32 }
 0x956   :  { %2167 = vst [vmem:[#allocation1 + $0x7] ss:$9 sm:$0xff] %v5476_v25 }
 0x95d   :  { %v6090_v26 = vld [vmem:[#allocation1] sm:$0xff] }
 0x95e   :  { %2169 = vst [vmem:[#allocation1] ss:$9 sm:$0xff] %v7392_v48 }
 0x95f   :  { %2170 = vst [vmem:[#allocation1 + $0x1] ss:$9 sm:$0xff] %v7393_v47 }
 0x960   :  { %2171 = vst [vmem:[#allocation1 + $0x2] ss:$9 sm:$0xff] %v7394_v37 }
 0x961   :  { %2172 = vst [vmem:[#allocation1 + $0x3] ss:$9 sm:$0xff] %v7395_v46 }
 0x962   :  { %2173 = vst [vmem:[#allocation1 + $0x4] ss:$9 sm:$0xff] %v7396_v35 }
 0x963   :  { %2174 = vst [vmem:[#allocation1 + $0x5] ss:$9 sm:$0xff] %v7397_v17 }
 0x964   :  { %2175 = vst [vmem:[#allocation1 + $0x6] ss:$9 sm:$0xff] %v7398_v53 }
 0x965   :  { %2176 = vst [vmem:[#allocation1 + $0x7] ss:$9 sm:$0xff] %v7399_v39 }
 0x96c   :  { %v6100_v54 = vld [vmem:[#allocation1] sm:$0xff] }
 0x96d   :  { %2178 = vst [vmem:[#allocation1] ss:$9 sm:$0xff] %v7400_v52 }
 0x97b   :  { %v2215_v49 = vpop.permute.xlu0 %2214 }
 0x97c   :  { %v2226_v33 = vsel %vm1115_vm4, %v2215_v49, 0 }
 0x97d   :  { %2234 = vmatpush.bf16.xpose.msra.mxu1 %v2226_v33 }
 0x981   :  { %v2267_v3 = vpop.permute.xlu2 %2266 }
 0x982   :  { %v2277_v14 = vsel %vm1115_vm4, %v2267_v3, 0 }
 0x989   :  { %v2255_v42 = vpop.permute.xlu2 %2254 }
 0x991   :  { %v2257_v15 = vpop.permute.xlu2 %2256 }
 0x9a1   :  { %v2269_v57 = vpop.permute.xlu0 %2268 }
 0x9a2   :  { %v2280_v40 = vsel %vm1115_vm4, %v2269_v57, 0 }
 0x9a3   :  { %2288 = vmatpush.bf16.xpose.msra.mxu2 %v2280_v40  ;;  %v2188_v40 = vpack.c.bf16 %v2159_v20, %v2159_v20 }
 0x9a9   :  { %v2213_v23 = vpop.permute.xlu0 %2212 }
 0x9aa   :  { %v2223_v55 = vsel %vm1115_vm4, %v2213_v23, 0 }
 0x9ab   :  { %2235 = vmatpush.bf16.xpose.msra.mxu1 %v2223_v55  ;;  %2289 = vmatpush.bf16.xpose.msra.mxu2 %v2277_v14  ;;  %v2385_v14 = vunpack.c.l.b16 %v2188_v40 }
 0x9b1   :  { %v2201_v41 = vpop.permute.xlu0 %2200 }
 0x9b2   :  { %4508 = vmatmul.msk.bf16.vlgmr.msra.gmra.mxu1 %vm1115_vm4, %v2201_v41  ;;  %4510 = vmatmul.msk.bf16.vlgmr.msra.gmra.mxu2 %vm1115_vm4, %v2255_v42  ;;  %v2387_v42 = vpack.c.b16 %v2385_v14, %v2385_v14 }
 0x9b9   :  { %v2203_v50 = vpop.permute.xlu0 %2202 }
 0x9c2   :  { %4509 = vmatmul.msk.bf16.gmra.mxu1 %vm1115_vm4, %v2203_v50  ;;  %4511 = vmatmul.msk.bf16.gmra.mxu2 %vm1115_vm4, %v2257_v15  ;;  %v2187_v15 = vpack.c.bf16 %v6078_v36, %v6078_v36 }
 0xa2f   :  { %v2237_v30 = vpop.f32.mrf.mxu1 }
 0xa30   :  { %v2300_v19 = vsel %vm1196_vm5, %v2237_v30, -inf }
 0xa31   :  { %2301 = vmax.xlane.f32.xlu0 %v2300_v19  ;;  %v2186_v19 = vpack.c.bf16 %v6061_v43, %v6061_v43 }
 0xa35   :  { %v2291_v7 = vpop.f32.mrf.mxu2 }
 0xa36   :  { %v2309_v49 = vsel %vm1196_vm5, %v2291_v7, -inf }
 0xa37   :  { %v2239_v33 = vpop.f32.mrf.mxu1  ;;  %2310 = vmax.xlane.f32.xlu2 %v2309_v49  ;;  %v2384_v49 = vunpack.c.l.b16 %v2187_v15 }
 0xa38   :  { %v2303_v57 = vsel %vm1196_vm5, %v2239_v33, -inf }
 0xa39   :  { %2304 = vmax.xlane.f32.xlu1 %v2303_v57  ;;  %v2383_v57 = vunpack.c.l.b16 %v2186_v19 }
 0xa3d   :  { %v2293_v3 = vpop.f32.mrf.mxu2 }
 0xa3e   :  { %v2312_v20 = vsel %vm1196_vm5, %v2293_v3, -inf }
 0xa3f   :  { %v2242_v23 = vpop.f32.mrf.mxu1 }
 0xa40   :  { %v2306_v55 = vsel %vm1203_vm6, %v2242_v23, -inf }
 0xa41   :  { %2307 = vmax.xlane.f32.xlu1 %v2306_v55  ;;  %v2386_v55 = vpack.c.b16 %v2384_v49, %v2383_v57 }
 0xa45   :  { %2390 = vrot.lane.b32.xlu0 %v2387_v42, %s4770_s15  ;;  %v6116_v41 = vpop.f32.mrf.mxu2 }
 0xa46   :  { %v2315_v14 = vsel %vm1203_vm6, %v6116_v41, -inf }
 0xa47   :  { %v2244_v50 = vpop.f32.mrf.mxu1 }
 0xa49   :  { %2313 = vmax.xlane.f32.xlu1 %v2312_v20 }
 0xa4d   :  { %v2298_v40 = vpop.f32.mrf.mxu2 }
 0xa4f   :  { %2388 = vrot.lane.b32.xlu2 %v2386_v55, %s4770_s15 }
 0xa51   :  { %2316 = vmax.xlane.f32.xlu1 %v2315_v14 }
 0xaa4   :  { %v2302_v42 = vpop.xlane.xlu0 %2301 }
 0xaa5   :  { %v2318_v52 = vsub.f32 %v2237_v30, %v2302_v42 }
 0xaa7   :  { %v2324_v36 = vmul.f32 1.442695, %v2318_v52 }
 0xaa9   :  { %4683 = vpow2.f32 %v2324_v36 }
 0xaaa   :  { %v2311_v50 = vpop.xlane.xlu2 %2310 }
 0xaab   :  { %v2321_v39 = vsub.f32 %v2291_v7, %v2311_v50  ;;  %v2190_v50 = vpack.c.bf16 %v6100_v54, %v6100_v54 }
 0xaac   :  { %v2305_v43 = vpop.xlane.xlu1 %2304 }
 0xaad   :  { %v2330_v53 = vmul.f32 1.442695, %v2321_v39  ;;  %v2319_v17 = vsub.f32 %v2239_v33, %v2305_v43 }
 0xaaf   :  { %v4684_v20 = vpop.eup %4683  ;;  %4685 = vpow2.f32 %v2330_v53  ;;  %v2326_v15 = vmul.f32 1.442695, %v2319_v17 }
 0xab0   :  { %v2336_v19 = vsel %vm1196_vm5, %v4684_v20, 0.0 }
 0xab1   :  { %4687 = vpow2.f32 %v2326_v15  ;;  %2337 = vadd.xlane.f32.xlu1 %v2336_v19  ;;  %v2189_v15 = vpack.c.bf16 %v6090_v26, %v6090_v26 }
 0xab2   :  { %v2389_v33 = vpop.permute.xlu2 %2388 }
 0xab4   :  { %v2308_v49 = vpop.xlane.xlu1 %2307 }
 0xab5   :  { %v6127_v57 = vpop.eup %4685  ;;  %v2320_v40 = vsub.f32 %v2242_v23, %v2308_v49  ;;  %v2432_v49 = vunpack.c.l.b16 %v2190_v50 }
 0xab6   :  { %v2345_v52 = vsel %vm1196_vm5, %v6127_v57, 0.0 }
 0xab7   :  { %v4688_v30 = vpop.eup %4687  ;;  %v2328_v55 = vmul.f32 1.442695, %v2320_v40  ;;  %v2391_v7 = vpop.permute.xlu0 %2390  ;;  %2346 = vadd.xlane.f32.xlu2 %v2345_v52  ;;  %v2431_v40 = vunpack.c.l.b16 %v2189_v15  ;;  %v2179_v52 = vld [vmem:[#allocation1] sm:$0xff] }
 0xab8   :  { %v2400_v39 = vand.u32 %v2391_v7, %v5758_v24  ;;  %v2339_v53 = vsel %vm1196_vm5, %v4688_v30, 0.0 }
 0xab9   :  { %4689 = vpow2.f32 %v2328_v55  ;;  %2340 = vadd.xlane.f32.xlu1 %v2339_v53  ;;  %v2191_v55 = vpack.c.bf16 %v2179_v52, %v2179_v52 }
 0xaba   :  { %2408 = vmatpush.bf16.msra.mxu0 %v2400_v39 }
 0xabb   :  { %v2433_v7 = vunpack.c.l.b16 %v2191_v55 }
 0xabc   :  { %v2314_v17 = vpop.xlane.xlu1 %2313 }
 0xabd   :  { %v2322_v14 = vsub.f32 %v2293_v3, %v2314_v17  ;;  %v2434_v3 = vpack.c.b16 %v2432_v49, %v2431_v40  ;;  %v2435_v39 = vpack.c.b16 %v2433_v7, %v2433_v7 }
 0xabe   :  { %2409 = vmatpush.bf16.msra.mxu0 %v2389_v33 }
 0xabf   :  { %v4690_v42 = vpop.eup %4689  ;;  %v2332_v23 = vmul.f32 1.442695, %v2322_v14 }
 0xac0   :  { %v2342_v36 = vsel %vm1203_vm6, %v4690_v42, 0.0 }
 0xac1   :  { %4691 = vpow2.f32 %v2332_v23  ;;  %2343 = vadd.xlane.f32.xlu0 %v2342_v36 }
 0xac4   :  { %v2317_v53 = vpop.xlane.xlu1 %2316 }
 0xac5   :  { %v2323_v54 = vsub.f32 %v6116_v41, %v2317_v53 }
 0xac7   :  { %v4692_v43 = vpop.eup %4691  ;;  %v2334_v17 = vmul.f32 1.442695, %v2323_v54 }
 0xac8   :  { %v2348_v19 = vsel %vm1196_vm5, %v4692_v43, 0.0 }
 0xac9   :  { %2349 = vadd.xlane.f32.xlu1 %v2348_v19  ;;  %4693 = vpow2.f32 %v2334_v17 }
 0xacf   :  { %2436 = vrot.lane.b32.xlu2 %v2434_v3, %s4770_s15  ;;  %v4694_v26 = vpop.eup %4693 }
 0xad0   :  { %v2351_v33 = vsel %vm1203_vm6, %v4694_v26, 0.0 }
 0xae2   :  { %2438 = vrot.lane.b32.xlu1 %v2435_v39, %s4770_s15 }
 0xb0c   :  { %2352 = vadd.xlane.f32.xlu1 %v2351_v33 }
 0xb24   :  { %v2338_v14 = vpop.xlane.xlu1 %2337 }
 0xb25   :  { %4695 = vrcp.f32 %v2338_v14 }
 0xb2a   :  { %v2347_v17 = vpop.xlane.xlu2 %2346 }
 0xb2b   :  { %v4696_v36 = vpop.eup %4695 }
 0xb2c   :  { %v2341_v23 = vpop.xlane.xlu1 %2340  ;;  %v2360_v50 = vmul.f32 %v4696_v36, %v4684_v20 }
 0xb2d   :  { %4697 = vrcp.f32 %v2341_v23 }
 0xb2e   :  { %v2366_v19 = vpack.c.bf16 %v2360_v50, %v2360_v50 }
 0xb30   :  { %v2375_v52 = vunpack.c.l.b16 %v2366_v19 }
 0xb33   :  { %v4698_v15 = vpop.eup %4697 }
 0xb34   :  { %v2361_v49 = vmul.f32 %v4698_v15, %v4688_v30  ;;  %v2344_v40 = vpop.xlane.xlu0 %2343 }
 0xb35   :  { %4699 = vrcp.f32 %v2344_v40 }
 0xb36   :  { %v2367_v3 = vpack.c.bf16 %v2361_v49, %v2361_v49 }
 0xb38   :  { %v2376_v41 = vunpack.c.l.b16 %v2367_v3  ;;  %v2437_v3 = vpop.permute.xlu2 %2436 }
 0xb3a   :  { %v2378_v55 = vpack.c.b16 %v2376_v41, %v2375_v52 }
 0xb3b   :  { %v4700_v7 = vpop.eup %4699 }
 0xb3c   :  { %4512 = vmatmul.msk.bf16.vlgmr.msra.gmra.mxu0 %vm1196_vm5, %v2378_v55  ;;  %v2362_v39 = vmul.f32 %v4700_v7, %v4690_v42  ;;  %v2350_v54 = vpop.xlane.xlu1 %2349 }
 0xb3d   :  { %4701 = vrcp.f32 %v2350_v54 }
 0xb3e   :  { %v2368_v53 = vpack.c.bf16 %v2362_v39, %v2362_v39  ;;  %4703 = vrcp.f32 %v2347_v17 }
 0xb40   :  { %v2377_v33 = vunpack.c.l.b16 %v2368_v53 }
 0xb42   :  { %v2379_v20 = vpack.c.b16 %v2377_v33, %v2377_v33 }
 0xb43   :  { %v4702_v30 = vpop.eup %4701 }
 0xb44   :  { %v4704_v14 = vpop.eup %4703  ;;  %v2364_v23 = vmul.f32 %v4702_v30, %v4692_v43 }
 0xb45   :  { %v2363_v36 = vmul.f32 %v4704_v14, %v6127_v57 }
 0xb46   :  { %v2370_v50 = vpack.c.bf16 %v2364_v23, %v2364_v23 }
 0xb47   :  { %v2369_v49 = vpack.c.bf16 %v2363_v36, %v2363_v36 }
 0xb48   :  { %v2424_v42 = vunpack.c.l.b16 %v2370_v50 }
 0xb49   :  { %v2423_v40 = vunpack.c.l.b16 %v2369_v49 }
 0xb4b   :  { %v2426_v52 = vpack.c.b16 %v2424_v42, %v2423_v40 }
 0xb4c   :  { %4513 = vmatmul.msk.bf16.gmra.mxu0 %vm1196_vm5, %v2379_v20 }
 0xb54   :  { %v2439_v15 = vpop.permute.xlu1 %2438 }
 0xb55   :  { %v2448_v19 = vand.u32 %v2439_v15, %v5758_v24 }
 0xb57   :  { %2456 = vmatpush.bf16.msra.mxu3 %v2448_v19 }
 0xb5b   :  { %2457 = vmatpush.bf16.msra.mxu3 %v2437_v3 }
 0xb5e   :  { %4514 = vmatmul.msk.bf16.vlgmr.msra.gmra.mxu3 %vm1196_vm5, %v2426_v52 }
 0xb7f   :  { %v2353_v41 = vpop.xlane.xlu1 %2352 }
 0xb80   :  { %4705 = vrcp.f32 %v2353_v41 }
 0xb86   :  { %v4706_v55 = vpop.eup %4705 }
 0xb87   :  { %v2365_v7 = vmul.f32 %v4706_v55, %v4694_v26 }
 0xb89   :  { %v2371_v43 = vpack.c.bf16 %v2365_v7, %v2365_v7 }
 0xb8b   :  { %v2425_v39 = vunpack.c.l.b16 %v2371_v43 }
 0xb8d   :  { %v2427_v57 = vpack.c.b16 %v2425_v39, %v2425_v39 }
 0xb8f   :  { %4515 = vmatmul.msk.bf16.gmra.mxu3 %vm1196_vm5, %v2427_v57 }
 0xbb9   :  { %v2411_v53 = vpop.f32.mrf.mxu0 }
 0xbba   :  { %v2474_v54 = vrot.slane %v2411_v53, 1  ;;  %v2475_v17 = vrot.slane %v2411_v53, 2  ;;  %v2476_v33 = vrot.slane %v2411_v53, 3  ;;  %2502 = vst [vmem:[#allocation1] ss:$9 sm:$0xff] %v2411_v53  ;;  %v2477_v20 = vrot.slane %v2411_v53, 4 }
 0xbbb   :  { %v2478_v30 = vrot.slane %v2411_v53, 5  ;;  %v2479_v14 = vrot.slane %v2411_v53, 6  ;;  %v2480_v23 = vrot.slane %v2411_v53, 7 }
 0xbbc   :  { %2504 = vst [vmem:[#allocation1 + $0x1] ss:$9 sm:$0xff] %v2474_v54 }
 0xbbd   :  { %2506 = vst [vmem:[#allocation1 + $0x2] ss:$9 sm:$0xff] %v2475_v17 }
 0xbbe   :  { %2508 = vst [vmem:[#allocation1 + $0x3] ss:$9 sm:$0xff] %v2476_v33 }
 0xbbf   :  { %2510 = vst [vmem:[#allocation1 + $0x4] ss:$9 sm:$0xff] %v2477_v20 }
 0xbc0   :  { %2512 = vst [vmem:[#allocation1 + $0x5] ss:$9 sm:$0xff] %v2478_v30 }
 0xbc1   :  { %2514 = vst [vmem:[#allocation1 + $0x6] ss:$9 sm:$0xff] %v2479_v14  ;;  %v2413_v26 = vpop.f32.mrf.mxu0 }
 0xbc2   :  { %2516 = vst [vmem:[#allocation1 + $0x7] ss:$9 sm:$0xff] %v2480_v23  ;;  %v2481_v36 = vrot.slane %v2413_v26, 1  ;;  %v2482_v50 = vrot.slane %v2413_v26, 2  ;;  %v2483_v19 = vrot.slane %v2413_v26, 3  ;;  %v2484_v42 = vrot.slane %v2413_v26, 4 }
 0xbc3   :  { %v2485_v40 = vrot.slane %v2413_v26, 5  ;;  %v2486_v3 = vrot.slane %v2413_v26, 6  ;;  %v2487_v52 = vrot.slane %v2413_v26, 7 }
 0xbc9   :  { %v6149_v15 = vld [vmem:[#allocation1] sm:$0xff]  ;;  %v2416_v49 = vpop.f32.mrf.mxu0 }
 0xbca   :  { %2518 = vst [vmem:[#allocation1] ss:$9 sm:$0xff] %v2413_v26 }
 0xbcb   :  { %2519 = vst [vmem:[#allocation1 + $0x1] ss:$9 sm:$0xff] %v2481_v36 }
 0xbcc   :  { %2520 = vst [vmem:[#allocation1 + $0x2] ss:$9 sm:$0xff] %v2482_v50 }
 0xbcd   :  { %2521 = vst [vmem:[#allocation1 + $0x3] ss:$9 sm:$0xff] %v2483_v19 }
 0xbce   :  { %2522 = vst [vmem:[#allocation1 + $0x4] ss:$9 sm:$0xff] %v2484_v42 }
 0xbcf   :  { %2523 = vst [vmem:[#allocation1 + $0x5] ss:$9 sm:$0xff] %v2485_v40 }
 0xbd0   :  { %2524 = vst [vmem:[#allocation1 + $0x6] ss:$9 sm:$0xff] %v2486_v3 }
 0xbd1   :  { %2525 = vst [vmem:[#allocation1 + $0x7] ss:$9 sm:$0xff] %v2487_v52  ;;  %v2418_v41 = vpop.f32.mrf.mxu0 }
 0xbd8   :  { %v6151_v55 = vld [vmem:[#allocation1] sm:$0xff] }
 0xbd9   :  { %2527 = vst [vmem:[#allocation1] ss:$9 sm:$0xff] %v2416_v49 }
 0xbe1   :  { %v2459_v7 = vpop.f32.mrf.mxu3 }
 0xbe2   :  { %v2488_v43 = vrot.slane %v2459_v7, 1  ;;  %v2489_v39 = vrot.slane %v2459_v7, 2  ;;  %v2490_v57 = vrot.slane %v2459_v7, 3  ;;  %2528 = vst [vmem:[#allocation1 + $0x1] ss:$9 sm:$0xff] %v2459_v7  ;;  %v2491_v53 = vrot.slane %v2459_v7, 4 }
 0xbe3   :  { %v2492_v54 = vrot.slane %v2459_v7, 5  ;;  %v2493_v17 = vrot.slane %v2459_v7, 6  ;;  %v2494_v20 = vrot.slane %v2459_v7, 7  ;;  %v7401_v7 = vld [vmem:[#allocation38_spill] sm:$0xff] }
 0xbe4   :  { %2529 = vst [vmem:[#allocation1 + $0x2] ss:$9 sm:$0xff] %v2488_v43 }
 0xbe5   :  { %2530 = vst [vmem:[#allocation1 + $0x3] ss:$9 sm:$0xff] %v2489_v39  ;;  %v7410_v39 = vld [vmem:[#allocation47_spill] sm:$0xff] }
 0xbe6   :  { %2531 = vst [vmem:[#allocation1 + $0x4] ss:$9 sm:$0xff] %v2490_v57  ;;  %v7411_v57 = vld [vmem:[#allocation48_spill] sm:$0xff] }
 0xbe7   :  { %2532 = vst [vmem:[#allocation1 + $0x5] ss:$9 sm:$0xff] %v2491_v53  ;;  %v7412_v53 = vld [vmem:[#allocation49_spill] sm:$0xff] }
 0xbe8   :  { %2533 = vst [vmem:[#allocation1 + $0x6] ss:$9 sm:$0xff] %v2492_v54  ;;  %v7413_v54 = vld [vmem:[#allocation50_spill] sm:$0xff] }
 0xbe9   :  { %2534 = vst [vmem:[#allocation1 + $0x7] ss:$9 sm:$0xff] %v2493_v17  ;;  %v2461_v33 = vpop.f32.mrf.mxu3  ;;  %v7414_v17 = vld [vmem:[#allocation51_spill] sm:$0xff] }
 0xbea   :  { %v2495_v30 = vrot.slane %v2461_v33, 1  ;;  %v2496_v23 = vrot.slane %v2461_v33, 2  ;;  %v2497_v26 = vrot.slane %v2461_v33, 3  ;;  %v2498_v36 = vrot.slane %v2461_v33, 4 }
 0xbeb   :  { %v2499_v50 = vrot.slane %v2461_v33, 5  ;;  %v2500_v19 = vrot.slane %v2461_v33, 6  ;;  %v2501_v49 = vrot.slane %v2461_v33, 7 }
 0xbf0   :  { %v6153_v14 = vld [vmem:[#allocation1] sm:$0xff] }
 0xbf1   :  { %2536 = vst [vmem:[#allocation1] ss:$9 sm:$0xff] %v2494_v20  ;;  %v7416_v20 = vld [vmem:[#allocation53_spill] sm:$0xff] }
 0xbf2   :  { %2537 = vst [vmem:[#allocation1 + $0x1] ss:$9 sm:$0xff] %v2461_v33  ;;  %v7415_v33 = vld [vmem:[#allocation52_spill] sm:$0xff] }
 0xbf3   :  { %2538 = vst [vmem:[#allocation1 + $0x2] ss:$9 sm:$0xff] %v2495_v30 }
 0xbf4   :  { %2539 = vst [vmem:[#allocation1 + $0x3] ss:$9 sm:$0xff] %v2496_v23  ;;  %v7417_v23 = vld [vmem:[#allocation54_spill] sm:$0xff] }
 0xbf5   :  { %2540 = vst [vmem:[#allocation1 + $0x4] ss:$9 sm:$0xff] %v2497_v26  ;;  %v7418_v26 = vld [vmem:[#allocation55_spill] sm:$0xff] }
 0xbf6   :  { %2541 = vst [vmem:[#allocation1 + $0x5] ss:$9 sm:$0xff] %v2498_v36  ;;  %v7419_v36 = vld [vmem:[#allocation56_spill] sm:$0xff] }
 0xbf7   :  { %2542 = vst [vmem:[#allocation1 + $0x6] ss:$9 sm:$0xff] %v2499_v50  ;;  %v7420_v50 = vld [vmem:[#allocation57_spill] sm:$0xff] }
 0xbf8   :  { %2543 = vst [vmem:[#allocation1 + $0x7] ss:$9 sm:$0xff] %v2500_v19  ;;  %v7421_v19 = vld [vmem:[#allocation59_spill] sm:$0xff] }
 0xbff   :  { %v6155_v42 = vld [vmem:[#allocation1] sm:$0xff] }
 0xc00   :  { %2545 = vst [vmem:[#allocation1] ss:$9 sm:$0xff] %v2501_v49  ;;  %v7422_v49 = vld [vmem:[#allocation60_spill] sm:$0xff] }
 0xc12   :  { %v2464_v40 = vpop.f32.mrf.mxu3 }
 0xc13   :  { %2546 = vst [vmem:[#allocation1 + $0x1] ss:$9 sm:$0xff] %v2464_v40  ;;  %v7423_v40 = vld [vmem:[#allocation61_spill] sm:$0xff] }
 0xc1a   :  { %v6157_v3 = vld [vmem:[#allocation1] sm:$0xff]  ;;  %v2466_v52 = vpop.f32.mrf.mxu3 }
 0xc1b   :  { %2570 = vst [vmem:[#allocation1] ss:$9 sm:$0xff] %v5382_v63  ;;  %v7402_v63 = vld [vmem:[#allocation39_spill] sm:$0xff]  ;;  %v7424_v52 = vld [vmem:[#allocation62_spill] sm:$0xff] }
 0xc1c   :  { %2572 = vst [vmem:[#allocation1 + $0x1] ss:$9 sm:$0xff] %v5385_v29  ;;  %v7403_v29 = vld [vmem:[#allocation40_spill] sm:$0xff] }
 0xc1d   :  { %2574 = vst [vmem:[#allocation1 + $0x2] ss:$9 sm:$0xff] %v5388_v61  ;;  %v7404_v61 = vld [vmem:[#allocation41_spill] sm:$0xff] }
 0xc1e   :  { %2576 = vst [vmem:[#allocation1 + $0x3] ss:$9 sm:$0xff] %v5391_v62  ;;  %v7405_v62 = vld [vmem:[#allocation42_spill] sm:$0xff] }
 0xc1f   :  { %2578 = vst [vmem:[#allocation1 + $0x4] ss:$9 sm:$0xff] %v5395_v11  ;;  %v7406_v11 = vld [vmem:[#allocation43_spill] sm:$0xff] }
 0xc20   :  { %2580 = vst [vmem:[#allocation1 + $0x5] ss:$9 sm:$0xff] %v5398_v13  ;;  %v7407_v13 = vld [vmem:[#allocation44_spill] sm:$0xff] }
 0xc21   :  { %2582 = vst [vmem:[#allocation1 + $0x6] ss:$9 sm:$0xff] %v5402_v21 }
 0xc22   :  { %2584 = vst [vmem:[#allocation1 + $0x7] ss:$9 sm:$0xff] %v5406_v59  ;;  %v7408_v59 = vld [vmem:[#allocation45_spill] sm:$0xff] }
 0xc29   :  { %v6167_v41 = vld [vmem:[#allocation1] sm:$0xff] }
 0xc2a   :  { %2586 = vst [vmem:[#allocation1] ss:$9 sm:$0xff] %v5417_v31  ;;  %v7409_v31 = vld [vmem:[#allocation46_spill] sm:$0xff] }
 0xc2b   :  { %2587 = vst [vmem:[#allocation1 + $0x1] ss:$9 sm:$0xff] %v7401_v7 }
 0xc2c   :  { %2588 = vst [vmem:[#allocation1 + $0x2] ss:$9 sm:$0xff] %v7402_v63  ;;  %v7425_v63 = vld [vmem:[#allocation63_spill] sm:$0xff] }
 0xc2d   :  { %2589 = vst [vmem:[#allocation1 + $0x3] ss:$9 sm:$0xff] %v7403_v29 }
 0xc2e   :  { %2590 = vst [vmem:[#allocation1 + $0x4] ss:$9 sm:$0xff] %v7404_v61 }
 0xc2f   :  { %2591 = vst [vmem:[#allocation1 + $0x5] ss:$9 sm:$0xff] %v7405_v62 }
 0xc30   :  { %2592 = vst [vmem:[#allocation1 + $0x6] ss:$9 sm:$0xff] %v7406_v11 }
 0xc31   :  { %2593 = vst [vmem:[#allocation1 + $0x7] ss:$9 sm:$0xff] %v7407_v13 }
 0xc38   :  { %v6177_v21 = vld [vmem:[#allocation1] sm:$0xff] }
 0xc39   :  { %2595 = vst [vmem:[#allocation1] ss:$9 sm:$0xff] %v7408_v59 }
 0xc40   :  { %v6180_v43 = vld [vmem:[#allocation1] sm:$0xff] }
 0xc41   :  { %2597 = vst [vmem:[#allocation1] ss:$9 sm:$0xff] %v7409_v31 }
 0xc42   :  { %2598 = vst [vmem:[#allocation1 + $0x1] ss:$9 sm:$0xff] %v7410_v39 }
 0xc43   :  { %2599 = vst [vmem:[#allocation1 + $0x2] ss:$9 sm:$0xff] %v7411_v57 }
 0xc44   :  { %2600 = vst [vmem:[#allocation1 + $0x3] ss:$9 sm:$0xff] %v7412_v53 }
 0xc45   :  { %2601 = vst [vmem:[#allocation1 + $0x4] ss:$9 sm:$0xff] %v7413_v54 }
 0xc46   :  { %2602 = vst [vmem:[#allocation1 + $0x5] ss:$9 sm:$0xff] %v7414_v17 }
 0xc47   :  { %2603 = vst [vmem:[#allocation1 + $0x6] ss:$9 sm:$0xff] %v7415_v33 }
 0xc48   :  { %2604 = vst [vmem:[#allocation1 + $0x7] ss:$9 sm:$0xff] %v7416_v20  ;;  %v7426_v20 = vld [vmem:[#allocation69_spill] sm:$0xff] }
 0xc4f   :  { %v6190_v30 = vld [vmem:[#allocation1] sm:$0xff] }
 0xc50   :  { %2606 = vst [vmem:[#allocation1] ss:$9 sm:$0xff] %v7417_v23  ;;  %v7427_v23 = vld [vmem:[#allocation70_spill] sm:$0xff] }
 0xc51   :  { %2607 = vst [vmem:[#allocation1 + $0x1] ss:$9 sm:$0xff] %v7418_v26  ;;  %v7428_v26 = vld [vmem:[#allocation58_spill] sm:$0xff] }
 0xc52   :  { %2608 = vst [vmem:[#allocation1 + $0x2] ss:$9 sm:$0xff] %v7419_v36 }
 0xc53   :  { %2609 = vst [vmem:[#allocation1 + $0x3] ss:$9 sm:$0xff] %v7420_v50 }
 0xc54   :  { %2610 = vst [vmem:[#allocation1 + $0x4] ss:$9 sm:$0xff] %v7421_v19 }
 0xc55   :  { %2611 = vst [vmem:[#allocation1 + $0x5] ss:$9 sm:$0xff] %v7422_v49  ;;  %v7429_v49 = vld [vmem:[#allocation71_spill] sm:$0xff] }
 0xc56   :  { %2612 = vst [vmem:[#allocation1 + $0x6] ss:$9 sm:$0xff] %v7423_v40 }
 0xc57   :  { %2613 = vst [vmem:[#allocation1 + $0x7] ss:$9 sm:$0xff] %v7424_v52 }
 0xc5e   :  { %v6200_v7 = vld [vmem:[#allocation1] sm:$0xff] }
 0xc5f   :  { %2615 = vst [vmem:[#allocation1] ss:$9 sm:$0xff] %v7425_v63 }
 0xc66   :  { %v2616_v29 = vld [vmem:[#allocation1] sm:$0xff] }
 0xc67   :  { %2629 = vst [vmem:[#allocation1] ss:$9 sm:$0xff] %v5379_v34 }
 0xc68   :  { %2631 = vst [vmem:[#allocation1 + $0x1] ss:$9 sm:$0xff] %v5540_v8 }
 0xc69   :  { %2633 = vst [vmem:[#allocation1 + $0x2] ss:$9 sm:$0xff] %v5545_v12 }
 0xc6a   :  { %2635 = vst [vmem:[#allocation1 + $0x3] ss:$9 sm:$0xff] %v5549_v6 }
 0xc6b   :  { %2637 = vst [vmem:[#allocation1 + $0x4] ss:$9 sm:$0xff] %v5553_v18 }
 0xc6c   :  { %2639 = vst [vmem:[#allocation1 + $0x5] ss:$9 sm:$0xff] %v5557_v5 }
 0xc6d   :  { %2641 = vst [vmem:[#allocation1 + $0x6] ss:$9 sm:$0xff] %v5561_v9 }
 0xc6e   :  { %2643 = vst [vmem:[#allocation1 + $0x7] ss:$9 sm:$0xff] %v5565_v4 }
 0xc75   :  { %v2644_v61 = vld [vmem:[#allocation1] sm:$0xff] }
 0xc76   :  { %2645 = vst [vmem:[#allocation1] ss:$9 sm:$0xff] %v5411_v60  ;;  %v2682_v62 = vpack.c.bf16 %v2644_v61, %v2644_v61  ;;  %v2628_v61 = vpack.c.bf16 %v2616_v29, %v2616_v29  ;;  %v2624_v29 = vpack.c.bf16 %v6177_v21, %v6177_v21 }
 0xc77   :  { %2646 = vst [vmem:[#allocation1 + $0x1] ss:$9 sm:$0xff] %v5571_v2 }
 0xc78   :  { %2647 = vst [vmem:[#allocation1 + $0x2] ss:$9 sm:$0xff] %v5574_v1  ;;  %v2762_v59 = vunpack.c.l.b16 %v2682_v62 }
 0xc79   :  { %2648 = vst [vmem:[#allocation1 + $0x3] ss:$9 sm:$0xff] %v5578_v27 }
 0xc7a   :  { %2649 = vst [vmem:[#allocation1 + $0x4] ss:$9 sm:$0xff] %v5582_v38 }
 0xc7b   :  { %2650 = vst [vmem:[#allocation1 + $0x5] ss:$9 sm:$0xff] %v5586_v10 }
 0xc7c   :  { %2651 = vst [vmem:[#allocation1 + $0x6] ss:$9 sm:$0xff] %v5590_v58 }
 0xc7d   :  { %2652 = vst [vmem:[#allocation1 + $0x7] ss:$9 sm:$0xff] %v5594_v16 }
 0xc84   :  { %v2653_v11 = vld [vmem:[#allocation1] sm:$0xff] }
 0xc85   :  { %v2683_v13 = vpack.c.bf16 %v2653_v11, %v2653_v11  ;;  %2654 = vst [vmem:[#allocation1] ss:$9 sm:$0xff] %v5451_v45 }
 0xc87   :  { %v2763_v31 = vunpack.c.l.b16 %v2683_v13  ;;  %v2806_v13 = vunpack.c.l.b16 %v2628_v61 }
 0xc89   :  { %v2765_v39 = vpack.c.b16 %v2763_v31, %v2762_v59 }
 0xc8b   :  { %2767 = vrot.lane.b32.xlu2 %v2765_v39, %s4771_s16  ;;  %v2808_v39 = vpack.c.b16 %v2806_v13, %v2806_v13 }
 0xc8c   :  { %v2655_v57 = vld [vmem:[#allocation1] sm:$0xff] }
 0xc8d   :  { %v2684_v53 = vpack.c.bf16 %v2655_v57, %v2655_v57  ;;  %2656 = vst [vmem:[#allocation1] ss:$9 sm:$0xff] %v5601_v44 }
 0xc8e   :  { %2657 = vst [vmem:[#allocation1 + $0x1] ss:$9 sm:$0xff] %v5604_v0 }
 0xc8f   :  { %v2764_v54 = vunpack.c.l.b16 %v2684_v53  ;;  %2658 = vst [vmem:[#allocation1 + $0x2] ss:$9 sm:$0xff] %v5607_v22 }
 0xc90   :  { %2659 = vst [vmem:[#allocation1 + $0x3] ss:$9 sm:$0xff] %v5611_v28 }
 0xc91   :  { %v2766_v17 = vpack.c.b16 %v2764_v54, %v2764_v54  ;;  %2660 = vst [vmem:[#allocation1 + $0x4] ss:$9 sm:$0xff] %v5615_v51 }
 0xc92   :  { %2661 = vst [vmem:[#allocation1 + $0x5] ss:$9 sm:$0xff] %v5619_v56 }
 0xc93   :  { %2769 = vrot.lane.b32.xlu2 %v2766_v17, %s4771_s16  ;;  %2662 = vst [vmem:[#allocation1 + $0x6] ss:$9 sm:$0xff] %v5623_v32 }
 0xc94   :  { %2663 = vst [vmem:[#allocation1 + $0x7] ss:$9 sm:$0xff] %v5476_v25 }
 0xc9b   :  { %v2664_v33 = vld [vmem:[#allocation1] sm:$0xff] }
 0xc9c   :  { %2665 = vst [vmem:[#allocation1] ss:$9 sm:$0xff] %v7392_v48  ;;  %v2685_v36 = vpack.c.bf16 %v2664_v33, %v2664_v33 }
 0xc9d   :  { %2666 = vst [vmem:[#allocation1 + $0x1] ss:$9 sm:$0xff] %v7393_v47 }
 0xc9e   :  { %2667 = vst [vmem:[#allocation1 + $0x2] ss:$9 sm:$0xff] %v7394_v37  ;;  %v2816_v40 = vunpack.c.l.b16 %v2685_v36 }
 0xc9f   :  { %2668 = vst [vmem:[#allocation1 + $0x3] ss:$9 sm:$0xff] %v7395_v46 }
 0xca0   :  { %2669 = vst [vmem:[#allocation1 + $0x4] ss:$9 sm:$0xff] %v7396_v35 }
 0xca1   :  { %2670 = vst [vmem:[#allocation1 + $0x5] ss:$9 sm:$0xff] %v7426_v20 }
 0xca2   :  { %2671 = vst [vmem:[#allocation1 + $0x6] ss:$9 sm:$0xff] %v7427_v23 }
 0xca3   :  { %2672 = vst [vmem:[#allocation1 + $0x7] ss:$9 sm:$0xff] %v7428_v26 }
 0xcaa   :  { %v2673_v50 = vld [vmem:[#allocation1] sm:$0xff] }
 0xcab   :  { %v2686_v19 = vpack.c.bf16 %v2673_v50, %v2673_v50  ;;  %2674 = vst [vmem:[#allocation1] ss:$9 sm:$0xff] %v7429_v49 }
 0xcad   :  { %v2817_v52 = vunpack.c.l.b16 %v2686_v19 }
 0xcaf   :  { %v2819_v63 = vpack.c.b16 %v2817_v52, %v2816_v40 }
 0xcb1   :  { %2821 = vrot.lane.b32.xlu0 %v2819_v63, %s4771_s16 }
 0xcb2   :  { %v2675_v62 = vld [vmem:[#allocation1] sm:$0xff] }
 0xcb3   :  { %2690 = vst [vmem:[#allocation1 + $0x1] ss:$9 sm:$0xff] %v5540_v8  ;;  %v2687_v11 = vpack.c.bf16 %v2675_v62, %v2675_v62  ;;  %v2623_v8 = vpack.c.bf16 %v6167_v41, %v6167_v41 }
 0xcb4   :  { %2692 = vst [vmem:[#allocation1 + $0x2] ss:$9 sm:$0xff] %v5545_v12  ;;  %v2751_v12 = vunpack.c.l.b16 %v2624_v29 }
 0xcb5   :  { %2694 = vst [vmem:[#allocation1 + $0x3] ss:$9 sm:$0xff] %v5549_v6  ;;  %v2818_v59 = vunpack.c.l.b16 %v2687_v11  ;;  %v2750_v6 = vunpack.c.l.b16 %v2623_v8 }
 0xcb6   :  { %2696 = vst [vmem:[#allocation1 + $0x4] ss:$9 sm:$0xff] %v5553_v18 }
 0xcb7   :  { %2698 = vst [vmem:[#allocation1 + $0x5] ss:$9 sm:$0xff] %v5557_v5  ;;  %v2820_v31 = vpack.c.b16 %v2818_v59, %v2818_v59  ;;  %v2753_v18 = vpack.c.b16 %v2751_v12, %v2750_v6  ;;  %v2627_v5 = vpack.c.bf16 %v6200_v7, %v6200_v7  ;;  %v2625_v7 = vpack.c.bf16 %v6180_v43, %v6180_v43 }
 0xcb8   :  { %2700 = vst [vmem:[#allocation1 + $0x6] ss:$9 sm:$0xff] %v5561_v9  ;;  %v2626_v9 = vpack.c.bf16 %v6190_v30, %v6190_v30 }
 0xcb9   :  { %2702 = vst [vmem:[#allocation1 + $0x7] ss:$9 sm:$0xff] %v5565_v4  ;;  %2823 = vrot.lane.b32.xlu2 %v2820_v31, %s4771_s16  ;;  %2811 = vrot.lane.b32.xlu0 %v2808_v39, %s4772_s17  ;;  %v2805_v4 = vunpack.c.l.b16 %v2627_v5 }
 0xcba   :  { %2688 = vst [vmem:[#allocation1] ss:$9 sm:$0xff] %v5379_v34  ;;  %v2804_v34 = vunpack.c.l.b16 %v2626_v9 }
 0xcbc   :  { %v2807_v41 = vpack.c.b16 %v2805_v4, %v2804_v34 }
 0xcc1   :  { %v6255_v21 = vld [vmem:[#allocation1] sm:$0xff]  ;;  %2755 = vrot.lane.b32.xlu2 %v2753_v18, %s4772_s17 }
 0xcc2   :  { %2704 = vst [vmem:[#allocation1] ss:$9 sm:$0xff] %v5411_v60  ;;  %v2752_v60 = vunpack.c.l.b16 %v2625_v7 }
 0xcc3   :  { %2705 = vst [vmem:[#allocation1 + $0x1] ss:$9 sm:$0xff] %v5571_v2 }
 0xcc4   :  { %2706 = vst [vmem:[#allocation1 + $0x2] ss:$9 sm:$0xff] %v5574_v1  ;;  %v2754_v2 = vpack.c.b16 %v2752_v60, %v2752_v60 }
 0xcc5   :  { %2707 = vst [vmem:[#allocation1 + $0x3] ss:$9 sm:$0xff] %v5578_v27 }
 0xcc6   :  { %2708 = vst [vmem:[#allocation1 + $0x4] ss:$9 sm:$0xff] %v5582_v38 }
 0xcc7   :  { %2709 = vst [vmem:[#allocation1 + $0x5] ss:$9 sm:$0xff] %v5586_v10 }
 0xcc8   :  { %2710 = vst [vmem:[#allocation1 + $0x6] ss:$9 sm:$0xff] %v5590_v58 }
 0xcc9   :  { %2711 = vst [vmem:[#allocation1 + $0x7] ss:$9 sm:$0xff] %v5594_v16  ;;  %2809 = vrot.lane.b32.xlu2 %v2807_v41, %s4772_s17 }
 0xcd0   :  { %v6269_v30 = vld [vmem:[#allocation1] sm:$0xff] }
 0xcd1   :  { %2757 = vrot.lane.b32.xlu2 %v2754_v2, %s4772_s17  ;;  %2713 = vst [vmem:[#allocation1] ss:$9 sm:$0xff] %v5451_v45 }
 0xcd8   :  { %v6272_v1 = vld [vmem:[#allocation1] sm:$0xff] }
 0xcd9   :  { %2715 = vst [vmem:[#allocation1] ss:$9 sm:$0xff] %v5601_v44  ;;  %v2743_v41 = vpack.c.bf16 %v6272_v1, %v6272_v1 }
 0xcda   :  { %2716 = vst [vmem:[#allocation1 + $0x1] ss:$9 sm:$0xff] %v5604_v0 }
 0xcdb   :  { %2717 = vst [vmem:[#allocation1 + $0x2] ss:$9 sm:$0xff] %v5607_v22  ;;  %v2940_v7 = vunpack.c.l.b16 %v2743_v41 }
 0xcdc   :  { %2718 = vst [vmem:[#allocation1 + $0x3] ss:$9 sm:$0xff] %v5611_v28 }
 0xcdd   :  { %2719 = vst [vmem:[#allocation1 + $0x4] ss:$9 sm:$0xff] %v5615_v51 }
 0xcde   :  { %2720 = vst [vmem:[#allocation1 + $0x5] ss:$9 sm:$0xff] %v5619_v56 }
 0xcdf   :  { %2721 = vst [vmem:[#allocation1 + $0x6] ss:$9 sm:$0xff] %v5623_v32 }
 0xce0   :  { %2722 = vst [vmem:[#allocation1 + $0x7] ss:$9 sm:$0xff] %v5476_v25 }
 0xce5   :  { %v2768_v27 = vpop.permute.xlu2 %2767 }
 0xce6   :  { %v2778_v25 = vsel %vm1115_vm4, %v2768_v27, 0 }
 0xce7   :  { %v6282_v45 = vld [vmem:[#allocation1] sm:$0xff] }
 0xce8   :  { %2724 = vst [vmem:[#allocation1] ss:$9 sm:$0xff] %v7392_v48 }
 0xce9   :  { %2725 = vst [vmem:[#allocation1 + $0x1] ss:$9 sm:$0xff] %v7393_v47 }
 0xcea   :  { %2726 = vst [vmem:[#allocation1 + $0x2] ss:$9 sm:$0xff] %v7394_v37 }
 0xceb   :  { %2727 = vst [vmem:[#allocation1 + $0x3] ss:$9 sm:$0xff] %v7395_v46 }
 0xcec   :  { %2728 = vst [vmem:[#allocation1 + $0x4] ss:$9 sm:$0xff] %v7396_v35 }
 0xced   :  { %v2770_v51 = vpop.permute.xlu2 %2769  ;;  %2729 = vst [vmem:[#allocation1 + $0x5] ss:$9 sm:$0xff] %v7426_v20 }
 0xcee   :  { %v2781_v32 = vsel %vm1115_vm4, %v2770_v51, 0  ;;  %2730 = vst [vmem:[#allocation1 + $0x6] ss:$9 sm:$0xff] %v7427_v23 }
 0xcef   :  { %2789 = vmatpush.bf16.xpose.msrb.mxu1 %v2781_v32  ;;  %2731 = vst [vmem:[#allocation1 + $0x7] ss:$9 sm:$0xff] %v7428_v26  ;;  %v2942_v32 = vpack.c.b16 %v2940_v7, %v2940_v7 }
 0xcf6   :  { %v6294_v56 = vld [vmem:[#allocation1] sm:$0xff] }
 0xcf7   :  { %2790 = vmatpush.bf16.xpose.msrb.mxu1 %v2778_v25  ;;  %2733 = vst [vmem:[#allocation1] ss:$9 sm:$0xff] %v7429_v49  ;;  %v2742_v25 = vpack.c.bf16 %v6269_v30, %v6269_v30  ;;  %v2745_v1 = vpack.c.bf16 %v6294_v56, %v6294_v56 }
 0xcfe   :  { %v2734_v20 = vld [vmem:[#allocation1] sm:$0xff] }
 0xcff   :  { %v2746_v23 = vpack.c.bf16 %v2734_v20, %v2734_v20 }
 0xd01   :  { %v2988_v36 = vunpack.c.l.b16 %v2746_v23 }
 0xd03   :  { %v2990_v19 = vpack.c.b16 %v2988_v36, %v2988_v36 }
 0xd13   :  { %v2824_v28 = vpop.permute.xlu2 %2823 }
 0xd14   :  { %v2835_v22 = vsel %vm1115_vm4, %v2824_v28, 0  ;;  %v2741_v28 = vpack.c.bf16 %v6255_v21, %v6255_v21  ;;  %v7430_v21 = vld [vmem:[#allocation72_spill] sm:$0xff] }
 0xd15   :  { %2843 = vmatpush.bf16.xpose.msrb.mxu2 %v2835_v22  ;;  %v2939_v22 = vunpack.c.l.b16 %v2742_v25 }
 0xd1b   :  { %v2756_v38 = vpop.permute.xlu2 %2755 }
 0xd1c   :  { %4516 = vmatmul.msk.bf16.vlgmr.msrb.gmra.mxu1 %vm1115_vm4, %v2756_v38  ;;  %v2938_v38 = vunpack.c.l.b16 %v2741_v28 }
 0xd23   :  { %v2822_v10 = vpop.permute.xlu0 %2821  ;;  %v2810_v58 = vpop.permute.xlu2 %2809 }
 0xd24   :  { %v2832_v16 = vsel %vm1115_vm4, %v2822_v10, 0  ;;  %v2744_v10 = vpack.c.bf16 %v6282_v45, %v6282_v45 }
 0xd25   :  { %2844 = vmatpush.bf16.xpose.msrb.mxu2 %v2832_v16  ;;  %v2987_v16 = vunpack.c.l.b16 %v2745_v1 }
 0xd2b   :  { %v2758_v44 = vpop.permute.xlu2 %2757  ;;  %v2812_v0 = vpop.permute.xlu0 %2811 }
 0xd2c   :  { %4517 = vmatmul.msk.bf16.gmra.mxu1 %vm1115_vm4, %v2758_v44  ;;  %4518 = vmatmul.msk.bf16.vlgmr.msrb.gmra.mxu2 %vm1115_vm4, %v2810_v58  ;;  %v2941_v58 = vpack.c.b16 %v2939_v22, %v2938_v38  ;;  %v2986_v44 = vunpack.c.l.b16 %v2744_v10 }
 0xd3c   :  { %4519 = vmatmul.msk.bf16.gmra.mxu2 %vm1115_vm4, %v2812_v0  ;;  %v2989_v0 = vpack.c.b16 %v2987_v16, %v2986_v44 }
 0xd99   :  { %v2792_v35 = vpop.f32.mrf.mxu1 }
 0xd9a   :  { %v2855_v46 = vsel %vm1196_vm5, %v2792_v35, -inf }
 0xd9b   :  { %2856 = vmax.xlane.f32.xlu1 %v2855_v46  ;;  %v7431_v46 = vld [vmem:[#allocation73_spill] sm:$0xff] }
 0xda1   :  { %v2794_v37 = vpop.f32.mrf.mxu1 }
 0xda2   :  { %v2858_v47 = vsel %vm1196_vm5, %v2794_v37, -inf }
 0xda3   :  { %2859 = vmax.xlane.f32.xlu2 %v2858_v47 }
 0xda9   :  { %v6305_v48 = vpop.f32.mrf.mxu1 }
 0xdaa   :  { %v2861_v43 = vsel %vm1203_vm6, %v6305_v48, -inf }
 0xdab   :  { %2862 = vmax.xlane.f32.xlu1 %v2861_v43 }
 0xdaf   :  { %v2846_v57 = vpop.f32.mrf.mxu2 }
 0xdb0   :  { %v2864_v53 = vsel %vm1196_vm5, %v2846_v57, -inf }
 0xdb1   :  { %v2799_v54 = vpop.f32.mrf.mxu1  ;;  %2865 = vmax.xlane.f32.xlu0 %v2864_v53  ;;  %v7432_v53 = vld [vmem:[#allocation74_spill] sm:$0xff] }
 0xdb7   :  { %v2848_v17 = vpop.f32.mrf.mxu2 }
 0xdb8   :  { %v2867_v33 = vsel %vm1196_vm5, %v2848_v17, -inf }
 0xdb9   :  { %2868 = vmax.xlane.f32.xlu1 %v2867_v33 }
 0xdbf   :  { %v6311_v26 = vpop.f32.mrf.mxu2 }
 0xdc0   :  { %v2870_v50 = vsel %vm1203_vm6, %v6311_v26, -inf }
 0xdc1   :  { %2871 = vmax.xlane.f32.xlu1 %v2870_v50 }
 0xdc5   :  { %2993 = vrot.lane.b32.xlu0 %v2990_v19, %s4773_s18 }
 0xdc7   :  { %v2853_v49 = vpop.f32.mrf.mxu2 }
 0xe0e   :  { %v2857_v40 = vpop.xlane.xlu1 %2856 }
 0xe0f   :  { %v2873_v52 = vsub.f32 %v2792_v35, %v2857_v40 }
 0xe11   :  { %v2879_v63 = vmul.f32 1.442695, %v2873_v52 }
 0xe13   :  { %4707 = vpow2.f32 %v2879_v63 }
 0xe16   :  { %v2860_v61 = vpop.xlane.xlu2 %2859 }
 0xe17   :  { %v2874_v62 = vsub.f32 %v2794_v37, %v2860_v61 }
 0xe19   :  { %v6316_v11 = vpop.eup %4707  ;;  %v2881_v13 = vmul.f32 1.442695, %v2874_v62 }
 0xe1a   :  { %v2891_v59 = vsel %vm1196_vm5, %v6316_v11, 0.0 }
 0xe1b   :  { %4709 = vpow2.f32 %v2881_v13  ;;  %2892 = vadd.xlane.f32.xlu1 %v2891_v59 }
 0xe1e   :  { %v2863_v29 = vpop.xlane.xlu1 %2862 }
 0xe1f   :  { %v2875_v30 = vsub.f32 %v6305_v48, %v2863_v29 }
 0xe21   :  { %v6320_v31 = vpop.eup %4709  ;;  %v2883_v35 = vmul.f32 1.442695, %v2875_v30 }
 0xe22   :  { %v2894_v39 = vsel %vm1196_vm5, %v6320_v31, 0.0 }
 0xe23   :  { %2895 = vadd.xlane.f32.xlu1 %v2894_v39 }
 0xe24   :  { %v2866_v8 = vpop.xlane.xlu0 %2865 }
 0xe25   :  { %v2876_v12 = vsub.f32 %v2846_v57, %v2866_v8 }
 0xe27   :  { %v2885_v6 = vmul.f32 1.442695, %v2876_v12 }
 0xe29   :  { %4711 = vpow2.f32 %v2885_v6 }
 0xe2c   :  { %v2869_v18 = vpop.xlane.xlu1 %2868 }
 0xe2d   :  { %v2877_v5 = vsub.f32 %v2848_v17, %v2869_v18 }
 0xe2f   :  { %v6324_v9 = vpop.eup %4711  ;;  %v2887_v4 = vmul.f32 1.442695, %v2877_v5 }
 0xe30   :  { %v2900_v34 = vsel %vm1196_vm5, %v6324_v9, 0.0 }
 0xe31   :  { %4713 = vpow2.f32 %v2887_v4  ;;  %2901 = vadd.xlane.f32.xlu2 %v2900_v34 }
 0xe32   :  { %4715 = vpow2.f32 %v2883_v35 }
 0xe34   :  { %v2872_v56 = vpop.xlane.xlu1 %2871 }
 0xe35   :  { %v2878_v45 = vsub.f32 %v6311_v26, %v2872_v56 }
 0xe37   :  { %v4714_v60 = vpop.eup %4713  ;;  %v2994_v2 = vpop.permute.xlu0 %2993  ;;  %v2889_v47 = vmul.f32 1.442695, %v2878_v45 }
 0xe38   :  { %v3003_v27 = vand.u32 %v2994_v2, %v5758_v24  ;;  %v2903_v51 = vsel %vm1196_vm5, %v4714_v60, 0.0  ;;  %v4716_v37 = vpop.eup %4715 }
 0xe39   :  { %2904 = vadd.xlane.f32.xlu0 %v2903_v51  ;;  %v2897_v48 = vsel %vm1203_vm6, %v4716_v37, 0.0  ;;  %4717 = vpow2.f32 %v2889_v47 }
 0xe3a   :  { %3011 = vmatpush.bf16.msrb.mxu3 %v3003_v27 }
 0xe3c   :  { %2945 = vrot.lane.b32.xlu1 %v2942_v32, %s4773_s18 }
 0xe3f   :  { %v4718_v43 = vpop.eup %4717 }
 0xe40   :  { %v2906_v57 = vsel %vm1203_vm6, %v4718_v43, 0.0 }
 0xe49   :  { %2943 = vrot.lane.b32.xlu2 %v2941_v58, %s4773_s18 }
 0xe4d   :  { %2991 = vrot.lane.b32.xlu0 %v2989_v0, %s4773_s18 }
 0xe55   :  { %1993 = vrot.lane.b32.xlu0 %v7430_v21, %s4774_s19 }
 0xe5d   :  { %1995 = vrot.lane.b32.xlu0 %v7431_v46, %s4774_s19 }
 0xe65   :  { %2548 = vrot.lane.b32.xlu0 %v6149_v15, %s4775_s0 }
 0xe66   :  { %2898 = vadd.xlane.f32.xlu1 %v2897_v48 }
 0xe6d   :  { %2550 = vrot.lane.b32.xlu0 %v6151_v55, %s4775_s0 }
 0xe72   :  { %2907 = vadd.xlane.f32.xlu2 %v2906_v57 }
 0xe8a   :  { %1997 = vrot.lane.b32.xlu2 %v7432_v53, %s4774_s19 }
 0xe8e   :  { %v2893_v54 = vpop.xlane.xlu1 %2892 }
 0xe96   :  { %v2896_v17 = vpop.xlane.xlu1 %2895 }
 0xe97   :  { %4719 = vrcp.f32 %v2896_v17 }
 0xe98   :  { %4721 = vrcp.f32 %v2893_v54 }
 0xe9d   :  { %v4720_v33 = vpop.eup %4719 }
 0xe9e   :  { %v4722_v15 = vpop.eup %4721  ;;  %v2916_v20 = vmul.f32 %v4720_v33, %v6320_v31 }
 0xe9f   :  { %v2915_v26 = vmul.f32 %v4722_v15, %v6316_v11 }
 0xea0   :  { %v2922_v55 = vpack.c.bf16 %v2916_v20, %v2916_v20 }
 0xea1   :  { %v2921_v49 = vpack.c.bf16 %v2915_v26, %v2915_v26  ;;  %v7433_v26 = vld [vmem:[#allocation76_spill] sm:$0xff] }
 0xea2   :  { %v2931_v40 = vunpack.c.l.b16 %v2922_v55 }
 0xea3   :  { %v2930_v61 = vunpack.c.l.b16 %v2921_v49 }
 0xea4   :  { %v2902_v23 = vpop.xlane.xlu2 %2901 }
 0xea5   :  { %v2933_v59 = vpack.c.b16 %v2931_v40, %v2930_v61 }
 0xeac   :  { %v2905_v36 = vpop.xlane.xlu0 %2904  ;;  %v2944_v62 = vpop.permute.xlu2 %2943 }
 0xead   :  { %4723 = vrcp.f32 %v2905_v36 }
 0xeae   :  { %4725 = vrcp.f32 %v2902_v23  ;;  %v2946_v50 = vpop.permute.xlu1 %2945 }
 0xeaf   :  { %v2955_v19 = vand.u32 %v2946_v50, %v5758_v24 }
 0xeb1   :  { %2963 = vmatpush.bf16.msrb.mxu0 %v2955_v19 }
 0xeb3   :  { %v4724_v52 = vpop.eup %4723 }
 0xeb4   :  { %v4726_v63 = vpop.eup %4725  ;;  %v2919_v13 = vmul.f32 %v4724_v52, %v4714_v60 }
 0xeb5   :  { %2964 = vmatpush.bf16.msrb.mxu0 %v2944_v62  ;;  %v2918_v31 = vmul.f32 %v4726_v63, %v6324_v9 }
 0xeb6   :  { %v2925_v11 = vpack.c.bf16 %v2919_v13, %v2919_v13 }
 0xeb7   :  { %v2924_v39 = vpack.c.bf16 %v2918_v31, %v2918_v31 }
 0xeb8   :  { %4520 = vmatmul.msk.bf16.vlgmr.msrb.gmra.mxu0 %vm1196_vm5, %v2933_v59  ;;  %v2979_v29 = vunpack.c.l.b16 %v2925_v11 }
 0xeb9   :  { %v2978_v8 = vunpack.c.l.b16 %v2924_v39 }
 0xebb   :  { %v2981_v24 = vpack.c.b16 %v2979_v29, %v2978_v8  ;;  %v4586_v8 = vld [vmem:[%s7091_s5 + $0x8] sm:$0xff] }
 0xebc   :  { %3164 = vmatpush.bf16.msra.mxu1 %v4586_v8 }
 0xebf   :  { %v2992_v12 = vpop.permute.xlu0 %2991 }
 0xec0   :  { %3012 = vmatpush.bf16.msrb.mxu3 %v2992_v12 }
 0xec3   :  { %4522 = vmatmul.msk.bf16.vlgmr.msrb.gmra.mxu3 %vm1196_vm5, %v2981_v24 }
 0xec7   :  { %v1994_v6 = vpop.permute.xlu0 %1993 }
 0xec8   :  { %2009 = vst.msk [vmem:[#allocation2] sm:$0xff] %vm2008_vm9, %v1994_v6 }
 0xecf   :  { %v1996_v18 = vpop.permute.xlu0 %1995 }
 0xed0   :  { %2010 = vst.msk [vmem:[#allocation2 + $0x8] sm:$0xff] %vm2008_vm9, %v1996_v18 }
 0xed7   :  { %v2549_v5 = vpop.permute.xlu0 %2548 }
 0xed8   :  { %2564 = vst.msk [vmem:[#allocation2] sm:$0xff] %vm2563_vm10, %v2549_v5 }
 0xed9   :  { %v2899_v9 = vpop.xlane.xlu1 %2898 }
 0xeda   :  { %4727 = vrcp.f32 %v2899_v9 }
 0xedf   :  { %v2551_v4 = vpop.permute.xlu0 %2550 }
 0xee0   :  { %v4728_v34 = vpop.eup %4727  ;;  %2565 = vst.msk [vmem:[#allocation2 + $0x8] sm:$0xff] %vm2563_vm10, %v2551_v4 }
 0xee1   :  { %v2917_v41 = vmul.f32 %v4728_v34, %v4716_v37 }
 0xee3   :  { %v2923_v7 = vpack.c.bf16 %v2917_v41, %v2917_v41 }
 0xee5   :  { %v2908_v60 = vpop.xlane.xlu2 %2907  ;;  %v2932_v2 = vunpack.c.l.b16 %v2923_v7 }
 0xee6   :  { %4729 = vrcp.f32 %v2908_v60 }
 0xee7   :  { %v2934_v27 = vpack.c.b16 %v2932_v2, %v2932_v2 }
 0xee9   :  { %4521 = vmatmul.msk.bf16.gmra.mxu0 %vm1196_vm5, %v2934_v27 }
 0xeec   :  { %v4730_v51 = vpop.eup %4729 }
 0xeed   :  { %v1998_v32 = vpop.permute.xlu2 %1997  ;;  %v2920_v25 = vmul.f32 %v4730_v51, %v4718_v43 }
 0xeee   :  { %2011 = vst.msk [vmem:[#allocation2 + $0x10] sm:$0xff] %vm2008_vm9, %v1998_v32 }
 0xeef   :  { %v2926_v28 = vpack.c.bf16 %v2920_v25, %v2920_v25 }
 0xef1   :  { %v2980_v22 = vunpack.c.l.b16 %v2926_v28 }
 0xef3   :  { %v2982_v1 = vpack.c.b16 %v2980_v22, %v2980_v22 }
 0xef5   :  { %4523 = vmatmul.msk.bf16.gmra.mxu3 %vm1196_vm5, %v2982_v1  ;;  %v6404_v1 = vld [vmem:[%s7090_s6] ss:$0 sm:$0xff] }
 0xf35   :  { %v2966_v38 = vpop.f32.mrf.mxu0 }
 0xf36   :  { %v3029_v10 = vrot.slane %v2966_v38, 1  ;;  %v3030_v58 = vrot.slane %v2966_v38, 2  ;;  %v3031_v16 = vrot.slane %v2966_v38, 3  ;;  %3057 = vst [vmem:[#allocation1] ss:$9 sm:$0xff] %v2966_v38  ;;  %v3032_v44 = vrot.slane %v2966_v38, 4 }
 0xf37   :  { %v3033_v0 = vrot.slane %v2966_v38, 5  ;;  %v3034_v30 = vrot.slane %v2966_v38, 6  ;;  %v3035_v21 = vrot.slane %v2966_v38, 7  ;;  %v6407_v38 = vrot.slane %v6404_v1, 1 }
 0xf38   :  { %3059 = vst [vmem:[#allocation1 + $0x1] ss:$9 sm:$0xff] %v3029_v10  ;;  %v6410_v10 = vrot.slane %v6404_v1, 2 }
 0xf39   :  { %3061 = vst [vmem:[#allocation1 + $0x2] ss:$9 sm:$0xff] %v3030_v58 }
 0xf3a   :  { %3063 = vst [vmem:[#allocation1 + $0x3] ss:$9 sm:$0xff] %v3031_v16  ;;  %v6413_v16 = vrot.slane %v6404_v1, 3 }
 0xf3b   :  { %3065 = vst [vmem:[#allocation1 + $0x4] ss:$9 sm:$0xff] %v3032_v44  ;;  %v6416_v44 = vrot.slane %v6404_v1, 4 }
 0xf3c   :  { %3067 = vst [vmem:[#allocation1 + $0x5] ss:$9 sm:$0xff] %v3033_v0  ;;  %v6419_v0 = vrot.slane %v6404_v1, 5 }
 0xf3d   :  { %3069 = vst [vmem:[#allocation1 + $0x6] ss:$9 sm:$0xff] %v3034_v30  ;;  %v2968_v35 = vpop.f32.mrf.mxu0  ;;  %v6422_v30 = vrot.slane %v6404_v1, 6 }
 0xf3e   :  { %3071 = vst [vmem:[#allocation1 + $0x7] ss:$9 sm:$0xff] %v3035_v21  ;;  %v3036_v56 = vrot.slane %v2968_v35, 1  ;;  %v3037_v46 = vrot.slane %v2968_v35, 2  ;;  %v3038_v37 = vrot.slane %v2968_v35, 3  ;;  %v3039_v47 = vrot.slane %v2968_v35, 4 }
 0xf3f   :  { %v3040_v48 = vrot.slane %v2968_v35, 5  ;;  %v3041_v43 = vrot.slane %v2968_v35, 6  ;;  %v3042_v57 = vrot.slane %v2968_v35, 7 }
 0xf45   :  { %v3072_v45 = vld [vmem:[#allocation1] sm:$0xff] }
 0xf46   :  { %3073 = vst [vmem:[#allocation1] ss:$9 sm:$0xff] %v2968_v35  ;;  %3103 = vrot.lane.b32.xlu1 %v3072_v45, %s4776_s20  ;;  %v3014_v53 = vpop.f32.mrf.mxu3 }
 0xf47   :  { %3074 = vst [vmem:[#allocation1 + $0x1] ss:$9 sm:$0xff] %v3036_v56  ;;  %v3043_v54 = vrot.slane %v3014_v53, 1  ;;  %v3044_v17 = vrot.slane %v3014_v53, 2  ;;  %v3045_v15 = vrot.slane %v3014_v53, 3  ;;  %v3046_v20 = vrot.slane %v3014_v53, 4 }
 0xf48   :  { %3075 = vst [vmem:[#allocation1 + $0x2] ss:$9 sm:$0xff] %v3037_v46  ;;  %v3047_v23 = vrot.slane %v3014_v53, 5  ;;  %v3048_v36 = vrot.slane %v3014_v53, 6  ;;  %v3049_v19 = vrot.slane %v3014_v53, 7 }
 0xf49   :  { %3076 = vst [vmem:[#allocation1 + $0x3] ss:$9 sm:$0xff] %v3038_v37 }
 0xf4a   :  { %3077 = vst [vmem:[#allocation1 + $0x4] ss:$9 sm:$0xff] %v3039_v47 }
 0xf4b   :  { %3078 = vst [vmem:[#allocation1 + $0x5] ss:$9 sm:$0xff] %v3040_v48  ;;  %v7435_v48 = vld [vmem:[#allocation3_spill] sm:$0xff] }
 0xf4c   :  { %3079 = vst [vmem:[#allocation1 + $0x6] ss:$9 sm:$0xff] %v3041_v43 }
 0xf4d   :  { %3080 = vst [vmem:[#allocation1 + $0x7] ss:$9 sm:$0xff] %v3042_v57  ;;  %v7436_v57 = vld [vmem:[#allocation4_spill] sm:$0xff] }
 0xf4e   :  { %2554 = vrot.lane.b32.xlu1 %v6155_v42, %s4775_s0  ;;  %v7434_v42 = vld [vmem:[#allocation75_spill] sm:$0xff]  ;;  %v3016_v50 = vpop.f32.mrf.mxu3 }
 0xf4f   :  { %v3050_v52 = vrot.slane %v3016_v50, 1  ;;  %v3051_v63 = vrot.slane %v3016_v50, 2  ;;  %v3052_v61 = vrot.slane %v3016_v50, 3  ;;  %v3053_v62 = vrot.slane %v3016_v50, 4 }
 0xf50   :  { %v3054_v13 = vrot.slane %v3016_v50, 5  ;;  %v3055_v59 = vrot.slane %v3016_v50, 6  ;;  %v3056_v31 = vrot.slane %v3016_v50, 7 }
 0xf54   :  { %v3081_v33 = vld [vmem:[#allocation1] sm:$0xff] }
 0xf55   :  { %3083 = vst [vmem:[#allocation1 + $0x1] ss:$9 sm:$0xff] %v3014_v53  ;;  %3105 = vrot.lane.b32.xlu0 %v3081_v33, %s4776_s20  ;;  %v7438_v33 = vld [vmem:[#allocation6_spill] sm:$0xff] }
 0xf56   :  { %3084 = vst [vmem:[#allocation1 + $0x2] ss:$9 sm:$0xff] %v3043_v54  ;;  %2001 = vrot.lane.b32.xlu1 %v7433_v26, %s4774_s19  ;;  %v7437_v54 = vld [vmem:[#allocation5_spill] sm:$0xff]  ;;  %v7440_v26 = vld [vmem:[#allocation8_spill] sm:$0xff] }
 0xf57   :  { %3085 = vst [vmem:[#allocation1 + $0x3] ss:$9 sm:$0xff] %v3044_v17 }
 0xf58   :  { %3086 = vst [vmem:[#allocation1 + $0x4] ss:$9 sm:$0xff] %v3045_v15 }
 0xf59   :  { %3087 = vst [vmem:[#allocation1 + $0x5] ss:$9 sm:$0xff] %v3046_v20  ;;  %v7439_v20 = vld [vmem:[#allocation7_spill] sm:$0xff] }
 0xf5a   :  { %3088 = vst [vmem:[#allocation1 + $0x6] ss:$9 sm:$0xff] %v3047_v23 }
 0xf5b   :  { %3089 = vst [vmem:[#allocation1 + $0x7] ss:$9 sm:$0xff] %v3048_v36 }
 0xf5d   :  { %1999 = vrot.lane.b32.xlu0 %v7434_v42, %s4774_s19  ;;  %v7441_v42 = vld [vmem:[#allocation9_spill] sm:$0xff] }
 0xf65   :  { %2552 = vrot.lane.b32.xlu0 %v6153_v14, %s4775_s0 }
 0xf66   :  { %v2971_v55 = vpop.f32.mrf.mxu0 }
 0xf67   :  { %3082 = vst [vmem:[#allocation1] ss:$9 sm:$0xff] %v2971_v55 }
 0xf6e   :  { %v3090_v49 = vld [vmem:[#allocation1] sm:$0xff]  ;;  %v2973_v40 = vpop.f32.mrf.mxu0 }
 0xf6f   :  { %3091 = vst [vmem:[#allocation1] ss:$9 sm:$0xff] %v3049_v19  ;;  %3107 = vrot.lane.b32.xlu0 %v3090_v49, %s4776_s20  ;;  %v7443_v49 = vld [vmem:[#allocation10_spill] sm:$0xff] }
 0xf70   :  { %3092 = vst [vmem:[#allocation1 + $0x1] ss:$9 sm:$0xff] %v3016_v50  ;;  %v6432_v50 = vrot.slane %v6404_v1, 7 }
 0xf71   :  { %3093 = vst [vmem:[#allocation1 + $0x2] ss:$9 sm:$0xff] %v3050_v52 }
 0xf72   :  { %3094 = vst [vmem:[#allocation1 + $0x3] ss:$9 sm:$0xff] %v3051_v63 }
 0xf73   :  { %3095 = vst [vmem:[#allocation1 + $0x4] ss:$9 sm:$0xff] %v3052_v61 }
 0xf74   :  { %3096 = vst [vmem:[#allocation1 + $0x5] ss:$9 sm:$0xff] %v3053_v62 }
 0xf75   :  { %3097 = vst [vmem:[#allocation1 + $0x6] ss:$9 sm:$0xff] %v3054_v13 }
 0xf76   :  { %3098 = vst [vmem:[#allocation1 + $0x7] ss:$9 sm:$0xff] %v3055_v59 }
 0xf77   :  { %2556 = vrot.lane.b32.xlu0 %v6157_v3, %s4775_s0  ;;  %v4585_v3 = vld [vmem:[%s7091_s5] sm:$0xff] }
 0xf78   :  { %v3019_v14 = vpop.f32.mrf.mxu3  ;;  %3165 = vmatpush.bf16.msra.mxu1 %v4585_v3 }
 0xf7d   :  { %v3099_v11 = vld [vmem:[#allocation1] sm:$0xff] }
 0xf7e   :  { %3109 = vrot.lane.b32.xlu2 %v3099_v11, %s4776_s20  ;;  %3100 = vst [vmem:[#allocation1] ss:$9 sm:$0xff] %v3056_v31 }
 0xf7f   :  { %3101 = vst [vmem:[#allocation1 + $0x1] ss:$9 sm:$0xff] %v3019_v14 }
 0xf80   :  { %v3021_v39 = vpop.f32.mrf.mxu3 }
 0xf86   :  { %v3102_v29 = vld [vmem:[#allocation1] sm:$0xff] }
 0xf87   :  { %3111 = vrot.lane.b32.xlu2 %v3102_v29, %s4776_s20 }
 0xfb8   :  { %v3104_v12 = vpop.permute.xlu1 %3103 }
 0xfb9   :  { %3119 = vst.msk [vmem:[#allocation2] sm:$0xff] %vm3118_vm11, %v3104_v12  ;;  %v7451_v12 = vld [vmem:[#allocation12_spill] sm:$0xff] }
 0xfc0   :  { %v2555_v24 = vpop.permute.xlu1 %2554  ;;  %v3125_v9 = vld [vmem:[#allocation2] sm:$0xff] }
 0xfc7   :  { %v3106_v6 = vpop.permute.xlu0 %3105 }
 0xfc8   :  { %3120 = vst.msk [vmem:[#allocation2 + $0x8] sm:$0xff] %vm3118_vm11, %v3106_v6  ;;  %v2002_v18 = vpop.permute.xlu1 %2001 }
 0xfc9   :  { %2014 = vst.msk [vmem:[#allocation2 + $0x20] sm:$0x3] %vm2013_vm12, %v2002_v18  ;;  %v7452_v18 = vld [vmem:[#allocation11_spill] sm:$0xff] }
 0xfcf   :  { %v2000_v5 = vpop.permute.xlu0 %1999  ;;  %v3126_v4 = vld [vmem:[#allocation2 + $0x8] sm:$0xff] }
 0xfd0   :  { %2012 = vst.msk [vmem:[#allocation2 + $0x18] sm:$0xff] %vm2008_vm9, %v2000_v5  ;;  %v3130_v34 = vpack.c.bf16 %v3126_v4, %v3125_v9  ;;  %v7453_v9 = vld [vmem:[#allocation13_spill] sm:$0xff] }
 0xfd1   :  { %2567 = vst.msk [vmem:[#allocation2 + $0x18] sm:$0xff] %vm2563_vm10, %v2555_v24 }
 0xfd2   :  { %4532 = vmatmul.msk.bf16.vlgmr.msra.gmra.mxu1 %vm164_vm0, %v3130_v34 }
 0xfd7   :  { %v2553_v41 = vpop.permute.xlu0 %2552 }
 0xfd8   :  { %2566 = vst.msk [vmem:[#allocation2 + $0x10] sm:$0xff] %vm2563_vm10, %v2553_v41  ;;  %v3110_v7 = vpop.permute.xlu2 %3109  ;;  %v7454_v41 = vld [vmem:[#allocation14_spill] sm:$0xff] }
 0xfd9   :  { %3122 = vst.msk [vmem:[#allocation2 + $0x18] sm:$0xff] %vm3118_vm11, %v3110_v7 }
 0xfe0   :  { %v3128_v51 = vld [vmem:[#allocation2 + $0x18] sm:$0xff] }
 0xfe1   :  { %v3108_v60 = vpop.permute.xlu0 %3107  ;;  %v3112_v32 = vpop.permute.xlu2 %3111 }
 0xfe2   :  { %3121 = vst.msk [vmem:[#allocation2 + $0x10] sm:$0xff] %vm3118_vm11, %v3108_v60  ;;  %v7455_v60 = vld [vmem:[#allocation15_spill] sm:$0xff] }
 0xfe9   :  { %v2557_v2 = vpop.permute.xlu0 %2556  ;;  %v3127_v27 = vld [vmem:[#allocation2 + $0x10] sm:$0xff] }
 0xfea   :  { %2569 = vst.msk [vmem:[#allocation2 + $0x20] sm:$0x3] %vm2568_vm13, %v2557_v2  ;;  %v3131_v25 = vpack.c.bf16 %v3128_v51, %v3127_v27  ;;  %v7456_v27 = vld [vmem:[#allocation16_spill] sm:$0xff] }
 0xfeb   :  { %3124 = vst.msk [vmem:[#allocation2 + $0x20] sm:$0x3] %vm3123_vm14, %v3112_v32 }
 0xfec   :  { %4533 = vmatmul.msk.bf16.gmra.mxu1 %vm164_vm0, %v3131_v25  ;;  %v7458_v25 = vld [vmem:[#allocation17_spill] sm:$0xff] }
 0xff2   :  { %v3129_v28 = vld [vmem:[#allocation2 + $0x20] sm:$0x3] }
 0xff3   :  { %v3132_v22 = vpack.c.bf16 %v3129_v28, %v3129_v28 }
 0xffc   :  { %4534 = vmatmul.msk.bf16.gmra.mxu1 %vm164_vm0, %v3132_v22 }
0x104f   :  { %v3167_v58 = vpop.f32.mrf.mxu1 }
0x1050   :  { %v3186_v21 = vrot.slane %v3167_v58, 1  ;;  %v3187_v35 = vrot.slane %v3167_v58, 2  ;;  %v3188_v56 = vrot.slane %v3167_v58, 3  ;;  %v3189_v46 = vrot.slane %v3167_v58, 4 }
0x1051   :  { %v3190_v45 = vrot.slane %v3167_v58, 5  ;;  %v3191_v37 = vrot.slane %v3167_v58, 6  ;;  %v3192_v47 = vrot.slane %v3167_v58, 7  ;;  %v3244_v43 = vadd.f32 %v3167_v58, %v7435_v48 }
0x1052   :  { %v3245_v53 = vadd.f32 %v3186_v21, %v7436_v57  ;;  %v3246_v17 = vadd.f32 %v3187_v35, %v7437_v54  ;;  %v3247_v15 = vadd.f32 %v3188_v56, %v7438_v33  ;;  %v3248_v23 = vadd.f32 %v3189_v46, %v7439_v20  ;;  %v7461_v21 = vld [vmem:[#allocation18_spill] sm:$0xff] }
0x1053   :  { %v3249_v36 = vadd.f32 %v3190_v45, %v7440_v26  ;;  %v3250_v55 = vadd.f32 %v3191_v37, %v7441_v42  ;;  %v6435_v19 = vadd.f32 %v6404_v1, %v3244_v43  ;;  %v3251_v40 = vadd.f32 %v3192_v47, %v7443_v49  ;;  %v7468_v26 = vld [vmem:[#allocation19_spill] sm:$0xff] }
0x1054   :  { %v6439_v52 = vadd.f32 %v6407_v38, %v3245_v53  ;;  %v6442_v63 = vadd.f32 %v6410_v10, %v3246_v17  ;;  %v6445_v61 = vadd.f32 %v6413_v16, %v3247_v15  ;;  %v6448_v62 = vadd.f32 %v6416_v44, %v3248_v23  ;;  %v7467_v15 = vld [vmem:[#allocation20_spill] sm:$0xff] }
0x1055   :  { %7442 = vst [vmem:[#allocation64_spill] sm:$0xff] %v6435_v19  ;;  %v6452_v13 = vadd.f32 %v6419_v0, %v3249_v36  ;;  %v6456_v59 = vadd.f32 %v6422_v30, %v3250_v55  ;;  %v6460_v31 = vadd.f32 %v6432_v50, %v3251_v40  ;;  %v7469_v55 = vld [vmem:[#allocation21_spill] sm:$0xff] }
0x1056   :  { %7444 = vst [vmem:[#allocation65_spill] sm:$0xff] %v6439_v52 }
0x1057   :  { %7445 = vst [vmem:[#allocation66_spill] sm:$0xff] %v6442_v63  ;;  %v3169_v14 = vpop.f32.mrf.mxu1 }
0x1058   :  { %7446 = vst [vmem:[#allocation67_spill] sm:$0xff] %v6445_v61  ;;  %v3193_v11 = vrot.slane %v3169_v14, 1  ;;  %v3194_v39 = vrot.slane %v3169_v14, 2  ;;  %v3195_v29 = vrot.slane %v3169_v14, 3  ;;  %v3196_v8 = vrot.slane %v3169_v14, 4 }
0x1059   :  { %7447 = vst [vmem:[#allocation68_spill] sm:$0xff] %v6448_v62  ;;  %v3197_v3 = vrot.slane %v3169_v14, 5  ;;  %v3198_v6 = vrot.slane %v3169_v14, 6  ;;  %v3252_v5 = vadd.f32 %v3169_v14, %v7452_v18  ;;  %v3199_v34 = vrot.slane %v3169_v14, 7  ;;  %v7470_v14 = vld [vmem:[#allocation22_spill] sm:$0xff] }
0x105a   :  { %3364 = vst [vmem:[#allocation1] ss:$9 sm:$0xff] %v6435_v19  ;;  %v3253_v24 = vadd.f32 %v3193_v11, %v7451_v12  ;;  %v3254_v4 = vadd.f32 %v3194_v39, %v7453_v9  ;;  %v3255_v7 = vadd.f32 %v3195_v29, %v7454_v41  ;;  %v3256_v2 = vadd.f32 %v3196_v8, %v7455_v60  ;;  %v7471_v39 = vld [vmem:[#allocation23_spill] sm:$0xff] }
0x105b   :  { %7448 = vst [vmem:[#allocation38_spill] sm:$0xff] %v6452_v13  ;;  %v3257_v51 = vadd.f32 %v3197_v3, %v7456_v27  ;;  %v3258_v28 = vadd.f32 %v3198_v6, %v7458_v25  ;;  %v6478_v22 = vadd.f32 %v6404_v1, %v3252_v5  ;;  %v3259_v35 = vadd.f32 %v3199_v34, %v7461_v21  ;;  %v7473_v3 = vld [vmem:[#allocation24_spill] sm:$0xff]  ;;  %v7475_v6 = vld [vmem:[#allocation25_spill] sm:$0xff]  ;;  %v7477_v34 = vld [vmem:[#allocation26_spill] sm:$0xff] }
0x105c   :  { %3366 = vst [vmem:[#allocation1 + $0x1] ss:$9 sm:$0xff] %v6439_v52  ;;  %v6474_v32 = vadd.f32 %v6407_v38, %v3253_v24  ;;  %v6481_v58 = vadd.f32 %v6410_v10, %v3254_v4  ;;  %v6485_v56 = vadd.f32 %v6413_v16, %v3255_v7  ;;  %v6488_v45 = vadd.f32 %v6416_v44, %v3256_v2 }
0x105d   :  { %7449 = vst [vmem:[#allocation39_spill] sm:$0xff] %v6456_v59  ;;  %v6493_v47 = vadd.f32 %v6419_v0, %v3257_v51  ;;  %v6497_v48 = vadd.f32 %v6422_v30, %v3258_v28  ;;  %v6501_v43 = vadd.f32 %v6432_v50, %v3259_v35 }
0x105e   :  { %3368 = vst [vmem:[#allocation1 + $0x2] ss:$9 sm:$0xff] %v6442_v63 }
0x105f   :  { %7450 = vst [vmem:[#allocation40_spill] sm:$0xff] %v6460_v31 }
0x1060   :  { %3370 = vst [vmem:[#allocation1 + $0x3] ss:$9 sm:$0xff] %v6445_v61 }
0x1061   :  { %3372 = vst [vmem:[#allocation1 + $0x4] ss:$9 sm:$0xff] %v6448_v62 }
0x1062   :  { %3374 = vst [vmem:[#allocation1 + $0x5] ss:$9 sm:$0xff] %v6452_v13 }
0x1063   :  { %3376 = vst [vmem:[#allocation1 + $0x6] ss:$9 sm:$0xff] %v6456_v59 }
0x1064   :  { %3378 = vst [vmem:[#allocation1 + $0x7] ss:$9 sm:$0xff] %v6460_v31 }
0x1065   :  { %7457 = vst [vmem:[#allocation41_spill] sm:$0xff] %v6474_v32 }
0x1066   :  { %7459 = vst [vmem:[#allocation42_spill] sm:$0xff] %v6478_v22 }
0x1067   :  { %7460 = vst [vmem:[#allocation43_spill] sm:$0xff] %v6481_v58 }
0x1068   :  { %7462 = vst [vmem:[#allocation44_spill] sm:$0xff] %v6485_v56 }
0x1069   :  { %7463 = vst [vmem:[#allocation45_spill] sm:$0xff] %v6488_v45  ;;  %v3172_v57 = vpop.f32.mrf.mxu1 }
0x106a   :  { %7464 = vst [vmem:[#allocation46_spill] sm:$0xff] %v6493_v47  ;;  %v3200_v53 = vrot.slane %v3172_v57, 1  ;;  %v3201_v54 = vrot.slane %v3172_v57, 2  ;;  %v3202_v17 = vrot.slane %v3172_v57, 3  ;;  %v3203_v33 = vrot.slane %v3172_v57, 4 }
0x106b   :  { %v3379_v46 = vld [vmem:[#allocation1] sm:$0xff]  ;;  %7465 = vst [vmem:[#allocation47_spill] sm:$0xff] %v6497_v48  ;;  %v3260_v20 = vadd.f32 %v3172_v57, %v7467_v15  ;;  %v3204_v23 = vrot.slane %v3172_v57, 5  ;;  %v3205_v42 = vrot.slane %v3172_v57, 6  ;;  %v3206_v40 = vrot.slane %v3172_v57, 7 }
0x106c   :  { %v3415_v37 = vsel %vm164_vm0, %v3379_v46, 0.0  ;;  %3380 = vst [vmem:[#allocation1] ss:$9 sm:$0xff] %v6478_v22  ;;  %v3261_v36 = vadd.f32 %v3200_v53, %v7468_v26  ;;  %v3262_v49 = vadd.f32 %v3201_v54, %v7469_v55  ;;  %v3263_v11 = vadd.f32 %v3202_v17, %v7470_v14  ;;  %v7483_v53 = vld [vmem:[#allocation27_spill] sm:$0xff] }
0x106d   :  { %3416 = vadd.xlane.f32.xlu1 %v3415_v37  ;;  %3381 = vst [vmem:[#allocation1 + $0x1] ss:$9 sm:$0xff] %v6474_v32  ;;  %v3264_v29 = vadd.f32 %v3203_v33, %v7471_v39  ;;  %v6514_v8 = vadd.f32 %v6404_v1, %v3260_v20  ;;  %v3265_v12 = vadd.f32 %v3204_v23, %v7473_v3  ;;  %v7484_v33 = vld [vmem:[#allocation28_spill] sm:$0xff]  ;;  %v7485_v20 = vld [vmem:[#allocation29_spill] sm:$0xff]  ;;  %v7487_v55 = vld [vmem:[#allocation31_spill] sm:$0xff] }
0x106e   :  { %3382 = vst [vmem:[#allocation1 + $0x2] ss:$9 sm:$0xff] %v6481_v58  ;;  %v6518_v24 = vadd.f32 %v6407_v38, %v3261_v36  ;;  %v3266_v18 = vadd.f32 %v3205_v42, %v7475_v6  ;;  %v6522_v5 = vadd.f32 %v6410_v10, %v3262_v49  ;;  %v3267_v41 = vadd.f32 %v3206_v40, %v7477_v34  ;;  %v7486_v36 = vld [vmem:[#allocation30_spill] sm:$0xff]  ;;  %v7488_v40 = vld [vmem:[#allocation32_spill] sm:$0xff]  ;;  %v7490_v39 = vld [vmem:[#allocation33_spill] sm:$0xff] }
0x106f   :  { %7466 = vst [vmem:[#allocation48_spill] sm:$0xff] %v6501_v43  ;;  %v6526_v7 = vadd.f32 %v6413_v16, %v3263_v11  ;;  %v6530_v2 = vadd.f32 %v6416_v44, %v3264_v29  ;;  %v6534_v27 = vadd.f32 %v6419_v0, %v3265_v12  ;;  %v7493_v6 = vld [vmem:[#allocation34_spill] sm:$0xff] }
0x1070   :  { %3383 = vst [vmem:[#allocation1 + $0x3] ss:$9 sm:$0xff] %v6485_v56  ;;  %v6538_v51 = vadd.f32 %v6422_v30, %v3266_v18  ;;  %v6542_v25 = vadd.f32 %v6432_v50, %v3267_v41 }
0x1071   :  { %3384 = vst [vmem:[#allocation1 + $0x4] ss:$9 sm:$0xff] %v6488_v45  ;;  %v3174_v9 = vpop.f32.mrf.mxu1 }
0x1072   :  { %3385 = vst [vmem:[#allocation1 + $0x5] ss:$9 sm:$0xff] %v6493_v47  ;;  %v3207_v28 = vrot.slane %v3174_v9, 1  ;;  %v3208_v21 = vrot.slane %v3174_v9, 2  ;;  %v3209_v35 = vrot.slane %v3174_v9, 3  ;;  %v3210_v37 = vrot.slane %v3174_v9, 4 }
0x1073   :  { %3386 = vst [vmem:[#allocation1 + $0x6] ss:$9 sm:$0xff] %v6497_v48  ;;  %v3211_v57 = vrot.slane %v3174_v9, 5  ;;  %v3212_v17 = vrot.slane %v3174_v9, 6  ;;  %v3268_v15 = vadd.f32 %v3174_v9, %v7484_v33  ;;  %v3213_v26 = vrot.slane %v3174_v9, 7 }
0x1074   :  { %3387 = vst [vmem:[#allocation1 + $0x7] ss:$9 sm:$0xff] %v6501_v43  ;;  %v3269_v54 = vadd.f32 %v3207_v28, %v7483_v53  ;;  %v3270_v23 = vadd.f32 %v3208_v21, %v7485_v20  ;;  %v3271_v42 = vadd.f32 %v3209_v35, %v7486_v36  ;;  %v3272_v49 = vadd.f32 %v3210_v37, %v7487_v55 }
0x1075   :  { %7472 = vst [vmem:[#allocation49_spill] sm:$0xff] %v6514_v8  ;;  %v3273_v14 = vadd.f32 %v3211_v57, %v7488_v40  ;;  %v3274_v29 = vadd.f32 %v3212_v17, %v7490_v39  ;;  %v6560_v3 = vadd.f32 %v6404_v1, %v3268_v15  ;;  %v3275_v18 = vadd.f32 %v3213_v26, %v7493_v6 }
0x1076   :  { %7474 = vst [vmem:[#allocation50_spill] sm:$0xff] %v6518_v24  ;;  %v6556_v11 = vadd.f32 %v6407_v38, %v3269_v54  ;;  %v6563_v12 = vadd.f32 %v6410_v10, %v3270_v23  ;;  %v6567_v9 = vadd.f32 %v6413_v16, %v3271_v42  ;;  %v6570_v41 = vadd.f32 %v6416_v44, %v3272_v49 }
0x1077   :  { %7476 = vst [vmem:[#allocation51_spill] sm:$0xff] %v6522_v5  ;;  %v6575_v28 = vadd.f32 %v6419_v0, %v3273_v14  ;;  %v6579_v10 = vadd.f32 %v6422_v30, %v3274_v29  ;;  %v6583_v16 = vadd.f32 %v6432_v50, %v3275_v18  ;;  %v7499_v0 = vld [vmem:[#allocation36_spill] sm:$0xff]  ;;  %v7500_v30 = vld [vmem:[#allocation35_spill] sm:$0xff] }
0x1078   :  { %7478 = vst [vmem:[#allocation52_spill] sm:$0xff] %v6526_v7 }
0x1079   :  { %7479 = vst [vmem:[#allocation53_spill] sm:$0xff] %v6530_v2  ;;  %v3177_v46 = vpop.f32.mrf.mxu1 }
0x107a   :  { %7480 = vst [vmem:[#allocation54_spill] sm:$0xff] %v6534_v27  ;;  %v3214_v44 = vrot.slane %v3177_v46, 1  ;;  %v3276_v35 = vadd.f32 %v3177_v46, %v7500_v30  ;;  %v7503_v46 = vld [vmem:[#allocation37_spill] sm:$0xff] }
0x107b   :  { %v3388_v4 = vld [vmem:[#allocation1] sm:$0xff]  ;;  %7481 = vst [vmem:[#allocation55_spill] sm:$0xff] %v6538_v51 }
0x107c   :  { %v3418_v60 = vsel %vm164_vm0, %v3388_v4, 0.0  ;;  %3389 = vst [vmem:[#allocation1] ss:$9 sm:$0xff] %v6514_v8  ;;  %v3277_v21 = vadd.f32 %v3214_v44, %v7499_v0  ;;  %v6596_v50 = vadd.f32 %v6404_v1, %v3276_v35 }
0x107d   :  { %3419 = vadd.xlane.f32.xlu0 %v3418_v60  ;;  %3390 = vst [vmem:[#allocation1 + $0x1] ss:$9 sm:$0xff] %v6518_v24 }
0x107e   :  { %3391 = vst [vmem:[#allocation1 + $0x2] ss:$9 sm:$0xff] %v6522_v5  ;;  %v6593_v37 = vadd.f32 %v6407_v38, %v3277_v21 }
0x107f   :  { %7482 = vst [vmem:[#allocation56_spill] sm:$0xff] %v6542_v25 }
0x1080   :  { %3392 = vst [vmem:[#allocation1 + $0x3] ss:$9 sm:$0xff] %v6526_v7 }
0x1081   :  { %3393 = vst [vmem:[#allocation1 + $0x4] ss:$9 sm:$0xff] %v6530_v2  ;;  %v3179_v34 = vpop.f32.mrf.mxu1 }
0x1082   :  { %3394 = vst [vmem:[#allocation1 + $0x5] ss:$9 sm:$0xff] %v6534_v27 }
0x1083   :  { %3395 = vst [vmem:[#allocation1 + $0x6] ss:$9 sm:$0xff] %v6538_v51 }
0x1084   :  { %3396 = vst [vmem:[#allocation1 + $0x7] ss:$9 sm:$0xff] %v6542_v25 }
0x1085   :  { %7489 = vst [vmem:[#allocation57_spill] sm:$0xff] %v6556_v11 }
0x1086   :  { %7491 = vst [vmem:[#allocation59_spill] sm:$0xff] %v6560_v3 }
0x1087   :  { %7492 = vst [vmem:[#allocation60_spill] sm:$0xff] %v6563_v12 }
0x1088   :  { %7494 = vst [vmem:[#allocation61_spill] sm:$0xff] %v6567_v9 }
0x1089   :  { %7495 = vst [vmem:[#allocation62_spill] sm:$0xff] %v6570_v41 }
0x108a   :  { %7496 = vst [vmem:[#allocation63_spill] sm:$0xff] %v6575_v28 }
0x108b   :  { %v3397_v4 = vld [vmem:[#allocation1] sm:$0xff]  ;;  %7497 = vst [vmem:[#allocation69_spill] sm:$0xff] %v6579_v10 }
0x108c   :  { %v3421_v60 = vsel %vm164_vm0, %v3397_v4, 0.0  ;;  %3398 = vst [vmem:[#allocation1] ss:$9 sm:$0xff] %v6560_v3 }
0x108d   :  { %3422 = vadd.xlane.f32.xlu2 %v3421_v60  ;;  %3399 = vst [vmem:[#allocation1 + $0x1] ss:$9 sm:$0xff] %v6556_v11 }
0x108e   :  { %3400 = vst [vmem:[#allocation1 + $0x2] ss:$9 sm:$0xff] %v6563_v12 }
0x108f   :  { %7498 = vst [vmem:[#allocation70_spill] sm:$0xff] %v6583_v16 }
0x1090   :  { %3401 = vst [vmem:[#allocation1 + $0x3] ss:$9 sm:$0xff] %v6567_v9 }
0x1091   :  { %3402 = vst [vmem:[#allocation1 + $0x4] ss:$9 sm:$0xff] %v6570_v41 }
0x1092   :  { %3403 = vst [vmem:[#allocation1 + $0x5] ss:$9 sm:$0xff] %v6575_v28 }
0x1093   :  { %3404 = vst [vmem:[#allocation1 + $0x6] ss:$9 sm:$0xff] %v6579_v10 }
0x1094   :  { %3405 = vst [vmem:[#allocation1 + $0x7] ss:$9 sm:$0xff] %v6583_v16 }
0x1095   :  { %7501 = vst [vmem:[#allocation58_spill] sm:$0xff] %v6593_v37 }
0x1096   :  { %7502 = vst [vmem:[#allocation71_spill] sm:$0xff] %v6596_v50 }
0x109b   :  { %v3406_v57 = vld [vmem:[#allocation1] sm:$0xff] }
0x109c   :  { %v3424_v53 = vsel %vm164_vm0, %v3406_v57, 0.0  ;;  %3407 = vst [vmem:[#allocation1] ss:$9 sm:$0xff] %v6596_v50 }
0x109d   :  { %3425 = vadd.xlane.f32.xlu1 %v3424_v53  ;;  %3408 = vst [vmem:[#allocation1 + $0x1] ss:$9 sm:$0xff] %v6593_v37 }
0x10a4   :  { %v3409_v54 = vld [vmem:[#allocation1] sm:$0xff] }
0x10a5   :  { %v3427_v17 = vsel %vm177_vm1, %v3409_v54, 0.0 }
0x10a6   :  { %3428 = vadd.xlane.f32.xlu0 %v3427_v17 }
0x10e0   :  { %v3417_v33 = vpop.xlane.xlu1 %3416 }
0x10e1   :  { %v3430_v15 = vmul.f32 %v3417_v33, %v7503_v46 }
0x10e3   :  { %v3440_v38 = vperm.slane %v3430_v15, 0  ;;  %v3441_v20 = vperm.slane %v3430_v15, 1  ;;  %v3442_v23 = vperm.slane %v3430_v15, 2  ;;  %v3443_v1 = vperm.slane %v3430_v15, 3 }
0x10e4   :  { %v3444_v26 = vperm.slane %v3430_v15, 4  ;;  %v3445_v36 = vperm.slane %v3430_v15, 5  ;;  %v3446_v42 = vperm.slane %v3430_v15, 6  ;;  %v3447_v55 = vperm.slane %v3430_v15, 7 }
0x10e5   :  { %v6604_v49 = vsub.f32 %v6435_v19, %v3440_v38  ;;  %v6607_v40 = vsub.f32 %v6439_v52, %v3441_v20  ;;  %v6610_v14 = vsub.f32 %v6442_v63, %v3442_v23  ;;  %v6613_v39 = vsub.f32 %v6445_v61, %v3443_v1  ;;  %v4587_v63 = vld [vmem:[%s7095_s9] sm:$0xff] }
0x10e6   :  { %v6616_v29 = vsub.f32 %v6448_v62, %v3444_v26  ;;  %v6619_v6 = vsub.f32 %v6452_v13, %v3445_v36  ;;  %v6622_v18 = vsub.f32 %v6456_v59, %v3446_v42  ;;  %v6631_v44 = vsub.f32 %v6460_v31, %v3447_v55 }
0x10e7   :  { %v3542_v4 = vmul.f32 %v6604_v49, %v6604_v49  ;;  %v3543_v34 = vmul.f32 %v6607_v40, %v6607_v40  ;;  %v3544_v60 = vmul.f32 %v6610_v14, %v6610_v14  ;;  %v3545_v0 = vmul.f32 %v6613_v39, %v6613_v39 }
0x10e8   :  { %v3546_v21 = vmul.f32 %v6616_v29, %v6616_v29  ;;  %v3547_v30 = vmul.f32 %v6619_v6, %v6619_v6  ;;  %v3548_v35 = vmul.f32 %v6622_v18, %v6622_v18  ;;  %v3549_v57 = vmul.f32 %v6631_v44, %v6631_v44 }
0x10e9   :  { %3610 = vst [vmem:[#allocation1] ss:$9 sm:$0xff] %v3542_v4 }
0x10ea   :  { %3612 = vst [vmem:[#allocation1 + $0x1] ss:$9 sm:$0xff] %v3543_v34 }
0x10eb   :  { %3614 = vst [vmem:[#allocation1 + $0x2] ss:$9 sm:$0xff] %v3544_v60 }
0x10ec   :  { %3616 = vst [vmem:[#allocation1 + $0x3] ss:$9 sm:$0xff] %v3545_v0 }
0x10ed   :  { %3618 = vst [vmem:[#allocation1 + $0x4] ss:$9 sm:$0xff] %v3546_v21 }
0x10ee   :  { %3620 = vst [vmem:[#allocation1 + $0x5] ss:$9 sm:$0xff] %v3547_v30 }
0x10ef   :  { %3622 = vst [vmem:[#allocation1 + $0x6] ss:$9 sm:$0xff] %v3548_v35 }
0x10f0   :  { %v3420_v53 = vpop.xlane.xlu0 %3419  ;;  %3624 = vst [vmem:[#allocation1 + $0x7] ss:$9 sm:$0xff] %v3549_v57 }
0x10f1   :  { %v3431_v54 = vmul.f32 %v3420_v53, %v7503_v46 }
0x10f3   :  { %v3448_v17 = vperm.slane %v3431_v54, 0  ;;  %v3449_v33 = vperm.slane %v3431_v54, 1  ;;  %v3450_v15 = vperm.slane %v3431_v54, 2  ;;  %v3451_v38 = vperm.slane %v3431_v54, 3 }
0x10f4   :  { %v3452_v20 = vperm.slane %v3431_v54, 4  ;;  %v3453_v23 = vperm.slane %v3431_v54, 5  ;;  %v3454_v1 = vperm.slane %v3431_v54, 6  ;;  %v3455_v26 = vperm.slane %v3431_v54, 7 }
0x10f5   :  { %v6645_v36 = vsub.f32 %v6478_v22, %v3448_v17  ;;  %v6648_v42 = vsub.f32 %v6474_v32, %v3449_v33  ;;  %v6651_v55 = vsub.f32 %v6481_v58, %v3450_v15  ;;  %v6654_v4 = vsub.f32 %v6485_v56, %v3451_v38 }
0x10f6   :  { %v6657_v34 = vsub.f32 %v6488_v45, %v3452_v20  ;;  %v6660_v60 = vsub.f32 %v6493_v47, %v3453_v23  ;;  %v6663_v0 = vsub.f32 %v6497_v48, %v3454_v1  ;;  %v6672_v57 = vsub.f32 %v6501_v43, %v3455_v26 }
0x10f7   :  { %v3550_v21 = vmul.f32 %v6645_v36, %v6645_v36  ;;  %v3551_v30 = vmul.f32 %v6648_v42, %v6648_v42  ;;  %v3552_v35 = vmul.f32 %v6651_v55, %v6651_v55  ;;  %v3553_v53 = vmul.f32 %v6654_v4, %v6654_v4  ;;  %v3625_v54 = vld [vmem:[#allocation1] sm:$0xff] }
0x10f8   :  { %v3554_v17 = vmul.f32 %v6657_v34, %v6657_v34  ;;  %v3661_v33 = vsel %vm164_vm0, %v3625_v54, 0.0  ;;  %v3555_v15 = vmul.f32 %v6660_v60, %v6660_v60  ;;  %v3556_v38 = vmul.f32 %v6663_v0, %v6663_v0 }
0x10f9   :  { %3626 = vst [vmem:[#allocation1] ss:$9 sm:$0xff] %v3550_v21  ;;  %3662 = vadd.xlane.f32.xlu2 %v3661_v33  ;;  %v3557_v20 = vmul.f32 %v6672_v57, %v6672_v57 }
0x10fa   :  { %3627 = vst [vmem:[#allocation1 + $0x1] ss:$9 sm:$0xff] %v3551_v30 }
0x10fb   :  { %3628 = vst [vmem:[#allocation1 + $0x2] ss:$9 sm:$0xff] %v3552_v35 }
0x10fc   :  { %3629 = vst [vmem:[#allocation1 + $0x3] ss:$9 sm:$0xff] %v3553_v53 }
0x10fd   :  { %3630 = vst [vmem:[#allocation1 + $0x4] ss:$9 sm:$0xff] %v3554_v17 }
0x10fe   :  { %3631 = vst [vmem:[#allocation1 + $0x5] ss:$9 sm:$0xff] %v3555_v15 }
0x10ff   :  { %3632 = vst [vmem:[#allocation1 + $0x6] ss:$9 sm:$0xff] %v3556_v38 }
0x1100   :  { %v3423_v23 = vpop.xlane.xlu2 %3422  ;;  %3633 = vst [vmem:[#allocation1 + $0x7] ss:$9 sm:$0xff] %v3557_v20 }
0x1101   :  { %v3432_v1 = vmul.f32 %v3423_v23, %v7503_v46 }
0x1103   :  { %v3456_v26 = vperm.slane %v3432_v1, 0  ;;  %v3457_v21 = vperm.slane %v3432_v1, 1  ;;  %v3458_v54 = vperm.slane %v3432_v1, 2  ;;  %v3459_v33 = vperm.slane %v3432_v1, 3 }
0x1104   :  { %v3460_v30 = vperm.slane %v3432_v1, 4  ;;  %v3461_v43 = vperm.slane %v3432_v1, 5  ;;  %v3462_v48 = vperm.slane %v3432_v1, 6  ;;  %v3463_v47 = vperm.slane %v3432_v1, 7 }
0x1105   :  { %v6687_v35 = vsub.f32 %v6514_v8, %v3456_v26  ;;  %v6690_v53 = vsub.f32 %v6518_v24, %v3457_v21  ;;  %v6693_v17 = vsub.f32 %v6522_v5, %v3458_v54  ;;  %v6696_v15 = vsub.f32 %v6526_v7, %v3459_v33 }
0x1106   :  { %v6699_v38 = vsub.f32 %v6530_v2, %v3460_v30  ;;  %v6702_v20 = vsub.f32 %v6534_v27, %v3461_v43  ;;  %v6705_v23 = vsub.f32 %v6538_v51, %v3462_v48  ;;  %v6714_v33 = vsub.f32 %v6542_v25, %v3463_v47 }
0x1107   :  { %v3558_v1 = vmul.f32 %v6687_v35, %v6687_v35  ;;  %v3559_v26 = vmul.f32 %v6690_v53, %v6690_v53  ;;  %v3560_v21 = vmul.f32 %v6693_v17, %v6693_v17  ;;  %v3634_v54 = vld [vmem:[#allocation1] sm:$0xff]  ;;  %v3561_v43 = vmul.f32 %v6696_v15, %v6696_v15 }
0x1108   :  { %v3664_v30 = vsel %vm164_vm0, %v3634_v54, 0.0  ;;  %v3562_v48 = vmul.f32 %v6699_v38, %v6699_v38  ;;  %v3563_v51 = vmul.f32 %v6702_v20, %v6702_v20  ;;  %v3564_v27 = vmul.f32 %v6705_v23, %v6705_v23 }
0x1109   :  { %3635 = vst [vmem:[#allocation1] ss:$9 sm:$0xff] %v3558_v1  ;;  %3665 = vadd.xlane.f32.xlu1 %v3664_v30  ;;  %v3565_v47 = vmul.f32 %v6714_v33, %v6714_v33 }
0x110a   :  { %3636 = vst [vmem:[#allocation1 + $0x1] ss:$9 sm:$0xff] %v3559_v26 }
0x110b   :  { %3637 = vst [vmem:[#allocation1 + $0x2] ss:$9 sm:$0xff] %v3560_v21 }
0x110c   :  { %3638 = vst [vmem:[#allocation1 + $0x3] ss:$9 sm:$0xff] %v3561_v43 }
0x110d   :  { %3639 = vst [vmem:[#allocation1 + $0x4] ss:$9 sm:$0xff] %v3562_v48 }
0x110e   :  { %3640 = vst [vmem:[#allocation1 + $0x5] ss:$9 sm:$0xff] %v3563_v51 }
0x110f   :  { %3641 = vst [vmem:[#allocation1 + $0x6] ss:$9 sm:$0xff] %v3564_v27 }
0x1110   :  { %v3426_v54 = vpop.xlane.xlu1 %3425  ;;  %3642 = vst [vmem:[#allocation1 + $0x7] ss:$9 sm:$0xff] %v3565_v47 }
0x1111   :  { %v3433_v1 = vmul.f32 %v3426_v54, %v7503_v46 }
0x1113   :  { %v3464_v30 = vperm.slane %v3433_v1, 0  ;;  %v3465_v25 = vperm.slane %v3433_v1, 1  ;;  %v3466_v2 = vperm.slane %v3433_v1, 2  ;;  %v3467_v7 = vperm.slane %v3433_v1, 3 }
0x1114   :  { %v3468_v26 = vperm.slane %v3433_v1, 4  ;;  %v3469_v5 = vperm.slane %v3433_v1, 5  ;;  %v3470_v24 = vperm.slane %v3433_v1, 6  ;;  %v3471_v8 = vperm.slane %v3433_v1, 7 }
0x1115   :  { %v6729_v21 = vsub.f32 %v6560_v3, %v3464_v30  ;;  %v6732_v43 = vsub.f32 %v6556_v11, %v3465_v25  ;;  %v6735_v27 = vsub.f32 %v6563_v12, %v3466_v2  ;;  %v6738_v51 = vsub.f32 %v6567_v9, %v3467_v7 }
0x1116   :  { %v6741_v48 = vsub.f32 %v6570_v41, %v3468_v26  ;;  %v6744_v47 = vsub.f32 %v6575_v28, %v3469_v5  ;;  %v6747_v54 = vsub.f32 %v6579_v10, %v3470_v24  ;;  %v6756_v7 = vsub.f32 %v6583_v16, %v3471_v8 }
0x1117   :  { %v3566_v1 = vmul.f32 %v6729_v21, %v6729_v21  ;;  %v3567_v25 = vmul.f32 %v6732_v43, %v6732_v43  ;;  %v3568_v2 = vmul.f32 %v6735_v27, %v6735_v27  ;;  %v3569_v30 = vmul.f32 %v6738_v51, %v6738_v51  ;;  %v3643_v5 = vld [vmem:[#allocation1] sm:$0xff] }
0x1118   :  { %7504 = vst [vmem:[#allocation72_spill] sm:$0xff] %v6747_v54  ;;  %v3570_v24 = vmul.f32 %v6741_v48, %v6741_v48  ;;  %v3667_v10 = vsel %vm164_vm0, %v3643_v5, 0.0  ;;  %v3571_v28 = vmul.f32 %v6744_v47, %v6744_v47  ;;  %v3572_v8 = vmul.f32 %v6747_v54, %v6747_v54 }
0x1119   :  { %7505 = vst [vmem:[#allocation73_spill] sm:$0xff] %v6756_v7  ;;  %v3429_v26 = vpop.xlane.xlu0 %3428  ;;  %3668 = vadd.xlane.f32.xlu0 %v3667_v10  ;;  %v3573_v16 = vmul.f32 %v6756_v7, %v6756_v7 }
0x111a   :  { %3644 = vst [vmem:[#allocation1] ss:$9 sm:$0xff] %v3566_v1  ;;  %v3434_v41 = vmul.f32 %v3429_v26, %v7503_v46 }
0x111b   :  { %3645 = vst [vmem:[#allocation1 + $0x1] ss:$9 sm:$0xff] %v3567_v25 }
0x111c   :  { %3646 = vst [vmem:[#allocation1 + $0x2] ss:$9 sm:$0xff] %v3568_v2  ;;  %v3472_v9 = vperm.slane %v3434_v41, 0  ;;  %v3473_v12 = vperm.slane %v3434_v41, 1 }
0x111d   :  { %3647 = vst [vmem:[#allocation1 + $0x3] ss:$9 sm:$0xff] %v3569_v30 }
0x111e   :  { %3648 = vst [vmem:[#allocation1 + $0x4] ss:$9 sm:$0xff] %v3570_v24  ;;  %v6771_v1 = vsub.f32 %v6596_v50, %v3472_v9  ;;  %v6774_v10 = vsub.f32 %v6593_v37, %v3473_v12  ;;  %v6786_v37 = vld [vmem:[%s7092_s7] ss:$0 sm:$0xff] }
0x111f   :  { %3649 = vst [vmem:[#allocation1 + $0x5] ss:$9 sm:$0xff] %v3571_v28  ;;  %v6818_v11 = vrot.slane %v6786_v37, 7 }
0x1120   :  { %3650 = vst [vmem:[#allocation1 + $0x6] ss:$9 sm:$0xff] %v3572_v8  ;;  %v3574_v25 = vmul.f32 %v6771_v1, %v6771_v1  ;;  %v3575_v2 = vmul.f32 %v6774_v10, %v6774_v10 }
0x1121   :  { %7506 = vst [vmem:[#allocation74_spill] sm:$0xff] %v6771_v1 }
0x1122   :  { %3651 = vst [vmem:[#allocation1 + $0x7] ss:$9 sm:$0xff] %v3573_v16 }
0x1123   :  { %7507 = vst [vmem:[#allocation76_spill] sm:$0xff] %v6774_v10 }
0x1129   :  { %v3652_v5 = vld [vmem:[#allocation1] sm:$0xff] }
0x112a   :  { %v3670_v30 = vsel %vm164_vm0, %v3652_v5, 0.0  ;;  %3653 = vst [vmem:[#allocation1] ss:$9 sm:$0xff] %v3574_v25 }
0x112b   :  { %3671 = vadd.xlane.f32.xlu2 %v3670_v30  ;;  %3654 = vst [vmem:[#allocation1 + $0x1] ss:$9 sm:$0xff] %v3575_v2  ;;  %v6792_v30 = vld [vmem:[%s7093_s8] ss:$0 sm:$0xff] }
0x112c   :  { %v6821_v3 = vrot.slane %v6792_v30, 1  ;;  %v6824_v45 = vrot.slane %v6792_v30, 2 }
0x1132   :  { %v3655_v41 = vld [vmem:[#allocation1] sm:$0xff] }
0x1133   :  { %v3673_v9 = vsel %vm177_vm1, %v3655_v41, 0.0 }
0x1134   :  { %3674 = vadd.xlane.f32.xlu1 %v3673_v9 }
0x116c   :  { %v3663_v28 = vpop.xlane.xlu2 %3662 }
0x116d   :  { %v3676_v12 = vmul.f32 %v3663_v28, %v7503_v46  ;;  %v6797_v28 = vrot.slane %v6786_v37, 1 }
0x116f   :  { %v3681_v16 = vadd.f32 1e-05, %v3676_v12  ;;  %v6800_v12 = vrot.slane %v6786_v37, 2 }
0x1171   :  { %4731 = vrsqrt.f32 %v3681_v16  ;;  %vm3692_vm15 = vweird.f32 %v3681_v16 }
0x1177   :  { %v4732_v24 = vpop.eup %4731 }
0x1178   :  { %v3687_v26 = vmul.f32 %v4732_v24, %v3681_v16  ;;  %vm3693_vm1 = vweird.f32 %v4732_v24  ;;  %v6830_v16 = vrot.slane %v6792_v30, 4 }
0x1179   :  { %vm3694_vm2 = vmor %vm3692_vm15, %vm3693_vm1 }
0x117a   :  { %v3688_v8 = vmul.f32 %v4732_v24, %v3687_v26  ;;  %v6803_v26 = vrot.slane %v6786_v37, 3 }
0x117c   :  { %v3666_v25 = vpop.xlane.xlu1 %3665  ;;  %v3689_v5 = vmul.f32 0.5, %v3688_v8  ;;  %v6806_v8 = vrot.slane %v6786_v37, 4 }
0x117d   :  { %v3677_v2 = vmul.f32 %v3666_v25, %v7503_v46  ;;  %v6809_v25 = vrot.slane %v6786_v37, 5 }
0x117e   :  { %v3690_v41 = vsub.f32 1.5, %v3689_v5  ;;  %v4588_v5 = vld [vmem:[%s7095_s9 + $0x8] sm:$0xff] }
0x117f   :  { %v6794_v9 = vadd.f32 1e-05, %v3677_v2  ;;  %v6815_v2 = vrot.slane %v6786_v37, 6  ;;  %4070 = vmatpush.bf16.msra.mxu2 %v4588_v5 }
0x1180   :  { %v3691_v50 = vmul.f32 %v4732_v24, %v3690_v41  ;;  %v6827_v41 = vrot.slane %v6792_v30, 3 }
0x1181   :  { %4733 = vrsqrt.f32 %v6794_v9  ;;  %vm3702_vm4 = vweird.f32 %v6794_v9 }
0x1182   :  { %v3695_v56 = vsel %vm3694_vm2, %v4732_v24, %v3691_v50 }
0x1183   :  { %v3741_v58 = vperm.slane %v3695_v56, 0  ;;  %v3742_v22 = vperm.slane %v3695_v56, 1  ;;  %v3743_v32 = vperm.slane %v3695_v56, 2  ;;  %v3744_v31 = vperm.slane %v3695_v56, 3  ;;  %4071 = vmatpush.bf16.msra.mxu2 %v4587_v63 }
0x1184   :  { %v3745_v59 = vperm.slane %v3695_v56, 4  ;;  %v3746_v13 = vperm.slane %v3695_v56, 5  ;;  %v3747_v62 = vperm.slane %v3695_v56, 6  ;;  %v3748_v61 = vperm.slane %v3695_v56, 7 }
0x1185   :  { %v3809_v52 = vmul.f32 %v3741_v58, %v6604_v49  ;;  %v3810_v19 = vmul.f32 %v3742_v22, %v6607_v40  ;;  %v3811_v50 = vmul.f32 %v3743_v32, %v6610_v14  ;;  %v3812_v24 = vmul.f32 %v3744_v31, %v6613_v39 }
0x1186   :  { %v3813_v5 = vmul.f32 %v3745_v59, %v6616_v29  ;;  %v3814_v10 = vmul.f32 %v3746_v13, %v6619_v6  ;;  %v3815_v1 = vmul.f32 %v3747_v62, %v6622_v18  ;;  %v3816_v56 = vmul.f32 %v3748_v61, %v6631_v44 }
0x1187   :  { %v3861_v7 = vmul.f32 %v6786_v37, %v3809_v52  ;;  %v3862_v54 = vmul.f32 %v6797_v28, %v3810_v19  ;;  %v3863_v58 = vmul.f32 %v6800_v12, %v3811_v50  ;;  %v3864_v22 = vmul.f32 %v6803_v26, %v3812_v24  ;;  %v4734_v32 = vpop.eup %4733 }
0x1188   :  { %v6849_v31 = vrot.slane %v6792_v30, 5  ;;  %v6852_v59 = vrot.slane %v6792_v30, 6  ;;  %v3865_v62 = vmul.f32 %v6806_v8, %v3813_v5  ;;  %v3866_v61 = vmul.f32 %v6809_v25, %v3814_v10 }
0x1189   :  { %v3867_v63 = vmul.f32 %v6815_v2, %v3815_v1  ;;  %v3913_v52 = vadd.f32 %v6792_v30, %v3861_v7  ;;  %v3914_v19 = vadd.f32 %v6821_v3, %v3862_v54  ;;  %v3915_v13 = vadd.f32 %v6824_v45, %v3863_v58 }
0x118a   :  { %v6861_v49 = vrot.slane %v6792_v30, 7  ;;  %v3868_v40 = vmul.f32 %v6818_v11, %v3816_v56  ;;  %v3916_v14 = vadd.f32 %v6827_v41, %v3864_v22  ;;  %v3917_v29 = vadd.f32 %v6830_v16, %v3865_v62 }
0x118b   :  { %3981 = vst [vmem:[#allocation1] ss:$9 sm:$0xff] %v3913_v52  ;;  %v3697_v6 = vmul.f32 %v4734_v32, %v6794_v9  ;;  %v3918_v18 = vadd.f32 %v6849_v31, %v3866_v61  ;;  %v3919_v44 = vadd.f32 %v6852_v59, %v3867_v63  ;;  %vm3703_vm3 = vweird.f32 %v4734_v32 }
0x118c   :  { %v3669_v39 = vpop.xlane.xlu0 %3668  ;;  %3983 = vst [vmem:[#allocation1 + $0x1] ss:$9 sm:$0xff] %v3914_v19  ;;  %v3920_v1 = vadd.f32 %v6861_v49, %v3868_v40  ;;  %vm3704_vm5 = vmor %vm3702_vm4, %vm3703_vm3 }
0x118d   :  { %3985 = vst [vmem:[#allocation1 + $0x2] ss:$9 sm:$0xff] %v3915_v13  ;;  %v3698_v54 = vmul.f32 %v4734_v32, %v3697_v6  ;;  %v3678_v7 = vmul.f32 %v3669_v39, %v7503_v46 }
0x118e   :  { %3987 = vst [vmem:[#allocation1 + $0x3] ss:$9 sm:$0xff] %v3916_v14 }
0x118f   :  { %3989 = vst [vmem:[#allocation1 + $0x4] ss:$9 sm:$0xff] %v3917_v29  ;;  %v3699_v10 = vmul.f32 0.5, %v3698_v54  ;;  %v3683_v24 = vadd.f32 1e-05, %v3678_v7 }
0x1190   :  { %3991 = vst [vmem:[#allocation1 + $0x5] ss:$9 sm:$0xff] %v3918_v18 }
0x1191   :  { %3993 = vst [vmem:[#allocation1 + $0x6] ss:$9 sm:$0xff] %v3919_v44  ;;  %v3700_v50 = vsub.f32 1.5, %v3699_v10  ;;  %4735 = vrsqrt.f32 %v3683_v24  ;;  %vm3712_vm7 = vweird.f32 %v3683_v24 }
0x1192   :  { %3995 = vst [vmem:[#allocation1 + $0x7] ss:$9 sm:$0xff] %v3920_v1 }
0x1193   :  { %v3701_v5 = vmul.f32 %v4734_v32, %v3700_v50 }
0x1195   :  { %v3705_v56 = vsel %vm3704_vm5, %v4734_v32, %v3701_v5 }
0x1196   :  { %v3749_v58 = vperm.slane %v3705_v56, 0  ;;  %v3750_v22 = vperm.slane %v3705_v56, 1  ;;  %v3751_v62 = vperm.slane %v3705_v56, 2  ;;  %v3752_v61 = vperm.slane %v3705_v56, 3 }
0x1197   :  { %v3753_v63 = vperm.slane %v3705_v56, 4  ;;  %v3754_v52 = vperm.slane %v3705_v56, 5  ;;  %v3755_v19 = vperm.slane %v3705_v56, 6  ;;  %v3756_v13 = vperm.slane %v3705_v56, 7  ;;  %v4736_v7 = vpop.eup %4735 }
0x1198   :  { %v3817_v40 = vmul.f32 %v3749_v58, %v6645_v36  ;;  %v3818_v14 = vmul.f32 %v3750_v22, %v6648_v42  ;;  %v3819_v39 = vmul.f32 %v3751_v62, %v6651_v55  ;;  %v3820_v29 = vmul.f32 %v3752_v61, %v6654_v4 }
0x1199   :  { %v3821_v9 = vmul.f32 %v3753_v63, %v6657_v34  ;;  %v3822_v32 = vmul.f32 %v3754_v52, %v6660_v60  ;;  %v3823_v6 = vmul.f32 %v3755_v19, %v6663_v0  ;;  %v3824_v18 = vmul.f32 %v3756_v13, %v6672_v57  ;;  %v6886_v34 = vld [vmem:[#allocation1] sm:$0xff] }
0x119a   :  { %v3869_v44 = vmul.f32 %v6786_v37, %v3817_v40  ;;  %v3870_v54 = vmul.f32 %v6797_v28, %v3818_v14  ;;  %v3871_v36 = vmul.f32 %v6800_v12, %v3819_v39  ;;  %v3872_v42 = vmul.f32 %v6803_v26, %v3820_v29 }
0x119b   :  { %v3873_v55 = vmul.f32 %v6806_v8, %v3821_v9  ;;  %v3874_v4 = vmul.f32 %v6809_v25, %v3822_v32  ;;  %v3875_v60 = vmul.f32 %v6815_v2, %v3823_v6  ;;  %v3876_v50 = vmul.f32 %v6818_v11, %v3824_v18 }
0x119c   :  { %v3921_v0 = vadd.f32 %v6792_v30, %v3869_v44  ;;  %v3922_v57 = vadd.f32 %v6821_v3, %v3870_v54  ;;  %v3923_v1 = vadd.f32 %v6824_v45, %v3871_v36  ;;  %v3924_v5 = vadd.f32 %v6827_v41, %v3872_v42 }
0x119d   :  { %v3925_v56 = vadd.f32 %v6830_v16, %v3873_v55  ;;  %v3707_v58 = vmul.f32 %v4736_v7, %v3683_v24  ;;  %v3926_v22 = vadd.f32 %v6849_v31, %v3874_v4  ;;  %v3927_v61 = vadd.f32 %v6852_v59, %v3875_v60 }
0x119e   :  { %v3672_v10 = vpop.xlane.xlu2 %3671  ;;  %3997 = vst [vmem:[#allocation1] ss:$9 sm:$0xff] %v3921_v0  ;;  %v3928_v52 = vadd.f32 %v6861_v49, %v3876_v50  ;;  %vm3713_vm6 = vweird.f32 %v4736_v7 }
0x119f   :  { %v3679_v62 = vmul.f32 %v3672_v10, %v7503_v46  ;;  %3998 = vst [vmem:[#allocation1 + $0x1] ss:$9 sm:$0xff] %v3922_v57  ;;  %v3708_v63 = vmul.f32 %v4736_v7, %v3707_v58  ;;  %vm3714_vm8 = vmor %vm3712_vm7, %vm3713_vm6 }
0x11a0   :  { %3999 = vst [vmem:[#allocation1 + $0x2] ss:$9 sm:$0xff] %v3923_v1 }
0x11a1   :  { %4000 = vst [vmem:[#allocation1 + $0x3] ss:$9 sm:$0xff] %v3924_v5  ;;  %v3709_v19 = vmul.f32 0.5, %v3708_v63  ;;  %v6899_v40 = vadd.f32 1e-05, %v3679_v62 }
0x11a2   :  { %4001 = vst [vmem:[#allocation1 + $0x4] ss:$9 sm:$0xff] %v3925_v56 }
0x11a3   :  { %4002 = vst [vmem:[#allocation1 + $0x5] ss:$9 sm:$0xff] %v3926_v22  ;;  %v3710_v39 = vsub.f32 1.5, %v3709_v19  ;;  %4737 = vrsqrt.f32 %v6899_v40  ;;  %vm3722_vm10 = vweird.f32 %v6899_v40 }
0x11a4   :  { %4003 = vst [vmem:[#allocation1 + $0x6] ss:$9 sm:$0xff] %v3927_v61 }
0x11a5   :  { %4004 = vst [vmem:[#allocation1 + $0x7] ss:$9 sm:$0xff] %v3928_v52  ;;  %v3711_v9 = vmul.f32 %v4736_v7, %v3710_v39 }
0x11a7   :  { %v3675_v13 = vpop.xlane.xlu1 %3674  ;;  %v3715_v32 = vsel %vm3714_vm8, %v4736_v7, %v3711_v9 }
0x11a8   :  { %v3680_v14 = vmul.f32 %v3675_v13, %v7503_v46  ;;  %v3757_v6 = vperm.slane %v3715_v32, 0  ;;  %v3758_v18 = vperm.slane %v3715_v32, 1  ;;  %v3759_v44 = vperm.slane %v3715_v32, 2 }
0x11a9   :  { %v3760_v54 = vperm.slane %v3715_v32, 3  ;;  %v3761_v36 = vperm.slane %v3715_v32, 4  ;;  %v3762_v46 = vperm.slane %v3715_v32, 5  ;;  %v3763_v42 = vperm.slane %v3715_v32, 6  ;;  %v4738_v50 = vpop.eup %4737 }
0x11aa   :  { %v6902_v29 = vadd.f32 1e-05, %v3680_v14  ;;  %v3764_v55 = vperm.slane %v3715_v32, 7  ;;  %v3825_v4 = vmul.f32 %v3757_v6, %v6687_v35  ;;  %v3826_v60 = vmul.f32 %v3758_v18, %v6690_v53 }
0x11ab   :  { %v3827_v24 = vmul.f32 %v3759_v44, %v6693_v17  ;;  %v3828_v0 = vmul.f32 %v3760_v54, %v6696_v15  ;;  %v3829_v7 = vmul.f32 %v3761_v36, %v6699_v38  ;;  %v3830_v57 = vmul.f32 %v3762_v46, %v6702_v20 }
0x11ac   :  { %4739 = vrsqrt.f32 %v6902_v29  ;;  %v3831_v1 = vmul.f32 %v3763_v42, %v6705_v23  ;;  %v3832_v10 = vmul.f32 %v3764_v55, %v6714_v33  ;;  %v3877_v5 = vmul.f32 %v6786_v37, %v3825_v4  ;;  %v4005_v20 = vld [vmem:[#allocation1] sm:$0xff] }
0x11ad   :  { %v3878_v56 = vmul.f32 %v6797_v28, %v3826_v60  ;;  %v3879_v35 = vmul.f32 %v6800_v12, %v3827_v24  ;;  %v3880_v53 = vmul.f32 %v6803_v26, %v3828_v0  ;;  %v3881_v15 = vmul.f32 %v6806_v8, %v3829_v7 }
0x11ae   :  { %v3882_v38 = vmul.f32 %v6809_v25, %v3830_v57  ;;  %v3883_v23 = vmul.f32 %v6815_v2, %v3831_v1  ;;  %v3929_v33 = vadd.f32 %v6792_v30, %v3877_v5  ;;  %v3884_v62 = vmul.f32 %v6818_v11, %v3832_v10 }
0x11af   :  { %v3930_v58 = vadd.f32 %v6821_v3, %v3878_v56  ;;  %v3931_v22 = vadd.f32 %v6824_v45, %v3879_v35  ;;  %v3932_v61 = vadd.f32 %v6827_v41, %v3880_v53  ;;  %v3933_v63 = vadd.f32 %v6830_v16, %v3881_v15  ;;  %v7508_v53 = vld [vmem:[#allocation72_spill] sm:$0xff] }
0x11b0   :  { %v3717_v52 = vmul.f32 %v4738_v50, %v6899_v40  ;;  %v4032_v19 = vpack.c.bf16 %v4005_v20, %v6886_v34  ;;  %4006 = vst [vmem:[#allocation1] ss:$9 sm:$0xff] %v3929_v33  ;;  %v3934_v14 = vadd.f32 %v6849_v31, %v3882_v38  ;;  %v3935_v39 = vadd.f32 %v6852_v59, %v3883_v23  ;;  %v7509_v38 = vld [vmem:[#allocation73_spill] sm:$0xff] }
0x11b1   :  { %4007 = vst [vmem:[#allocation1 + $0x1] ss:$9 sm:$0xff] %v3930_v58  ;;  %v3936_v6 = vadd.f32 %v6861_v49, %v3884_v62  ;;  %vm3723_vm9 = vweird.f32 %v4738_v50  ;;  %vm3732_vm12 = vweird.f32 %v6902_v29 }
0x11b2   :  { %v6918_v17 = vpop.eup %4739  ;;  %v3718_v9 = vmul.f32 %v4738_v50, %v3717_v52  ;;  %4543 = vmatmul.msk.bf16.vlgmr.msra.gmra.mxu2 %vm164_vm0, %v4032_v19  ;;  %4008 = vst [vmem:[#allocation1 + $0x2] ss:$9 sm:$0xff] %v3931_v22  ;;  %vm3724_vm11 = vmor %vm3722_vm10, %vm3723_vm9  ;;  %v7510_v52 = vld [vmem:[#allocation74_spill] sm:$0xff] }
0x11b3   :  { %v3727_v13 = vmul.f32 %v6918_v17, %v6902_v29  ;;  %4009 = vst [vmem:[#allocation1 + $0x3] ss:$9 sm:$0xff] %v3932_v61  ;;  %vm3733_vm13 = vweird.f32 %v6918_v17 }
0x11b4   :  { %v3719_v18 = vmul.f32 0.5, %v3718_v9  ;;  %4010 = vst [vmem:[#allocation1 + $0x4] ss:$9 sm:$0xff] %v3933_v63  ;;  %vm3734_vm14 = vmor %vm3732_vm12, %vm3733_vm13  ;;  %v4592_v9 = vld [vmem:[%s7097_s11 + $0x18] sm:$0xff] }
0x11b5   :  { %v3728_v32 = vmul.f32 %v6918_v17, %v3727_v13  ;;  %4011 = vst [vmem:[#allocation1 + $0x5] ss:$9 sm:$0xff] %v3934_v14 }
0x11b6   :  { %v3720_v44 = vsub.f32 1.5, %v3719_v18  ;;  %4012 = vst [vmem:[#allocation1 + $0x6] ss:$9 sm:$0xff] %v3935_v39  ;;  %v4591_v18 = vld [vmem:[%s7097_s11 + $0x10] sm:$0xff] }
0x11b7   :  { %v3729_v34 = vmul.f32 0.5, %v3728_v32  ;;  %4013 = vst [vmem:[#allocation1 + $0x7] ss:$9 sm:$0xff] %v3936_v6  ;;  %v6997_v32 = vld [vmem:[%s7094_s10] ss:$0 sm:$0xff] }
0x11b8   :  { %v3721_v36 = vmul.f32 %v4738_v50, %v3720_v44 }
0x11b9   :  { %v3730_v54 = vsub.f32 1.5, %v3729_v34 }
0x11ba   :  { %v3725_v46 = vsel %vm3724_vm11, %v4738_v50, %v3721_v36 }
0x11bb   :  { %v3731_v42 = vmul.f32 %v6918_v17, %v3730_v54  ;;  %v3765_v55 = vperm.slane %v3725_v46, 0  ;;  %v3766_v4 = vperm.slane %v3725_v46, 1  ;;  %v3767_v60 = vperm.slane %v3725_v46, 2  ;;  %v4590_v54 = vld [vmem:[%s7097_s11 + $0x8] sm:$0xff] }
0x11bc   :  { %v3768_v24 = vperm.slane %v3725_v46, 3  ;;  %v3769_v0 = vperm.slane %v3725_v46, 4  ;;  %v3770_v7 = vperm.slane %v3725_v46, 5  ;;  %v3771_v57 = vperm.slane %v3725_v46, 6 }
0x11bd   :  { %v3772_v1 = vperm.slane %v3725_v46, 7  ;;  %v3833_v10 = vmul.f32 %v3765_v55, %v6729_v21  ;;  %v3834_v40 = vmul.f32 %v3766_v4, %v6732_v43  ;;  %v3835_v50 = vmul.f32 %v3767_v60, %v6735_v27 }
0x11be   :  { %v3836_v5 = vmul.f32 %v3768_v24, %v6738_v51  ;;  %v3837_v56 = vmul.f32 %v3769_v0, %v6741_v48  ;;  %v3838_v35 = vmul.f32 %v3770_v7, %v6744_v47  ;;  %v3839_v15 = vmul.f32 %v3771_v57, %v7508_v53  ;;  %v4014_v47 = vld [vmem:[#allocation1] sm:$0xff] }
0x11bf   :  { %v3840_v20 = vmul.f32 %v3772_v1, %v7509_v38  ;;  %v3885_v23 = vmul.f32 %v6786_v37, %v3833_v10  ;;  %v3886_v33 = vmul.f32 %v6797_v28, %v3834_v40  ;;  %v3887_v21 = vmul.f32 %v6800_v12, %v3835_v50 }
0x11c0   :  { %v3888_v43 = vmul.f32 %v6803_v26, %v3836_v5  ;;  %v3889_v27 = vmul.f32 %v6806_v8, %v3837_v56  ;;  %v3890_v51 = vmul.f32 %v6809_v25, %v3838_v35  ;;  %v3735_v48 = vsel %vm3734_vm14, %v6918_v17, %v3731_v42  ;;  %v4589_v42 = vld [vmem:[%s7097_s11] sm:$0xff] }
0x11c1   :  { %v3891_v58 = vmul.f32 %v6815_v2, %v3839_v15  ;;  %v3937_v22 = vadd.f32 %v6792_v30, %v3885_v23  ;;  %v3938_v12 = vadd.f32 %v6821_v3, %v3886_v33  ;;  %v3939_v26 = vadd.f32 %v6824_v45, %v3887_v21  ;;  %v7511_v45 = vld [vmem:[#allocation76_spill] sm:$0xff] }
0x11c2   :  { %v3892_v62 = vmul.f32 %v6818_v11, %v3840_v20  ;;  %v3940_v29 = vadd.f32 %v6827_v41, %v3888_v43  ;;  %v3941_v61 = vadd.f32 %v6830_v16, %v3889_v27  ;;  %v3773_v8 = vperm.slane %v3735_v48, 0 }
0x11c3   :  { %v3774_v63 = vperm.slane %v3735_v48, 1  ;;  %4015 = vst [vmem:[#allocation1] ss:$9 sm:$0xff] %v3937_v22  ;;  %v3942_v25 = vadd.f32 %v6849_v31, %v3890_v51  ;;  %v3943_v2 = vadd.f32 %v6852_v59, %v3891_v58 }
0x11c4   :  { %4016 = vst [vmem:[#allocation1 + $0x1] ss:$9 sm:$0xff] %v3938_v12  ;;  %v3944_v17 = vadd.f32 %v6861_v49, %v3892_v62  ;;  %v3841_v19 = vmul.f32 %v3773_v8, %v7510_v52 }
0x11c5   :  { %4017 = vst [vmem:[#allocation1 + $0x2] ss:$9 sm:$0xff] %v3939_v26  ;;  %v3842_v11 = vmul.f32 %v3774_v63, %v7511_v45 }
0x11c6   :  { %4018 = vst [vmem:[#allocation1 + $0x3] ss:$9 sm:$0xff] %v3940_v29  ;;  %v3893_v41 = vmul.f32 %v6786_v37, %v3841_v19  ;;  %v4596_v37 = vld [vmem:[%s7097_s11 + $0x38] sm:$0xff] }
0x11c7   :  { %4019 = vst [vmem:[#allocation1 + $0x4] ss:$9 sm:$0xff] %v3941_v61  ;;  %v3894_v16 = vmul.f32 %v6797_v28, %v3842_v11  ;;  %4263 = vmatpush.bf16.msra.mxu0 %v4596_v37  ;;  %v4593_v28 = vld [vmem:[%s7097_s11 + $0x20] sm:$0xff] }
0x11c8   :  { %4020 = vst [vmem:[#allocation1 + $0x5] ss:$9 sm:$0xff] %v3942_v25  ;;  %v3945_v31 = vadd.f32 %v6792_v30, %v3893_v41  ;;  %v4595_v30 = vld [vmem:[%s7097_s11 + $0x30] sm:$0xff] }
0x11c9   :  { %4021 = vst [vmem:[#allocation1 + $0x6] ss:$9 sm:$0xff] %v3943_v2  ;;  %v3946_v59 = vadd.f32 %v6821_v3, %v3894_v16  ;;  %v4594_v3 = vld [vmem:[%s7097_s11 + $0x28] sm:$0xff] }
0x11ca   :  { %4022 = vst [vmem:[#allocation1 + $0x7] ss:$9 sm:$0xff] %v3944_v17 }
0x11cb   :  { %4264 = vmatpush.bf16.msra.mxu0 %v4595_v30 }
0x11cf   :  { %4265 = vmatpush.bf16.msra.mxu0 %v4594_v3 }
0x11d1   :  { %v4023_v13 = vld [vmem:[#allocation1] sm:$0xff] }
0x11d2   :  { %v4033_v14 = vpack.c.bf16 %v4023_v13, %v4014_v47  ;;  %4024 = vst [vmem:[#allocation1] ss:$9 sm:$0xff] %v3945_v31 }
0x11d3   :  { %4025 = vst [vmem:[#allocation1 + $0x1] ss:$9 sm:$0xff] %v3946_v59  ;;  %4266 = vmatpush.bf16.msra.mxu0 %v4593_v28 }
0x11d4   :  { %4544 = vmatmul.msk.bf16.gmra.mxu2 %vm164_vm0, %v4033_v14 }
0x11d7   :  { %4267 = vmatpush.bf16.msra.mxu0 %v4592_v9 }
0x11da   :  { %v4026_v49 = vld [vmem:[#allocation1] sm:$0xff] }
0x11db   :  { %v4034_v39 = vpack.c.bf16 %v4026_v49, %v4026_v49  ;;  %4268 = vmatpush.bf16.msra.mxu0 %v4591_v18 }
0x11df   :  { %4269 = vmatpush.bf16.msra.mxu0 %v4590_v54 }
0x11e3   :  { %4270 = vmatpush.bf16.msra.mxu0 %v4589_v42 }
0x11e4   :  { %4545 = vmatmul.msk.bf16.gmra.mxu2 %vm164_vm0, %v4034_v39 }
0x1235   :  { %v4073_v6 = vpop.f32.mrf.mxu2 }
0x1236   :  { %v4074_v34 = vadd.f32 %v6997_v32, %v4073_v6 }
0x1238   :  { %v4546_v44 = vmul.f32 -1.702, %v4074_v34 }
0x123a   :  { %v4097_v36 = vmul.f32 1.442695, %v4546_v44 }
0x123c   :  { %4741 = vpow2.f32 %v4097_v36 }
0x123d   :  { %v4075_v46 = vpop.f32.mrf.mxu2 }
0x123e   :  { %v4076_v55 = vadd.f32 %v6997_v32, %v4075_v46 }
0x1240   :  { %v4547_v4 = vmul.f32 -1.702, %v4076_v55 }
0x1242   :  { %v4742_v60 = vpop.eup %4741  ;;  %v4099_v24 = vmul.f32 1.442695, %v4547_v4 }
0x1243   :  { %v4107_v0 = vadd.f32 1.0, %v4742_v60 }
0x1244   :  { %4743 = vpow2.f32 %v4099_v24 }
0x1245   :  { %4745 = vrcp.f32 %v4107_v0  ;;  %v4123_v53 = vand.u32 2147483648, %v4107_v0  ;;  %vm4117_vm15 = vweird.f32 %v4107_v0  ;;  %v4121_v15 = vand.u32 2147483647, %v4107_v0 }
0x1247   :  { %v4124_v51 = vor.u32 1.1754944e-38, %v4123_v53  ;;  %vm4122_vm4 = vcmp.eq.f32.partialorder %v4121_v15, 8.507059e+37 }
0x124a   :  { %v4744_v7 = vpop.eup %4743 }
0x124b   :  { %v4746_v57 = vpop.eup %4745  ;;  %v4108_v1 = vadd.f32 1.0, %v4744_v7 }
0x124c   :  { %v4113_v10 = vmul.f32 %v4746_v57, %v4107_v0  ;;  %vm4118_vm1 = vweird.f32 %v4746_v57 }
0x124d   :  { %4747 = vrcp.f32 %v4108_v1  ;;  %vm4119_vm2 = vmor %vm4117_vm15, %vm4118_vm1  ;;  %v4136_v20 = vand.u32 2147483647, %v4108_v1  ;;  %v4138_v23 = vand.u32 2147483648, %v4108_v1  ;;  %vm4132_vm5 = vweird.f32 %v4108_v1 }
0x124e   :  { %v4114_v40 = vsub.f32 1.0, %v4113_v10 }
0x124f   :  { %v4139_v22 = vor.u32 1.1754944e-38, %v4138_v23  ;;  %vm4137_vm7 = vcmp.eq.f32.partialorder %v4136_v20, 8.507059e+37 }
0x1250   :  { %v4115_v50 = vmul.f32 %v4746_v57, %v4114_v40 }
0x1252   :  { %v4116_v56 = vadd.f32 %v4746_v57, %v4115_v50 }
0x1253   :  { %v4748_v5 = vpop.eup %4747 }
0x1254   :  { %v4128_v35 = vmul.f32 %v4748_v5, %v4108_v1  ;;  %v4120_v21 = vsel %vm4119_vm2, %v4746_v57, %v4116_v56  ;;  %vm4133_vm3 = vweird.f32 %v4748_v5 }
0x1255   :  { %v4125_v58 = vsel %vm4122_vm4, %v4124_v51, %v4120_v21  ;;  %vm4134_vm6 = vmor %vm4132_vm5, %vm4133_vm3  ;;  %v7020_v21 = vld [vmem:[%s7096_s12] ss:$0 sm:$0xff]  ;;  %vm4472_vm5 = vcmask 253952  }
0x1256   :  { %v4129_v38 = vsub.f32 1.0, %v4128_v35  ;;  %v4187_v29 = vmul.f32 %v4125_v58, %v4074_v34 }
0x1257   :  { %v4078_v33 = vpop.f32.mrf.mxu2 }
0x1258   :  { %v4130_v43 = vmul.f32 %v4748_v5, %v4129_v38  ;;  %v7011_v27 = vadd.f32 %v6997_v32, %v4078_v33 }
0x125a   :  { %v4131_v48 = vadd.f32 %v4748_v5, %v4130_v43  ;;  %v4548_v47 = vmul.f32 -1.702, %v7011_v27 }
0x125c   :  { %v4135_v12 = vsel %vm4134_vm6, %v4748_v5, %v4131_v48  ;;  %v4101_v26 = vmul.f32 1.442695, %v4548_v47 }
0x125d   :  { %v4140_v62 = vsel %vm4137_vm7, %v4139_v22, %v4135_v12 }
0x125e   :  { %v4188_v61 = vmul.f32 %v4140_v62, %v4076_v55  ;;  %4749 = vpow2.f32 %v4101_v26  ;;  %v7512_v26 = vld [vmem:[#allocation64_spill] sm:$0xff] }
0x125f   :  { %v4080_v8 = vpop.f32.mrf.mxu2 }
0x1260   :  { %v4192_v63 = vpack.c.bf16 %v4188_v61, %v4187_v29  ;;  %v4081_v25 = vadd.f32 %v6997_v32, %v4080_v8  ;;  %v7513_v61 = vld [vmem:[#allocation65_spill] sm:$0xff] }
0x1262   :  { %4271 = vmatmul.bf16.vlgmr.msra.gmra.mxu0 %v4192_v63  ;;  %v4549_v2 = vmul.f32 -1.702, %v4081_v25  ;;  %v7514_v63 = vld [vmem:[#allocation66_spill] sm:$0xff] }
0x1264   :  { %v4750_v17 = vpop.eup %4749  ;;  %v4103_v52 = vmul.f32 1.442695, %v4549_v2  ;;  %v7515_v2 = vld [vmem:[#allocation67_spill] sm:$0xff] }
0x1265   :  { %v4109_v19 = vadd.f32 1.0, %v4750_v17 }
0x1266   :  { %4751 = vpow2.f32 %v4103_v52  ;;  %v7516_v52 = vld [vmem:[#allocation68_spill] sm:$0xff] }
0x1267   :  { %4753 = vrcp.f32 %v4109_v19  ;;  %v4083_v45 = vpop.f32.mrf.mxu2  ;;  %v4153_v18 = vand.u32 2147483648, %v4109_v19  ;;  %vm4147_vm9 = vweird.f32 %v4109_v19 }
0x1268   :  { %v4084_v11 = vadd.f32 %v6997_v32, %v4083_v45  ;;  %v4151_v32 = vand.u32 2147483647, %v4109_v19  ;;  %v7517_v45 = vld [vmem:[#allocation38_spill] sm:$0xff] }
0x1269   :  { %v4154_v42 = vor.u32 1.1754944e-38, %v4153_v18 }
0x126a   :  { %v4550_v41 = vmul.f32 -1.702, %v4084_v11  ;;  %vm4152_vm12 = vcmp.eq.f32.partialorder %v4151_v32, 8.507059e+37  ;;  %v7521_v32 = vld [vmem:[#allocation42_spill] sm:$0xff] }
0x126c   :  { %v4752_v16 = vpop.eup %4751  ;;  %v4105_v31 = vmul.f32 1.442695, %v4550_v41  ;;  %v7518_v41 = vld [vmem:[#allocation39_spill] sm:$0xff] }
0x126d   :  { %v4754_v59 = vpop.eup %4753  ;;  %v4110_v13 = vadd.f32 1.0, %v4752_v16 }
0x126e   :  { %v4143_v14 = vmul.f32 %v4754_v59, %v4109_v19  ;;  %4755 = vpow2.f32 %v4105_v31  ;;  %vm4148_vm8 = vweird.f32 %v4754_v59 }
0x126f   :  { %4757 = vrcp.f32 %v4110_v13  ;;  %v4085_v49 = vpop.f32.mrf.mxu2  ;;  %vm4149_vm10 = vmor %vm4147_vm9, %vm4148_vm8  ;;  %v4168_v44 = vand.u32 2147483648, %v4110_v13  ;;  %v4166_v46 = vand.u32 2147483647, %v4110_v13  ;;  %vm4162_vm13 = vweird.f32 %v4110_v13 }
0x1270   :  { %v4144_v39 = vsub.f32 1.0, %v4143_v14 }
0x1271   :  { %v4169_v24 = vor.u32 1.1754944e-38, %v4168_v44  ;;  %vm4167_vm1 = vcmp.eq.f32.partialorder %v4166_v46, 8.507059e+37  ;;  %v7522_v44 = vld [vmem:[#allocation43_spill] sm:$0xff]  ;;  %v7523_v46 = vld [vmem:[#allocation44_spill] sm:$0xff] }
0x1272   :  { %v4145_v37 = vmul.f32 %v4754_v59, %v4144_v39 }
0x1274   :  { %v4756_v30 = vpop.eup %4755  ;;  %v4146_v9 = vadd.f32 %v4754_v59, %v4145_v37 }
0x1275   :  { %v4758_v3 = vpop.eup %4757  ;;  %v4111_v28 = vadd.f32 1.0, %v4756_v30 }
0x1276   :  { %v4158_v6 = vmul.f32 %v4758_v3, %v4110_v13  ;;  %v4150_v54 = vsel %vm4149_vm10, %v4754_v59, %v4146_v9  ;;  %vm4163_vm11 = vweird.f32 %v4758_v3  ;;  %v7519_v59 = vld [vmem:[#allocation40_spill] sm:$0xff] }
0x1277   :  { %4759 = vrcp.f32 %v4111_v28  ;;  %v4155_v60 = vsel %vm4152_vm12, %v4154_v42, %v4150_v54  ;;  %vm4164_vm14 = vmor %vm4162_vm13, %vm4163_vm11  ;;  %v4183_v35 = vand.u32 2147483648, %v4111_v28  ;;  %vm4177_vm2 = vweird.f32 %v4111_v28 }
0x1278   :  { %v4159_v34 = vsub.f32 1.0, %v4158_v6  ;;  %v4189_v1 = vmul.f32 %v4155_v60, %v7011_v27  ;;  %v4181_v53 = vand.u32 2147483647, %v4111_v28  ;;  %v7525_v60 = vld [vmem:[#allocation46_spill] sm:$0xff] }
0x1279   :  { %v4184_v38 = vor.u32 1.1754944e-38, %v4183_v35 }
0x127a   :  { %v4160_v36 = vmul.f32 %v4758_v3, %v4159_v34  ;;  %vm4182_vm4 = vcmp.eq.f32.partialorder %v4181_v53, 8.507059e+37 }
0x127c   :  { %v4161_v55 = vadd.f32 %v4758_v3, %v4160_v36 }
0x127d   :  { %v4760_v4 = vpop.eup %4759 }
0x127e   :  { %v4165_v0 = vsel %vm4164_vm14, %v4758_v3, %v4161_v55  ;;  %v4173_v7 = vmul.f32 %v4760_v4, %v4111_v28  ;;  %vm4178_vm15 = vweird.f32 %v4760_v4  ;;  %v7520_v28 = vld [vmem:[#allocation41_spill] sm:$0xff] }
0x127f   :  { %v4170_v57 = vsel %vm4167_vm1, %v4169_v24, %v4165_v0  ;;  %vm4179_vm3 = vmor %vm4177_vm2, %vm4178_vm15  ;;  %v7524_v55 = vld [vmem:[#allocation45_spill] sm:$0xff]  ;;  %v7526_v0 = vld [vmem:[#allocation47_spill] sm:$0xff] }
0x1280   :  { %v4190_v10 = vmul.f32 %v4170_v57, %v4081_v25  ;;  %v4174_v40 = vsub.f32 1.0, %v4173_v7  ;;  %v7527_v57 = vld [vmem:[#allocation48_spill] sm:$0xff] }
0x1282   :  { %v4193_v50 = vpack.c.bf16 %v4190_v10, %v4189_v1  ;;  %v4175_v5 = vmul.f32 %v4760_v4, %v4174_v40 }
0x1284   :  { %4276 = vmatmul.bf16.gmra.mxu0 %v4193_v50  ;;  %v4176_v56 = vadd.f32 %v4760_v4, %v4175_v5  ;;  %v7528_v5 = vld [vmem:[#allocation49_spill] sm:$0xff] }
0x1286   :  { %v4180_v15 = vsel %vm4179_vm3, %v4760_v4, %v4176_v56 }
0x1287   :  { %v4185_v20 = vsel %vm4182_vm4, %v4184_v38, %v4180_v15 }
0x1288   :  { %v4191_v23 = vmul.f32 %v4185_v20, %v4084_v11 }
0x128a   :  { %v4194_v33 = vpack.c.bf16 %v4191_v23, %v4191_v23 }
0x1294   :  { %4281 = vmatmul.bf16.gmra.mxu0 %v4194_v33  ;;  %v7529_v33 = vld [vmem:[#allocation50_spill] sm:$0xff] }
0x12df   :  { %v4272_v43 = vpop.f32.mrf.mxu0 }
0x12e0   :  { %v4273_v27 = vadd.f32 %v7020_v21, %v4272_v43 }
0x12e2   :  { %v4291_v51 = vrot.slane %v4273_v27, 1  ;;  %v4292_v48 = vrot.slane %v4273_v27, 2  ;;  %v4293_v47 = vrot.slane %v4273_v27, 3  ;;  %v4294_v58 = vrot.slane %v4273_v27, 4 }
0x12e3   :  { %v4295_v22 = vrot.slane %v4273_v27, 5  ;;  %v4296_v12 = vrot.slane %v4273_v27, 6  ;;  %v4349_v62 = vadd.f32 %v4273_v27, %v7512_v26  ;;  %v4297_v29 = vrot.slane %v4273_v27, 7 }
0x12e4   :  { %v4350_v8 = vadd.f32 %v4291_v51, %v7513_v61  ;;  %v4351_v25 = vadd.f32 %v4292_v48, %v7514_v63  ;;  %v4352_v17 = vadd.f32 %v4293_v47, %v7515_v2  ;;  %v4353_v19 = vadd.f32 %v4294_v58, %v7516_v52  ;;  %v7530_v51 = vld [vmem:[#allocation51_spill] sm:$0xff]  ;;  %v7533_v61 = vld [vmem:[#allocation54_spill] sm:$0xff] }
0x12e5   :  { %4417 = vst [vmem:[#allocation1] ss:$9 sm:$0xff] %v4349_v62  ;;  %v4354_v11 = vadd.f32 %v4295_v22, %v7517_v45  ;;  %v4355_v16 = vadd.f32 %v4296_v12, %v7518_v41  ;;  %v4356_v13 = vadd.f32 %v4297_v29, %v7519_v59  ;;  %v7531_v22 = vld [vmem:[#allocation52_spill] sm:$0xff]  ;;  %v7532_v62 = vld [vmem:[#allocation53_spill] sm:$0xff] }
0x12e6   :  { %4419 = vst [vmem:[#allocation1 + $0x1] ss:$9 sm:$0xff] %v4350_v8 }
0x12e7   :  { %4421 = vst [vmem:[#allocation1 + $0x2] ss:$9 sm:$0xff] %v4351_v25  ;;  %v4274_v31 = vpop.f32.mrf.mxu0  ;;  %v7534_v25 = vld [vmem:[#allocation55_spill] sm:$0xff] }
0x12e8   :  { %4423 = vst [vmem:[#allocation1 + $0x3] ss:$9 sm:$0xff] %v4352_v17  ;;  %v4275_v14 = vadd.f32 %v7020_v21, %v4274_v31  ;;  %v7535_v17 = vld [vmem:[#allocation56_spill] sm:$0xff] }
0x12e9   :  { %4425 = vst [vmem:[#allocation1 + $0x4] ss:$9 sm:$0xff] %v4353_v19  ;;  %v7536_v19 = vld [vmem:[#allocation59_spill] sm:$0xff] }
0x12ea   :  { %4427 = vst [vmem:[#allocation1 + $0x5] ss:$9 sm:$0xff] %v4354_v11  ;;  %v4298_v49 = vrot.slane %v4275_v14, 1  ;;  %v4299_v39 = vrot.slane %v4275_v14, 2  ;;  %v4300_v37 = vrot.slane %v4275_v14, 3  ;;  %v4301_v30 = vrot.slane %v4275_v14, 4 }
0x12eb   :  { %4429 = vst [vmem:[#allocation1 + $0x6] ss:$9 sm:$0xff] %v4355_v16  ;;  %v4302_v3 = vrot.slane %v4275_v14, 5  ;;  %v4303_v18 = vrot.slane %v4275_v14, 6  ;;  %v4357_v34 = vadd.f32 %v4275_v14, %v7521_v32  ;;  %v4304_v36 = vrot.slane %v4275_v14, 7  ;;  %v7537_v14 = vld [vmem:[#allocation57_spill] sm:$0xff] }
0x12ec   :  { %4431 = vst [vmem:[#allocation1 + $0x7] ss:$9 sm:$0xff] %v4356_v13  ;;  %v4358_v9 = vadd.f32 %v4298_v49, %v7520_v28  ;;  %v4359_v54 = vadd.f32 %v4299_v39, %v7522_v44  ;;  %v4360_v42 = vadd.f32 %v4300_v37, %v7523_v46  ;;  %v4361_v4 = vadd.f32 %v4301_v30, %v7524_v55  ;;  %v7538_v37 = vld [vmem:[#allocation60_spill] sm:$0xff]  ;;  %v7540_v32 = vld [vmem:[#allocation62_spill] sm:$0xff]  ;;  %v7541_v44 = vld [vmem:[#allocation63_spill] sm:$0xff] }
0x12ed   :  { %v4362_v24 = vadd.f32 %v4302_v3, %v7525_v60  ;;  %v4363_v7 = vadd.f32 %v4303_v18, %v7526_v0  ;;  %v4364_v1 = vadd.f32 %v4304_v36, %v7527_v57  ;;  %v7542_v36 = vld [vmem:[#allocation69_spill] sm:$0xff] }
0x12f3   :  { %v4432_v6 = vld [vmem:[#allocation1] sm:$0xff] }
0x12f4   :  { %4470 = vst.msk [vmem:[%s7098_s13] sm:$0xff] %vm164_vm0, %v4432_v6 }
0x12f5   :  { %4433 = vst [vmem:[#allocation1] ss:$9 sm:$0xff] %v4357_v34 }
0x12f6   :  { %4434 = vst [vmem:[#allocation1 + $0x1] ss:$9 sm:$0xff] %v4358_v9  ;;  %v7539_v9 = vld [vmem:[#allocation61_spill] sm:$0xff] }
0x12f7   :  { %4435 = vst [vmem:[#allocation1 + $0x2] ss:$9 sm:$0xff] %v4359_v54 }
0x12f8   :  { %4436 = vst [vmem:[#allocation1 + $0x3] ss:$9 sm:$0xff] %v4360_v42  ;;  %v7543_v42 = vld [vmem:[#allocation70_spill] sm:$0xff] }
0x12f9   :  { %4437 = vst [vmem:[#allocation1 + $0x4] ss:$9 sm:$0xff] %v4361_v4  ;;  %v7544_v4 = vld [vmem:[#allocation71_spill] sm:$0xff] }
0x12fa   :  { %4438 = vst [vmem:[#allocation1 + $0x5] ss:$9 sm:$0xff] %v4362_v24  ;;  %v7545_v24 = vld [vmem:[#allocation58_spill] sm:$0xff] }
0x12fb   :  { %4439 = vst [vmem:[#allocation1 + $0x6] ss:$9 sm:$0xff] %v4363_v7 }
0x12fc   :  { %4440 = vst [vmem:[#allocation1 + $0x7] ss:$9 sm:$0xff] %v4364_v1 }
0x1301   :  { %v4277_v10 = vpop.f32.mrf.mxu0 }
0x1302   :  { %v4278_v40 = vadd.f32 %v7020_v21, %v4277_v10 }
0x1303   :  { %v4441_v50 = vld [vmem:[#allocation1] sm:$0xff] }
0x1304   :  { %4471 = vst.msk [vmem:[%s7098_s13 + $0x8] sm:$0xff] %vm164_vm0, %v4441_v50  ;;  %v4365_v56 = vadd.f32 %v4278_v40, %v7528_v5  ;;  %v4305_v35 = vrot.slane %v4278_v40, 1  ;;  %v4306_v15 = vrot.slane %v4278_v40, 2  ;;  %v4307_v38 = vrot.slane %v4278_v40, 3 }
0x1305   :  { %v4308_v20 = vrot.slane %v4278_v40, 4  ;;  %v4309_v23 = vrot.slane %v4278_v40, 5  ;;  %v4310_v27 = vrot.slane %v4278_v40, 6  ;;  %v4311_v58 = vrot.slane %v4278_v40, 7 }
0x1306   :  { %4442 = vst [vmem:[#allocation1] ss:$9 sm:$0xff] %v4365_v56  ;;  %v4366_v43 = vadd.f32 %v4305_v35, %v7529_v33  ;;  %v4367_v48 = vadd.f32 %v4306_v15, %v7530_v51  ;;  %v4368_v12 = vadd.f32 %v4307_v38, %v7531_v22 }
0x1307   :  { %v4369_v29 = vadd.f32 %v4308_v20, %v7532_v62  ;;  %v4370_v8 = vadd.f32 %v4309_v23, %v7533_v61  ;;  %v4371_v2 = vadd.f32 %v4310_v27, %v7534_v25  ;;  %v4372_v52 = vadd.f32 %v4311_v58, %v7535_v17 }
0x1309   :  { %v4279_v53 = vpop.f32.mrf.mxu0 }
0x130a   :  { %v4280_v26 = vadd.f32 %v7020_v21, %v4279_v53 }
0x130c   :  { %v4373_v45 = vadd.f32 %v4280_v26, %v7536_v19  ;;  %v4312_v11 = vrot.slane %v4280_v26, 1  ;;  %v4313_v16 = vrot.slane %v4280_v26, 2  ;;  %v4314_v31 = vrot.slane %v4280_v26, 3 }
0x130d   :  { %v4443_v47 = vld [vmem:[#allocation1] sm:$0xff]  ;;  %v4315_v59 = vrot.slane %v4280_v26, 4  ;;  %v4316_v13 = vrot.slane %v4280_v26, 5  ;;  %v4317_v39 = vrot.slane %v4280_v26, 6  ;;  %v4318_v28 = vrot.slane %v4280_v26, 7 }
0x130e   :  { %4444 = vst [vmem:[#allocation1] ss:$9 sm:$0xff] %v4366_v43  ;;  %v4374_v49 = vadd.f32 %v4312_v11, %v7537_v14  ;;  %v4375_v30 = vadd.f32 %v4313_v16, %v7538_v37  ;;  %v4376_v6 = vadd.f32 %v4314_v31, %v7539_v9 }
0x130f   :  { %4445 = vst [vmem:[#allocation1 + $0x1] ss:$9 sm:$0xff] %v4367_v48  ;;  %v4377_v34 = vadd.f32 %v4315_v59, %v7540_v32  ;;  %v4378_v54 = vadd.f32 %v4316_v13, %v7541_v44  ;;  %v4379_v46 = vadd.f32 %v4317_v39, %v7542_v36  ;;  %v4380_v55 = vadd.f32 %v4318_v28, %v7543_v42 }
0x1310   :  { %4446 = vst [vmem:[#allocation1 + $0x2] ss:$9 sm:$0xff] %v4368_v12 }
0x1311   :  { %v4282_v63 = vpop.f32.mrf.mxu0  ;;  %4447 = vst [vmem:[#allocation1 + $0x3] ss:$9 sm:$0xff] %v4369_v29 }
0x1312   :  { %4448 = vst [vmem:[#allocation1 + $0x4] ss:$9 sm:$0xff] %v4370_v8  ;;  %v4283_v18 = vadd.f32 %v7020_v21, %v4282_v63 }
0x1313   :  { %4449 = vst [vmem:[#allocation1 + $0x5] ss:$9 sm:$0xff] %v4371_v2 }
0x1314   :  { %4450 = vst [vmem:[#allocation1 + $0x6] ss:$9 sm:$0xff] %v4372_v52  ;;  %v4381_v60 = vadd.f32 %v4283_v18, %v7544_v4  ;;  %v4319_v21 = vrot.slane %v4283_v18, 1 }
0x1315   :  { %4473 = vst.msk [vmem:[%s7098_s13 + $0x10] sm:$0x1] %vm4472_vm5, %v4443_v47 }
0x1316   :  { %4451 = vst [vmem:[#allocation1 + $0x7] ss:$9 sm:$0xff] %v4373_v45  ;;  %v4382_v0 = vadd.f32 %v4319_v21, %v7545_v24 }
0x1319   :  { %v4284_v41 = vpop.f32.mrf.mxu0 }
0x131d   :  { %v4452_v3 = vld [vmem:[#allocation1] sm:$0xff] }
0x131e   :  { %4453 = vst [vmem:[#allocation1] ss:$9 sm:$0xff] %v4374_v49 }
0x131f   :  { %4454 = vst [vmem:[#allocation1 + $0x1] ss:$9 sm:$0xff] %v4375_v30 }
0x1320   :  { %4455 = vst [vmem:[#allocation1 + $0x2] ss:$9 sm:$0xff] %v4376_v6 }
0x1321   :  { %4456 = vst [vmem:[#allocation1 + $0x3] ss:$9 sm:$0xff] %v4377_v34 }
0x1322   :  { %4457 = vst [vmem:[#allocation1 + $0x4] ss:$9 sm:$0xff] %v4378_v54 }
0x1323   :  { %4458 = vst [vmem:[#allocation1 + $0x5] ss:$9 sm:$0xff] %v4379_v46 }
0x1324   :  { %4459 = vst [vmem:[#allocation1 + $0x6] ss:$9 sm:$0xff] %v4380_v55 }
0x1325   :  { %4474 = vst.msk [vmem:[%s7098_s13 + $0x18] sm:$0xff] %vm164_vm0, %v4452_v3 }
0x1326   :  { %4460 = vst [vmem:[#allocation1 + $0x7] ss:$9 sm:$0xff] %v4381_v60 }
0x132d   :  { %v4461_v7 = vld [vmem:[#allocation1] sm:$0xff] }
0x132e   :  { %4462 = vst [vmem:[#allocation1] ss:$9 sm:$0xff] %v4382_v0 }
0x132f   :  { %4475 = vst.msk [vmem:[%s7098_s13 + $0x20] sm:$0xff] %vm164_vm0, %v4461_v7 }
0x1335   :  { %v4463_v57 = vld [vmem:[#allocation1] sm:$0xff] }
0x1336   :  { %4476 = vst.msk [vmem:[%s7098_s13 + $0x28] sm:$0x1] %vm4472_vm5, %v4463_v57 }

</bundles_post_ra>
